<compile_context>
chip_gen: v7x
topology: tpu7x:2x2x1
jax: 0.10.0
libtpu: 0.0.40
codegen_flags: <defaults>
</compile_context>

<pallas_src>
import functools
import math

import jax
import jax.numpy as jnp
from jax.experimental import pallas as pl
from jax.experimental.pallas import tpu as pltpu


def _vmem_limit_bytes():
    """Half of physical VMEM (64 MiB on v5e/v6e, 32 MiB on v7x), capped at 96 MiB."""
    cap = 128 * 1024 * 1024
    try:
        info = pltpu.get_tpu_info()
        cap = int(getattr(info, "vmem_capacity_bytes", cap))
    except Exception:
        pass
    return int(min(cap // 2, 96 * 1024 * 1024))


_VMEM_LIMIT = _vmem_limit_bytes()


def _pick_tile(dim, candidates, align=8):
    """Largest candidate dividing `dim`; full dim for small shapes; otherwise the
    largest `align`-multiple divisor (never an oversized / misaligned block)."""
    for c in candidates:
        if dim % c == 0:
            return c
    cap = max(candidates)
    if dim <= cap:
        return dim                      # full-extent block: always layout-legal
    start = (min(dim, cap) // align) * align
    for c in range(start, 0, -align):
        if dim % c == 0:
            return c
    return dim                          # last resort (full dim)


def _gelu_tanh(x):
    # PyTorch nn.GELU(approximate='tanh')
    c = 0.7978845608028654  # sqrt(2/pi)
    return 0.5 * x * (1.0 + jnp.tanh(c * (x + 0.044715 * x * x * x)))


# ---------------------------------------------------------------------------
# Standalone LayerNorm kernel (only used on the tiled fallback path)
# ---------------------------------------------------------------------------
def _layernorm_kernel(x_ref, g_ref, b_ref, o_ref, *, eps):
    x = x_ref[...].astype(jnp.float32)
    mu = jnp.mean(x, axis=-1, keepdims=True)
    xc = x - mu
    var = jnp.mean(xc * xc, axis=-1, keepdims=True)
    inv = jax.lax.rsqrt(var + eps)
    y = xc * inv * g_ref[...].astype(jnp.float32) + b_ref[...].astype(jnp.float32)
    o_ref[...] = y.astype(o_ref.dtype)


def pallas_layernorm(x2d, gamma, beta, *, eps=1e-5, out_dtype=jnp.bfloat16):
    M, C = x2d.shape
    tm = _pick_tile(M, (1024, 512, 256, 128))
    return pl.pallas_call(
        functools.partial(_layernorm_kernel, eps=eps),
        out_shape=jax.ShapeDtypeStruct((M, C), out_dtype),
        grid=(M // tm,),
        in_specs=[
            pl.BlockSpec((tm, C), lambda i: (i, 0)),
            pl.BlockSpec((1, C), lambda i: (0, 0)),
            pl.BlockSpec((1, C), lambda i: (0, 0)),
        ],
        out_specs=pl.BlockSpec((tm, C), lambda i: (i, 0)),
        compiler_params=pltpu.CompilerParams(
            dimension_semantics=("parallel",),
            vmem_limit_bytes=_VMEM_LIMIT,
        ),
    )(x2d, gamma.reshape(1, C), beta.reshape(1, C))


# ---------------------------------------------------------------------------
# Fused (optional LayerNorm) + weight-resident linear kernel.
# Grid is rows-only; the weight block index is constant -> DMA'd once.
# Epilogue fuses bias + optional tanh-GELU + optional f32 residual add.
# ---------------------------------------------------------------------------
def _fused_ln_linear_kernel(*refs, activation, has_ln, has_residual, eps):
    idx = 0
    x_ref = refs[idx]; idx += 1
    w_ref = refs[idx]; idx += 1
    b_ref = refs[idx]; idx += 1
    if has_ln:
        g_ref = refs[idx]; idx += 1
        bt_ref = refs[idx]; idx += 1
    if has_residual:
        r_ref = refs[idx]; idx += 1
    o_ref = refs[idx]

    if has_ln:
        x = x_ref[...].astype(jnp.float32)
        mu = jnp.mean(x, axis=-1, keepdims=True)
        xc = x - mu
        var = jnp.mean(xc * xc, axis=-1, keepdims=True)
        inv = jax.lax.rsqrt(var + eps)
        xn = xc * inv * g_ref[...].astype(jnp.float32) + bt_ref[...].astype(jnp.float32)
        xb = xn.astype(jnp.bfloat16)          # MXU-native inputs
    else:
        xb = x_ref[...]                       # already bf16

    y = jnp.dot(xb, w_ref[...], preferred_element_type=jnp.float32)
    y = y + b_ref[...].astype(jnp.float32)
    if activation == "gelu":
        y = _gelu_tanh(y)
    if has_residual:
        y = y + r_ref[...].astype(jnp.float32)
    o_ref[...] = y.astype(o_ref.dtype)


# ---------------------------------------------------------------------------
# 3-axis tiled fallback (K split, f32 VMEM accumulator) for weights that do
# not fit VMEM-resident (e.g. very large C on v7x's 64 MiB VMEM).
# ---------------------------------------------------------------------------
def _linear_tiled_kernel(x_ref, w_ref, b_ref, *rest, activation, has_residual):
    if has_residual:
        r_ref, o_ref, acc_ref = rest
    else:
        o_ref, acc_ref = rest

    @pl.when(pl.program_id(2) == 0)
    def _init():
        acc_ref[...] = jnp.zeros_like(acc_ref)

    acc_ref[...] += jnp.dot(x_ref[...], w_ref[...],
                            preferred_element_type=jnp.float32)

    @pl.when(pl.program_id(2) == pl.num_programs(2) - 1)
    def _finalize():
        y = acc_ref[...] + b_ref[...].astype(jnp.float32)
        if activation == "gelu":
            y = _gelu_tanh(y)
        if has_residual:
            y = y + r_ref[...].astype(jnp.float32)
        o_ref[...] = y.astype(o_ref.dtype)


def _pallas_linear_tiled(x2d, w_bf, b_f, *, residual=None, activation=None,
                         out_dtype=jnp.bfloat16):
    M, K = x2d.shape
    _, N = w_bf.shape
    x2d = x2d.astype(jnp.bfloat16)
    tm = _pick_tile(M, (512, 256, 128))
    tn = _pick_tile(N, (512, 256, 128), align=128)
    tk = _pick_tile(K, (512, 256, 128), align=128)
    grid = (M // tm, N // tn, K // tk)      # K (reduction) last, "arbitrary"

    in_specs = [
        pl.BlockSpec((tm, tk), lambda i, j, k: (i, k)),
        pl.BlockSpec((tk, tn), lambda i, j, k: (k, j)),
        pl.BlockSpec((1, tn), lambda i, j, k: (0, j)),
    ]
    args = [x2d, w_bf, b_f]
    if residual is not None:
        in_specs.append(pl.BlockSpec((tm, tn), lambda i, j, k: (i, j)))
        args.append(residual)

    kernel = functools.partial(_linear_tiled_kernel, activation=activation,
                               has_residual=residual is not None)
    return pl.pallas_call(
        kernel,
        out_shape=jax.ShapeDtypeStruct((M, N), out_dtype),
        grid=grid,
        in_specs=in_specs,
        out_specs=pl.BlockSpec((tm, tn), lambda i, j, k: (i, j)),
        scratch_shapes=[pltpu.VMEM((tm, tn), jnp.float32)],
        compiler_params=pltpu.CompilerParams(
            dimension_semantics=("parallel", "parallel", "arbitrary"),
            vmem_limit_bytes=_VMEM_LIMIT,
        ),
    )(*args)


def pallas_ln_linear(x2d, w, b, *, gamma=None, beta=None, residual=None,
                     activation=None, eps=1e-5, out_dtype=jnp.bfloat16):
    """y = (LN(x) if gamma else x) @ W + b  [+ gelu] [+ residual]."""
    M, K = x2d.shape
    K2, N = w.shape
    assert K == K2
    has_ln = gamma is not None
    has_res = residual is not None

    w_bf = w.astype(jnp.bfloat16)
    b_f = b.reshape(1, N).astype(jnp.float32)

    in_itemsize = 4 if (has_ln or x2d.dtype == jnp.float32) else 2
    out_itemsize = jnp.dtype(out_dtype).itemsize

    def resident_fits(tm):
        total = (2 * tm * K * in_itemsize                 # x (double-buffered)
                 + 2 * K * N * 2                          # bf16 weight
                 + 2 * N * 4                              # bias
                 + (2 * 2 * K * 4 if has_ln else 0)       # gamma + beta
                 + (2 * tm * N * 4 if has_res else 0)     # f32 residual
                 + 2 * tm * N * out_itemsize)             # output
        return total <= int(0.7 * _VMEM_LIMIT)

    tm = None
    for c in (512, 256, 128, 64, 32, 16, 8):
        if M % c == 0 and resident_fits(c):
            tm = c
            break
    if tm is None and M < 8 and resident_fits(M):
        tm = M

    if tm is None:
        # VMEM-resident weight infeasible (v7x gate) -> standalone LN + K-split.
        if has_ln:
            x2d = pallas_layernorm(x2d, gamma, beta, eps=eps,
                                   out_dtype=jnp.bfloat16)
        return _pallas_linear_tiled(x2d, w_bf, b_f, residual=residual,
                                    activation=activation, out_dtype=out_dtype)

    if not has_ln:
        x2d = x2d.astype(jnp.bfloat16)

    in_specs = [
        pl.BlockSpec((tm, K), lambda i: (i, 0)),
        pl.BlockSpec((K, N), lambda i: (0, 0)),      # constant -> DMA'd once
        pl.BlockSpec((1, N), lambda i: (0, 0)),
    ]
    args = [x2d, w_bf, b_f]
    if has_ln:
        in_specs += [pl.BlockSpec((1, K), lambda i: (0, 0)),
                     pl.BlockSpec((1, K), lambda i: (0, 0))]
        args += [gamma.reshape(1, K).astype(jnp.float32),
                 beta.reshape(1, K).astype(jnp.float32)]
    if has_res:
        in_specs.append(pl.BlockSpec((tm, N), lambda i: (i, 0)))
        args.append(residual)

    kernel = functools.partial(_fused_ln_linear_kernel, activation=activation,
                               has_ln=has_ln, has_residual=has_res, eps=eps)
    return pl.pallas_call(
        kernel,
        out_shape=jax.ShapeDtypeStruct((M, N), out_dtype),
        grid=(M // tm,),
        in_specs=in_specs,
        out_specs=pl.BlockSpec((tm, N), lambda i: (i, 0)),
        compiler_params=pltpu.CompilerParams(
            dimension_semantics=("parallel",),
            vmem_limit_bytes=_VMEM_LIMIT,
        ),
    )(*args)


# ---------------------------------------------------------------------------
# Flash attention: grid (B, T//tq, T//tk), online softmax in VMEM scratch.
# q/k/v sliced out of the fused (B, T, 3C) qkv tensor by BlockSpec index maps;
# skipped causal key tiles are not re-fetched (index clamp); mask only on the
# diagonal tile; per-head results packed into one full-lane-width (tq, C) acc.
# The 1/sqrt(head_dim) scale is pre-folded into the c_attn q weights.
# ---------------------------------------------------------------------------
def _flash_attn_kernel(q_ref, k_ref, v_ref, o_ref, m_ref, l_ref, acc_ref,
                       *, n_head, head_dim, tq, tk):
    qi = pl.program_id(1)
    ki = pl.program_id(2)

    @pl.when(ki == 0)
    def _init():
        m_ref[...] = jnp.full_like(m_ref, -1e30)
        l_ref[...] = jnp.zeros_like(l_ref)
        acc_ref[...] = jnp.zeros_like(acc_ref)

    def step(apply_mask):
        if apply_mask:
            row = qi * tq + jax.lax.broadcasted_iota(jnp.int32, (tq, tk), 0)
            col = ki * tk + jax.lax.broadcasted_iota(jnp.int32, (tq, tk), 1)
            causal = col <= row
        pv_parts, alpha_parts = [], []
        # TODO(synk): for large n_head (e.g. 12) move head-pairs onto a parallel
        # grid axis instead of fully unrolling (vreg pressure / basic-block size).
        for h in range(n_head):
            sl = slice(h * head_dim, (h + 1) * head_dim)
            q = q_ref[:, sl]
            k = k_ref[:, sl]
            v = v_ref[:, sl]
            s = jax.lax.dot_general(                 # q @ k^T, f32 accumulation
                q, k, (((1,), (1,)), ((), ())),
                preferred_element_type=jnp.float32)
            if apply_mask:
                s = jnp.where(causal, s, -1e30)
            m_prev = m_ref[h]
            m_new = jnp.maximum(m_prev, jnp.max(s, axis=-1, keepdims=True))
            alpha = jnp.exp(m_prev - m_new)
            p = jnp.exp(s - m_new)
            l_ref[h] = alpha * l_ref[h] + jnp.sum(p, axis=-1, keepdims=True)
            m_ref[h] = m_new
            pv_parts.append(jnp.dot(p.astype(jnp.bfloat16), v,
                                    preferred_element_type=jnp.float32))
            alpha_parts.append(jnp.broadcast_to(alpha, (tq, head_dim)))
        # Single full-lane-width accumulator update (128-lane dense ops/stores).
        pv = jnp.concatenate(pv_parts, axis=-1)
        alpha_full = jnp.concatenate(alpha_parts, axis=-1)
        acc_ref[...] = alpha_full * acc_ref[...] + pv

    # Interior key tiles (strictly in the past): no mask materialization.
    @pl.when(ki < qi)
    def _interior():
        step(apply_mask=False)

    # Diagonal tile: build/apply the causal mask. Future tiles (ki > qi) are
    # skipped entirely (and their DMA is elided via the clamped index map).
    @pl.when(ki == qi)
    def _diag():
        step(apply_mask=True)

    @pl.when(ki == pl.num_programs(2) - 1)
    def _finalize():
        inv_parts = [
            jnp.broadcast_to(pl.reciprocal(l_ref[h], approx=True),
                             (tq, head_dim))
            for h in range(n_head)
        ]
        inv = jnp.concatenate(inv_parts, axis=-1)
        o_ref[...] = (acc_ref[...] * inv).astype(o_ref.dtype)


def pallas_flash_attention(qkv, n_head, *, out_dtype=jnp.bfloat16):
    B, T, C3 = qkv.shape
    C = C3 // 3
    head_dim = C // n_head
    tq = _pick_tile(T, (256, 128))
    tk = tq                                    # required by the ki<=qi mask logic
    grid = (B, T // tq, T // tk)
    qkv = qkv.astype(jnp.bfloat16)

    kernel = functools.partial(
        _flash_attn_kernel, n_head=n_head, head_dim=head_dim, tq=tq, tk=tk)

    # `None` = squeezed batch dim; last-axis block index 0/1/2 selects the
    # q / k / v C-wide chunk of the fused qkv tensor.  The k/v index is clamped
    # to min(ki, qi): for causally-skipped future tiles the block index repeats,
    # so Pallas skips the DMA (no wasted K/V HBM traffic).
    q_spec = pl.BlockSpec((None, tq, C), lambda b, qi, ki: (b, qi, 0))
    k_spec = pl.BlockSpec((None, tk, C),
                          lambda b, qi, ki: (b, jnp.minimum(ki, qi), 1))
    v_spec = pl.BlockSpec((None, tk, C),
                          lambda b, qi, ki: (b, jnp.minimum(ki, qi), 2))

    return pl.pallas_call(
        kernel,
        out_shape=jax.ShapeDtypeStruct((B, T, C), out_dtype),
        grid=grid,
        in_specs=[q_spec, k_spec, v_spec],
        out_specs=pl.BlockSpec((None, tq, C), lambda b, qi, ki: (b, qi, 0)),
        scratch_shapes=[
            pltpu.VMEM((n_head, tq, 1), jnp.float32),   # running max m
            pltpu.VMEM((n_head, tq, 1), jnp.float32),   # running sum l
            pltpu.VMEM((tq, C), jnp.float32),           # packed output acc
        ],
        compiler_params=pltpu.CompilerParams(
            dimension_semantics=("parallel", "parallel", "arbitrary"),
            vmem_limit_bytes=_VMEM_LIMIT,
        ),
    )(qkv, qkv, qkv)


# ---------------------------------------------------------------------------
# Full Block forward: 5 pallas_calls
#   (LN1+c_attn fused) -> flash attention -> (c_proj + residual)
#   (LN2+c_fc+GELU fused) -> (c_fc_proj + residual)
# ---------------------------------------------------------------------------
def block_forward(x, params, n_head):
    B, T, C = x.shape
    M = B * T
    head_dim = C // n_head
    # Residual stream kept in f32 for accuracy (bf16 would halve its HBM traffic).
    xf = x.reshape(M, C).astype(jnp.float32)

    # Fold 1/sqrt(head_dim) into the q-third of the c_attn weights/bias so the
    # attention kernel does no per-tile scaling.
    scale = 1.0 / math.sqrt(head_dim)
    w_attn = jnp.concatenate([params["w_attn"][:, :C] * scale,
                              params["w_attn"][:, C:]], axis=1)
    b_attn = jnp.concatenate([params["b_attn"][:C] * scale,
                              params["b_attn"][C:]], axis=0)

    # --- x = x + attn(ln_1(x)) ---
    qkv = pallas_ln_linear(xf, w_attn, b_attn,
                           gamma=params["ln1_g"], beta=params["ln1_b"],
                           out_dtype=jnp.bfloat16)
    att = pallas_flash_attention(qkv.reshape(B, T, 3 * C), n_head)
    x1 = pallas_ln_linear(att.reshape(M, C), params["w_proj"], params["b_proj"],
                          residual=xf, out_dtype=jnp.float32)

    # --- x = x + mlp(ln_2(x)) ---
    ffn = pallas_ln_linear(x1, params["w_fc"], params["b_fc"],
                           gamma=params["ln2_g"], beta=params["ln2_b"],
                           activation="gelu", out_dtype=jnp.bfloat16)
    x2 = pallas_ln_linear(ffn, params["w_fc_proj"], params["b_fc_proj"],
                          residual=x1, out_dtype=jnp.float32)
    return x2.reshape(B, T, C)


# ---------------------------------------------------------------------------
# Pure-JAX f32 reference
# ---------------------------------------------------------------------------
def reference_block(x, params, n_head):
    def ln(v, g, b, eps=1e-5):
        mu = v.mean(-1, keepdims=True)
        var = ((v - mu) ** 2).mean(-1, keepdims=True)
        return (v - mu) / jnp.sqrt(var + eps) * g + b

    B, T, C = x.shape
    hd = C // n_head
    h = ln(x, params["ln1_g"], params["ln1_b"])
    qkv = h @ params["w_attn"] + params["b_attn"]
    q, k, v = jnp.split(qkv, 3, axis=-1)
    q = q.reshape(B, T, n_head, hd).transpose(0, 2, 1, 3)
    k = k.reshape(B, T, n_head, hd).transpose(0, 2, 1, 3)
    v = v.reshape(B, T, n_head, hd).transpose(0, 2, 1, 3)
    s = jnp.einsum("bhqd,bhkd->bhqk", q, k) / math.sqrt(hd)
    mask = jnp.tril(jnp.ones((T, T), dtype=bool))
    s = jnp.where(mask, s, -jnp.inf)
    p = jax.nn.softmax(s, axis=-1)
    y = jnp.einsum("bhqk,bhkd->bhqd", p, v)
    y = y.transpose(0, 2, 1, 3).reshape(B, T, C)
    x = x + y @ params["w_proj"] + params["b_proj"]
    h2 = ln(x, params["ln2_g"], params["ln2_b"])
    ff = _gelu_tanh(h2 @ params["w_fc"] + params["b_fc"])
    x = x + ff @ params["w_fc_proj"] + params["b_fc_proj"]
    return x


if __name__ == "__main__":
    # Small but TPU-aligned shapes: B=2, T=16, n_embd=128, n_head=2 (hd=64).
    B, T, C, n_head = 2, 16, 128, 2

    key = jax.random.PRNGKey(0)
    keys = jax.random.split(key, 12)

    x = jax.random.normal(keys[0], (B, T, C), dtype=jnp.float32)

    params = {
        "ln1_g": 1.0 + 0.1 * jax.random.normal(keys[1], (C,), dtype=jnp.float32),
        "ln1_b": 0.1 * jax.random.normal(keys[2], (C,), dtype=jnp.float32),
        "w_attn": 0.02 * jax.random.normal(keys[3], (C, 3 * C), dtype=jnp.float32),
        "b_attn": 0.01 * jax.random.normal(keys[4], (3 * C,), dtype=jnp.float32),
        "w_proj": 0.02 * jax.random.normal(keys[5], (C, C), dtype=jnp.float32),
        "b_proj": 0.01 * jax.random.normal(keys[6], (C,), dtype=jnp.float32),
        "ln2_g": 1.0 + 0.1 * jax.random.normal(keys[7], (C,), dtype=jnp.float32),
        "ln2_b": 0.1 * jax.random.normal(keys[8], (C,), dtype=jnp.float32),
        "w_fc": 0.02 * jax.random.normal(keys[9], (C, 4 * C), dtype=jnp.float32),
        "b_fc": 0.01 * jax.random.normal(keys[10], (4 * C,), dtype=jnp.float32),
        "w_fc_proj": 0.02 * jax.random.normal(keys[11], (4 * C, C), dtype=jnp.float32),
        "b_fc_proj": jnp.zeros((C,), dtype=jnp.float32),
    }

    fwd = jax.jit(functools.partial(block_forward, n_head=n_head))
    y = fwd(x, params)
    jax.block_until_ready(y)

    y_ref = reference_block(x, params, n_head)
    assert y.shape == (B, T, C)
    max_err = float(jnp.max(jnp.abs(y - y_ref)))
    # bf16 MXU inputs + approx reciprocal => compare at bf16-level tolerance.
    assert jnp.allclose(y, y_ref, atol=3e-2, rtol=3e-2), (
        f"mismatch vs reference, max abs err = {max_err}")

    print("KERNEL_OK")
</pallas_src>

<mosaic_0001>
module attributes {stable_mosaic.version = 11 : i64} {
  func.func @_flash_attn_kernel(%arg0: i32, %arg1: i32, %arg2: i32, %arg3: memref<1x16x128xbf16, #tpu.memory_space<vmem>>, %arg4: memref<1x16x128xbf16, #tpu.memory_space<vmem>>, %arg5: memref<1x16x128xbf16, #tpu.memory_space<vmem>>, %arg6: memref<1x16x128xbf16, #tpu.memory_space<vmem>>, %arg7: memref<2x16x1xf32, #tpu.memory_space<vmem>>, %arg8: memref<2x16x1xf32, #tpu.memory_space<vmem>>, %arg9: memref<16x128xf32, #tpu.memory_space<vmem>>) attributes {dimension_semantics = [#tpu.dimension_semantics<parallel>, #tpu.dimension_semantics<parallel>, #tpu.dimension_semantics<arbitrary>], iteration_bounds = array<i64: 2, 1, 1>, scalar_prefetch = 0 : i64, scratch_operands = 3 : i64, tpu.core_type = #tpu.core_type<tc>, window_params = [{transform_indices = @transform_0, window_bounds = array<i64: 1, 16, 128>}, {transform_indices = @transform_1, window_bounds = array<i64: 1, 16, 128>}, {transform_indices = @transform_2, window_bounds = array<i64: 1, 16, 128>}, {transform_indices = @transform_3, window_bounds = array<i64: 1, 16, 128>}]} {
    %c0_i32 = arith.constant 0 : i32
    %0 = arith.cmpi eq, %arg2, %c0_i32 : i32
    %1 = arith.extui %0 : i1 to i32
    %c0_i32_0 = arith.constant 0 : i32
    %2 = arith.cmpi ne, %1, %c0_i32_0 : i32
    scf.if %2 {
      %cst = arith.constant -1.000000e+30 : f32
      %12 = vector.broadcast %cst : f32 to vector<2x16x1xf32>
      %c0 = arith.constant 0 : index
      %c0_5 = arith.constant 0 : index
      %c0_6 = arith.constant 0 : index
      %13 = vector.load %arg7[%c0, %c0_5, %c0_6] : memref<2x16x1xf32, #tpu.memory_space<vmem>>, vector<2x16x1xf32>
      tpu.vector_store %arg7[%c0, %c0_5, %c0_6], %12 {strides = array<i32>} : memref<2x16x1xf32, #tpu.memory_space<vmem>>, vector<2x16x1xf32>,
      %cst_7 = arith.constant 0.000000e+00 : f32
      %14 = vector.broadcast %cst_7 : f32 to vector<2x16x1xf32>
      %c0_8 = arith.constant 0 : index
      %c0_9 = arith.constant 0 : index
      %c0_10 = arith.constant 0 : index
      %15 = vector.load %arg8[%c0_8, %c0_9, %c0_10] : memref<2x16x1xf32, #tpu.memory_space<vmem>>, vector<2x16x1xf32>
      tpu.vector_store %arg8[%c0_8, %c0_9, %c0_10], %14 {strides = array<i32>} : memref<2x16x1xf32, #tpu.memory_space<vmem>>, vector<2x16x1xf32>,
      %cst_11 = arith.constant 0.000000e+00 : f32
      %16 = vector.broadcast %cst_11 : f32 to vector<16x128xf32>
      %c0_12 = arith.constant 0 : index
      %c0_13 = arith.constant 0 : index
      %17 = vector.load %arg9[%c0_12, %c0_13] : memref<16x128xf32, #tpu.memory_space<vmem>>, vector<16x128xf32>
      tpu.vector_store %arg9[%c0_12, %c0_13], %16 {strides = array<i32>} : memref<16x128xf32, #tpu.memory_space<vmem>>, vector<16x128xf32>,
    } else {
    }
    %3 = arith.cmpi slt, %arg2, %arg1 : i32
    %4 = arith.extui %3 : i1 to i32
    %c0_i32_1 = arith.constant 0 : i32
    %5 = arith.cmpi ne, %4, %c0_i32_1 : i32
    scf.if %5 {
      %c0 = arith.constant 0 : index
      %c0_5 = arith.constant 0 : index
      %c0_6 = arith.constant 0 : index
      %12 = vector.load %arg3[%c0, %c0_5, %c0_6] : memref<1x16x128xbf16, #tpu.memory_space<vmem>>, vector<1x16x64xbf16>
      %13 = vector.shape_cast %12 : vector<1x16x64xbf16> to vector<16x64xbf16>
      %c0_7 = arith.constant 0 : index
      %c0_8 = arith.constant 0 : index
      %c0_9 = arith.constant 0 : index
      %14 = vector.load %arg4[%c0_7, %c0_8, %c0_9] : memref<1x16x128xbf16, #tpu.memory_space<vmem>>, vector<1x16x64xbf16>
      %15 = vector.shape_cast %14 : vector<1x16x64xbf16> to vector<16x64xbf16>
      %c0_10 = arith.constant 0 : index
      %c0_11 = arith.constant 0 : index
      %c0_12 = arith.constant 0 : index
      %16 = vector.load %arg5[%c0_10, %c0_11, %c0_12] : memref<1x16x128xbf16, #tpu.memory_space<vmem>>, vector<1x16x64xbf16>
      %17 = vector.shape_cast %16 : vector<1x16x64xbf16> to vector<16x64xbf16>
      %cst = arith.constant dense<0.000000e+00> : vector<16x16xf32>
      %18 = tpu.matmul %13, %15, %cst {dimension_numbers = #tpu.dot_dimension_numbers<[1], [1], [0], [0], [0, 0, 1, 0], [], []>} : vector<16x64xbf16>, vector<16x64xbf16>, vector<16x16xf32> -> vector<16x16xf32>
      %c0_13 = arith.constant 0 : index
      %c0_14 = arith.constant 0 : index
      %c0_15 = arith.constant 0 : index
      %19 = vector.load %arg7[%c0_13, %c0_14, %c0_15] : memref<2x16x1xf32, #tpu.memory_space<vmem>>, vector<1x16x1xf32>
      %20 = vector.shape_cast %19 : vector<1x16x1xf32> to vector<16x1xf32>
      %cst_16 = arith.constant dense<0xFF800000> : vector<16xf32>
      %21 = vector.multi_reduction <maximumf>, %18, %cst_16 [1] : vector<16x16xf32> to vector<16xf32>
      %22 = vector.shape_cast %21 : vector<16xf32> to vector<16x1xf32>
      %23 = arith.maximumf %20, %22 : vector<16x1xf32>
      %24 = arith.subf %20, %23 : vector<16x1xf32>
      %25 = math.exp %24 : vector<16x1xf32>
      %26 = vector.broadcast %23 : vector<16x1xf32> to vector<16x16xf32>
      %27 = arith.subf %18, %26 : vector<16x16xf32>
      %28 = math.exp %27 : vector<16x16xf32>
      %c0_17 = arith.constant 0 : index
      %c0_18 = arith.constant 0 : index
      %c0_19 = arith.constant 0 : index
      %29 = vector.load %arg8[%c0_17, %c0_18, %c0_19] : memref<2x16x1xf32, #tpu.memory_space<vmem>>, vector<1x16x1xf32>
      %30 = vector.shape_cast %29 : vector<1x16x1xf32> to vector<16x1xf32>
      %31 = arith.mulf %25, %30 : vector<16x1xf32>
      %cst_20 = arith.constant dense<0.000000e+00> : vector<16xf32>
      %32 = vector.multi_reduction <add>, %28, %cst_20 [1] : vector<16x16xf32> to vector<16xf32>
      %33 = vector.shape_cast %32 : vector<16xf32> to vector<16x1xf32>
      %34 = arith.addf %31, %33 : vector<16x1xf32>
      %c0_21 = arith.constant 0 : index
      %c0_22 = arith.constant 0 : index
      %c0_23 = arith.constant 0 : index
      %35 = vector.load %arg8[%c0_21, %c0_22, %c0_23] : memref<2x16x1xf32, #tpu.memory_space<vmem>>, vector<1x16x1xf32>
      %36 = vector.shape_cast %35 : vector<1x16x1xf32> to vector<16x1xf32>
      %37 = vector.shape_cast %34 : vector<16x1xf32> to vector<1x16x1xf32>
      tpu.vector_store %arg8[%c0_21, %c0_22, %c0_23], %37 {strides = array<i32>} : memref<2x16x1xf32, #tpu.memory_space<vmem>>, vector<1x16x1xf32>,
      %c0_24 = arith.constant 0 : index
      %c0_25 = arith.constant 0 : index
      %c0_26 = arith.constant 0 : index
      %38 = vector.load %arg7[%c0_24, %c0_25, %c0_26] : memref<2x16x1xf32, #tpu.memory_space<vmem>>, vector<1x16x1xf32>
      %39 = vector.shape_cast %38 : vector<1x16x1xf32> to vector<16x1xf32>
      %40 = vector.shape_cast %23 : vector<16x1xf32> to vector<1x16x1xf32>
      tpu.vector_store %arg7[%c0_24, %c0_25, %c0_26], %40 {strides = array<i32>} : memref<2x16x1xf32, #tpu.memory_space<vmem>>, vector<1x16x1xf32>,
      %41 = arith.truncf %28 : vector<16x16xf32> to vector<16x16xbf16>
      %cst_27 = arith.constant dense<0.000000e+00> : vector<16x64xf32>
      %42 = tpu.matmul %41, %17, %cst_27 {dimension_numbers = #tpu.dot_dimension_numbers<[1], [0], [0], [1], [0, 0, 1, 1], [], []>} : vector<16x16xbf16>, vector<16x64xbf16>, vector<16x64xf32> -> vector<16x64xf32>
      %43 = vector.shape_cast %25 : vector<16x1xf32> to vector<16x1xf32>
      %44 = vector.broadcast %43 : vector<16x1xf32> to vector<16x64xf32>
      %c0_28 = arith.constant 0 : index
      %c0_29 = arith.constant 0 : index
      %c64 = arith.constant 64 : index
      %45 = vector.load %arg3[%c0_28, %c0_29, %c64] : memref<1x16x128xbf16, #tpu.memory_space<vmem>>, vector<1x16x64xbf16>
      %46 = vector.shape_cast %45 : vector<1x16x64xbf16> to vector<16x64xbf16>
      %c0_30 = arith.constant 0 : index
      %c0_31 = arith.constant 0 : index
      %c64_32 = arith.constant 64 : index
      %47 = vector.load %arg4[%c0_30, %c0_31, %c64_32] : memref<1x16x128xbf16, #tpu.memory_space<vmem>>, vector<1x16x64xbf16>
      %48 = vector.shape_cast %47 : vector<1x16x64xbf16> to vector<16x64xbf16>
      %c0_33 = arith.constant 0 : index
      %c0_34 = arith.constant 0 : index
      %c64_35 = arith.constant 64 : index
      %49 = vector.load %arg5[%c0_33, %c0_34, %c64_35] : memref<1x16x128xbf16, #tpu.memory_space<vmem>>, vector<1x16x64xbf16>
      %50 = vector.shape_cast %49 : vector<1x16x64xbf16> to vector<16x64xbf16>
      %cst_36 = arith.constant dense<0.000000e+00> : vector<16x16xf32>
      %51 = tpu.matmul %46, %48, %cst_36 {dimension_numbers = #tpu.dot_dimension_numbers<[1], [1], [0], [0], [0, 0, 1, 0], [], []>} : vector<16x64xbf16>, vector<16x64xbf16>, vector<16x16xf32> -> vector<16x16xf32>
      %c1 = arith.constant 1 : index
      %c0_37 = arith.constant 0 : index
      %c0_38 = arith.constant 0 : index
      %52 = vector.load %arg7[%c1, %c0_37, %c0_38] : memref<2x16x1xf32, #tpu.memory_space<vmem>>, vector<1x16x1xf32>
      %53 = vector.shape_cast %52 : vector<1x16x1xf32> to vector<16x1xf32>
      %cst_39 = arith.constant dense<0xFF800000> : vector<16xf32>
      %54 = vector.multi_reduction <maximumf>, %51, %cst_39 [1] : vector<16x16xf32> to vector<16xf32>
      %55 = vector.shape_cast %54 : vector<16xf32> to vector<16x1xf32>
      %56 = arith.maximumf %53, %55 : vector<16x1xf32>
      %57 = arith.subf %53, %56 : vector<16x1xf32>
      %58 = math.exp %57 : vector<16x1xf32>
      %59 = vector.broadcast %56 : vector<16x1xf32> to vector<16x16xf32>
      %60 = arith.subf %51, %59 : vector<16x16xf32>
      %61 = math.exp %60 : vector<16x16xf32>
      %c1_40 = arith.constant 1 : index
      %c0_41 = arith.constant 0 : index
      %c0_42 = arith.constant 0 : index
      %62 = vector.load %arg8[%c1_40, %c0_41, %c0_42] : memref<2x16x1xf32, #tpu.memory_space<vmem>>, vector<1x16x1xf32>
      %63 = vector.shape_cast %62 : vector<1x16x1xf32> to vector<16x1xf32>
      %64 = arith.mulf %58, %63 : vector<16x1xf32>
      %cst_43 = arith.constant dense<0.000000e+00> : vector<16xf32>
      %65 = vector.multi_reduction <add>, %61, %cst_43 [1] : vector<16x16xf32> to vector<16xf32>
      %66 = vector.shape_cast %65 : vector<16xf32> to vector<16x1xf32>
      %67 = arith.addf %64, %66 : vector<16x1xf32>
      %c1_44 = arith.constant 1 : index
      %c0_45 = arith.constant 0 : index
      %c0_46 = arith.constant 0 : index
      %68 = vector.load %arg8[%c1_44, %c0_45, %c0_46] : memref<2x16x1xf32, #tpu.memory_space<vmem>>, vector<1x16x1xf32>
      %69 = vector.shape_cast %68 : vector<1x16x1xf32> to vector<16x1xf32>
      %70 = vector.shape_cast %67 : vector<16x1xf32> to vector<1x16x1xf32>
      tpu.vector_store %arg8[%c1_44, %c0_45, %c0_46], %70 {strides = array<i32>} : memref<2x16x1xf32, #tpu.memory_space<vmem>>, vector<1x16x1xf32>,
      %c1_47 = arith.constant 1 : index
      %c0_48 = arith.constant 0 : index
      %c0_49 = arith.constant 0 : index
      %71 = vector.load %arg7[%c1_47, %c0_48, %c0_49] : memref<2x16x1xf32, #tpu.memory_space<vmem>>, vector<1x16x1xf32>
      %72 = vector.shape_cast %71 : vector<1x16x1xf32> to vector<16x1xf32>
      %73 = vector.shape_cast %56 : vector<16x1xf32> to vector<1x16x1xf32>
      tpu.vector_store %arg7[%c1_47, %c0_48, %c0_49], %73 {strides = array<i32>} : memref<2x16x1xf32, #tpu.memory_space<vmem>>, vector<1x16x1xf32>,
      %74 = arith.truncf %61 : vector<16x16xf32> to vector<16x16xbf16>
      %cst_50 = arith.constant dense<0.000000e+00> : vector<16x64xf32>
      %75 = tpu.matmul %74, %50, %cst_50 {dimension_numbers = #tpu.dot_dimension_numbers<[1], [0], [0], [1], [0, 0, 1, 1], [], []>} : vector<16x16xbf16>, vector<16x64xbf16>, vector<16x64xf32> -> vector<16x64xf32>
      %76 = vector.shape_cast %58 : vector<16x1xf32> to vector<16x1xf32>
      %77 = vector.broadcast %76 : vector<16x1xf32> to vector<16x64xf32>
      %78 = tpu.concatenate %42, %75 in 1 : vector<16x64xf32>, vector<16x64xf32> -> vector<16x128xf32>
      %79 = tpu.concatenate %44, %77 in 1 : vector<16x64xf32>, vector<16x64xf32> -> vector<16x128xf32>
      %c0_51 = arith.constant 0 : index
      %c0_52 = arith.constant 0 : index
      %80 = vector.load %arg9[%c0_51, %c0_52] : memref<16x128xf32, #tpu.memory_space<vmem>>, vector<16x128xf32>
      %81 = arith.mulf %79, %80 : vector<16x128xf32>
      %82 = arith.addf %81, %78 : vector<16x128xf32>
      %c0_53 = arith.constant 0 : index
      %c0_54 = arith.constant 0 : index
      %83 = vector.load %arg9[%c0_53, %c0_54] : memref<16x128xf32, #tpu.memory_space<vmem>>, vector<16x128xf32>
      tpu.vector_store %arg9[%c0_53, %c0_54], %82 {strides = array<i32>} : memref<16x128xf32, #tpu.memory_space<vmem>>, vector<16x128xf32>,
    } else {
    }
    %6 = arith.cmpi eq, %arg2, %arg1 : i32
    %7 = arith.extui %6 : i1 to i32
    %c0_i32_2 = arith.constant 0 : i32
    %8 = arith.cmpi ne, %7, %c0_i32_2 : i32
    scf.if %8 {
      %c16_i32 = arith.constant 16 : i32
      %12 = arith.muli %arg1, %c16_i32 : i32
      %13 = tpu.iota {dimensions = array<i32: 0>} : vector<16x16xi32>
      %14 = vector.broadcast %12 : i32 to vector<16x16xi32>
      %15 = arith.addi %14, %13 : vector<16x16xi32>
      %c16_i32_5 = arith.constant 16 : i32
      %16 = arith.muli %arg2, %c16_i32_5 : i32
      %17 = tpu.iota {dimensions = array<i32: 1>} : vector<16x16xi32>
      %18 = vector.broadcast %16 : i32 to vector<16x16xi32>
      %19 = arith.addi %18, %17 : vector<16x16xi32>
      %20 = arith.cmpi sle, %19, %15 : vector<16x16xi32>
      %c0 = arith.constant 0 : index
      %c0_6 = arith.constant 0 : index
      %c0_7 = arith.constant 0 : index
      %21 = vector.load %arg3[%c0, %c0_6, %c0_7] : memref<1x16x128xbf16, #tpu.memory_space<vmem>>, vector<1x16x64xbf16>
      %22 = vector.shape_cast %21 : vector<1x16x64xbf16> to vector<16x64xbf16>
      %c0_8 = arith.constant 0 : index
      %c0_9 = arith.constant 0 : index
      %c0_10 = arith.constant 0 : index
      %23 = vector.load %arg4[%c0_8, %c0_9, %c0_10] : memref<1x16x128xbf16, #tpu.memory_space<vmem>>, vector<1x16x64xbf16>
      %24 = vector.shape_cast %23 : vector<1x16x64xbf16> to vector<16x64xbf16>
      %c0_11 = arith.constant 0 : index
      %c0_12 = arith.constant 0 : index
      %c0_13 = arith.constant 0 : index
      %25 = vector.load %arg5[%c0_11, %c0_12, %c0_13] : memref<1x16x128xbf16, #tpu.memory_space<vmem>>, vector<1x16x64xbf16>
      %26 = vector.shape_cast %25 : vector<1x16x64xbf16> to vector<16x64xbf16>
      %cst = arith.constant dense<0.000000e+00> : vector<16x16xf32>
      %27 = tpu.matmul %22, %24, %cst {dimension_numbers = #tpu.dot_dimension_numbers<[1], [1], [0], [0], [0, 0, 1, 0], [], []>} : vector<16x64xbf16>, vector<16x64xbf16>, vector<16x16xf32> -> vector<16x16xf32>
      %cst_14 = arith.constant -1.000000e+30 : f32
      %28 = vector.broadcast %cst_14 : f32 to vector<16x16xf32>
      %29 = arith.select %20, %27, %28 : vector<16x16xi1>, vector<16x16xf32>
      %c0_15 = arith.constant 0 : index
      %c0_16 = arith.constant 0 : index
      %c0_17 = arith.constant 0 : index
      %30 = vector.load %arg7[%c0_15, %c0_16, %c0_17] : memref<2x16x1xf32, #tpu.memory_space<vmem>>, vector<1x16x1xf32>
      %31 = vector.shape_cast %30 : vector<1x16x1xf32> to vector<16x1xf32>
      %cst_18 = arith.constant dense<0xFF800000> : vector<16xf32>
      %32 = vector.multi_reduction <maximumf>, %29, %cst_18 [1] : vector<16x16xf32> to vector<16xf32>
      %33 = vector.shape_cast %32 : vector<16xf32> to vector<16x1xf32>
      %34 = arith.maximumf %31, %33 : vector<16x1xf32>
      %35 = arith.subf %31, %34 : vector<16x1xf32>
      %36 = math.exp %35 : vector<16x1xf32>
      %37 = vector.broadcast %34 : vector<16x1xf32> to vector<16x16xf32>
      %38 = arith.subf %29, %37 : vector<16x16xf32>
      %39 = math.exp %38 : vector<16x16xf32>
      %c0_19 = arith.constant 0 : index
      %c0_20 = arith.constant 0 : index
      %c0_21 = arith.constant 0 : index
      %40 = vector.load %arg8[%c0_19, %c0_20, %c0_21] : memref<2x16x1xf32, #tpu.memory_space<vmem>>, vector<1x16x1xf32>
      %41 = vector.shape_cast %40 : vector<1x16x1xf32> to vector<16x1xf32>
      %42 = arith.mulf %36, %41 : vector<16x1xf32>
      %cst_22 = arith.constant dense<0.000000e+00> : vector<16xf32>
      %43 = vector.multi_reduction <add>, %39, %cst_22 [1] : vector<16x16xf32> to vector<16xf32>
      %44 = vector.shape_cast %43 : vector<16xf32> to vector<16x1xf32>
      %45 = arith.addf %42, %44 : vector<16x1xf32>
      %c0_23 = arith.constant 0 : index
      %c0_24 = arith.constant 0 : index
      %c0_25 = arith.constant 0 : index
      %46 = vector.load %arg8[%c0_23, %c0_24, %c0_25] : memref<2x16x1xf32, #tpu.memory_space<vmem>>, vector<1x16x1xf32>
      %47 = vector.shape_cast %46 : vector<1x16x1xf32> to vector<16x1xf32>
      %48 = vector.shape_cast %45 : vector<16x1xf32> to vector<1x16x1xf32>
      tpu.vector_store %arg8[%c0_23, %c0_24, %c0_25], %48 {strides = array<i32>} : memref<2x16x1xf32, #tpu.memory_space<vmem>>, vector<1x16x1xf32>,
      %c0_26 = arith.constant 0 : index
      %c0_27 = arith.constant 0 : index
      %c0_28 = arith.constant 0 : index
      %49 = vector.load %arg7[%c0_26, %c0_27, %c0_28] : memref<2x16x1xf32, #tpu.memory_space<vmem>>, vector<1x16x1xf32>
      %50 = vector.shape_cast %49 : vector<1x16x1xf32> to vector<16x1xf32>
      %51 = vector.shape_cast %34 : vector<16x1xf32> to vector<1x16x1xf32>
      tpu.vector_store %arg7[%c0_26, %c0_27, %c0_28], %51 {strides = array<i32>} : memref<2x16x1xf32, #tpu.memory_space<vmem>>, vector<1x16x1xf32>,
      %52 = arith.truncf %39 : vector<16x16xf32> to vector<16x16xbf16>
      %cst_29 = arith.constant dense<0.000000e+00> : vector<16x64xf32>
      %53 = tpu.matmul %52, %26, %cst_29 {dimension_numbers = #tpu.dot_dimension_numbers<[1], [0], [0], [1], [0, 0, 1, 1], [], []>} : vector<16x16xbf16>, vector<16x64xbf16>, vector<16x64xf32> -> vector<16x64xf32>
      %54 = vector.shape_cast %36 : vector<16x1xf32> to vector<16x1xf32>
      %55 = vector.broadcast %54 : vector<16x1xf32> to vector<16x64xf32>
      %c0_30 = arith.constant 0 : index
      %c0_31 = arith.constant 0 : index
      %c64 = arith.constant 64 : index
      %56 = vector.load %arg3[%c0_30, %c0_31, %c64] : memref<1x16x128xbf16, #tpu.memory_space<vmem>>, vector<1x16x64xbf16>
      %57 = vector.shape_cast %56 : vector<1x16x64xbf16> to vector<16x64xbf16>
      %c0_32 = arith.constant 0 : index
      %c0_33 = arith.constant 0 : index
      %c64_34 = arith.constant 64 : index
      %58 = vector.load %arg4[%c0_32, %c0_33, %c64_34] : memref<1x16x128xbf16, #tpu.memory_space<vmem>>, vector<1x16x64xbf16>
      %59 = vector.shape_cast %58 : vector<1x16x64xbf16> to vector<16x64xbf16>
      %c0_35 = arith.constant 0 : index
      %c0_36 = arith.constant 0 : index
      %c64_37 = arith.constant 64 : index
      %60 = vector.load %arg5[%c0_35, %c0_36, %c64_37] : memref<1x16x128xbf16, #tpu.memory_space<vmem>>, vector<1x16x64xbf16>
      %61 = vector.shape_cast %60 : vector<1x16x64xbf16> to vector<16x64xbf16>
      %cst_38 = arith.constant dense<0.000000e+00> : vector<16x16xf32>
      %62 = tpu.matmul %57, %59, %cst_38 {dimension_numbers = #tpu.dot_dimension_numbers<[1], [1], [0], [0], [0, 0, 1, 0], [], []>} : vector<16x64xbf16>, vector<16x64xbf16>, vector<16x16xf32> -> vector<16x16xf32>
      %cst_39 = arith.constant -1.000000e+30 : f32
      %63 = vector.broadcast %cst_39 : f32 to vector<16x16xf32>
      %64 = arith.select %20, %62, %63 : vector<16x16xi1>, vector<16x16xf32>
      %c1 = arith.constant 1 : index
      %c0_40 = arith.constant 0 : index
      %c0_41 = arith.constant 0 : index
      %65 = vector.load %arg7[%c1, %c0_40, %c0_41] : memref<2x16x1xf32, #tpu.memory_space<vmem>>, vector<1x16x1xf32>
      %66 = vector.shape_cast %65 : vector<1x16x1xf32> to vector<16x1xf32>
      %cst_42 = arith.constant dense<0xFF800000> : vector<16xf32>
      %67 = vector.multi_reduction <maximumf>, %64, %cst_42 [1] : vector<16x16xf32> to vector<16xf32>
      %68 = vector.shape_cast %67 : vector<16xf32> to vector<16x1xf32>
      %69 = arith.maximumf %66, %68 : vector<16x1xf32>
      %70 = arith.subf %66, %69 : vector<16x1xf32>
      %71 = math.exp %70 : vector<16x1xf32>
      %72 = vector.broadcast %69 : vector<16x1xf32> to vector<16x16xf32>
      %73 = arith.subf %64, %72 : vector<16x16xf32>
      %74 = math.exp %73 : vector<16x16xf32>
      %c1_43 = arith.constant 1 : index
      %c0_44 = arith.constant 0 : index
      %c0_45 = arith.constant 0 : index
      %75 = vector.load %arg8[%c1_43, %c0_44, %c0_45] : memref<2x16x1xf32, #tpu.memory_space<vmem>>, vector<1x16x1xf32>
      %76 = vector.shape_cast %75 : vector<1x16x1xf32> to vector<16x1xf32>
      %77 = arith.mulf %71, %76 : vector<16x1xf32>
      %cst_46 = arith.constant dense<0.000000e+00> : vector<16xf32>
      %78 = vector.multi_reduction <add>, %74, %cst_46 [1] : vector<16x16xf32> to vector<16xf32>
      %79 = vector.shape_cast %78 : vector<16xf32> to vector<16x1xf32>
      %80 = arith.addf %77, %79 : vector<16x1xf32>
      %c1_47 = arith.constant 1 : index
      %c0_48 = arith.constant 0 : index
      %c0_49 = arith.constant 0 : index
      %81 = vector.load %arg8[%c1_47, %c0_48, %c0_49] : memref<2x16x1xf32, #tpu.memory_space<vmem>>, vector<1x16x1xf32>
      %82 = vector.shape_cast %81 : vector<1x16x1xf32> to vector<16x1xf32>
      %83 = vector.shape_cast %80 : vector<16x1xf32> to vector<1x16x1xf32>
      tpu.vector_store %arg8[%c1_47, %c0_48, %c0_49], %83 {strides = array<i32>} : memref<2x16x1xf32, #tpu.memory_space<vmem>>, vector<1x16x1xf32>,
      %c1_50 = arith.constant 1 : index
      %c0_51 = arith.constant 0 : index
      %c0_52 = arith.constant 0 : index
      %84 = vector.load %arg7[%c1_50, %c0_51, %c0_52] : memref<2x16x1xf32, #tpu.memory_space<vmem>>, vector<1x16x1xf32>
      %85 = vector.shape_cast %84 : vector<1x16x1xf32> to vector<16x1xf32>
      %86 = vector.shape_cast %69 : vector<16x1xf32> to vector<1x16x1xf32>
      tpu.vector_store %arg7[%c1_50, %c0_51, %c0_52], %86 {strides = array<i32>} : memref<2x16x1xf32, #tpu.memory_space<vmem>>, vector<1x16x1xf32>,
      %87 = arith.truncf %74 : vector<16x16xf32> to vector<16x16xbf16>
      %cst_53 = arith.constant dense<0.000000e+00> : vector<16x64xf32>
      %88 = tpu.matmul %87, %61, %cst_53 {dimension_numbers = #tpu.dot_dimension_numbers<[1], [0], [0], [1], [0, 0, 1, 1], [], []>} : vector<16x16xbf16>, vector<16x64xbf16>, vector<16x64xf32> -> vector<16x64xf32>
      %89 = vector.shape_cast %71 : vector<16x1xf32> to vector<16x1xf32>
      %90 = vector.broadcast %89 : vector<16x1xf32> to vector<16x64xf32>
      %91 = tpu.concatenate %53, %88 in 1 : vector<16x64xf32>, vector<16x64xf32> -> vector<16x128xf32>
      %92 = tpu.concatenate %55, %90 in 1 : vector<16x64xf32>, vector<16x64xf32> -> vector<16x128xf32>
      %c0_54 = arith.constant 0 : index
      %c0_55 = arith.constant 0 : index
      %93 = vector.load %arg9[%c0_54, %c0_55] : memref<16x128xf32, #tpu.memory_space<vmem>>, vector<16x128xf32>
      %94 = arith.mulf %92, %93 : vector<16x128xf32>
      %95 = arith.addf %94, %91 : vector<16x128xf32>
      %c0_56 = arith.constant 0 : index
      %c0_57 = arith.constant 0 : index
      %96 = vector.load %arg9[%c0_56, %c0_57] : memref<16x128xf32, #tpu.memory_space<vmem>>, vector<16x128xf32>
      tpu.vector_store %arg9[%c0_56, %c0_57], %95 {strides = array<i32>} : memref<16x128xf32, #tpu.memory_space<vmem>>, vector<16x128xf32>,
    } else {
    }
    %c0_i32_3 = arith.constant 0 : i32
    %9 = arith.cmpi eq, %arg2, %c0_i32_3 : i32
    %10 = arith.extui %9 : i1 to i32
    %c0_i32_4 = arith.constant 0 : i32
    %11 = arith.cmpi ne, %10, %c0_i32_4 : i32
    scf.if %11 {
      %c0 = arith.constant 0 : index
      %c0_5 = arith.constant 0 : index
      %c0_6 = arith.constant 0 : index
      %12 = vector.load %arg8[%c0, %c0_5, %c0_6] : memref<2x16x1xf32, #tpu.memory_space<vmem>>, vector<1x16x1xf32>
      %13 = vector.shape_cast %12 : vector<1x16x1xf32> to vector<16x1xf32>
      %14 = tpu.reciprocal %13 {approx = true} : vector<16x1xf32> -> vector<16x1xf32>
      %15 = vector.shape_cast %14 : vector<16x1xf32> to vector<16x1xf32>
      %16 = vector.broadcast %15 : vector<16x1xf32> to vector<16x64xf32>
      %c1 = arith.constant 1 : index
      %c0_7 = arith.constant 0 : index
      %c0_8 = arith.constant 0 : index
      %17 = vector.load %arg8[%c1, %c0_7, %c0_8] : memref<2x16x1xf32, #tpu.memory_space<vmem>>, vector<1x16x1xf32>
      %18 = vector.shape_cast %17 : vector<1x16x1xf32> to vector<16x1xf32>
      %19 = tpu.reciprocal %18 {approx = true} : vector<16x1xf32> -> vector<16x1xf32>
      %20 = vector.shape_cast %19 : vector<16x1xf32> to vector<16x1xf32>
      %21 = vector.broadcast %20 : vector<16x1xf32> to vector<16x64xf32>
      %22 = tpu.concatenate %16, %21 in 1 : vector<16x64xf32>, vector<16x64xf32> -> vector<16x128xf32>
      %c0_9 = arith.constant 0 : index
      %c0_10 = arith.constant 0 : index
      %23 = vector.load %arg9[%c0_9, %c0_10] : memref<16x128xf32, #tpu.memory_space<vmem>>, vector<16x128xf32>
      %24 = arith.mulf %23, %22 : vector<16x128xf32>
      %25 = arith.truncf %24 : vector<16x128xf32> to vector<16x128xbf16>
      %c0_11 = arith.constant 0 : index
      %c0_12 = arith.constant 0 : index
      %c0_13 = arith.constant 0 : index
      %26 = vector.load %arg6[%c0_11, %c0_12, %c0_13] : memref<1x16x128xbf16, #tpu.memory_space<vmem>>, vector<1x16x128xbf16>
      %27 = vector.shape_cast %26 : vector<1x16x128xbf16> to vector<16x128xbf16>
      %28 = vector.shape_cast %25 : vector<16x128xbf16> to vector<1x16x128xbf16>
      tpu.vector_store %arg6[%c0_11, %c0_12, %c0_13], %28 {strides = array<i32>} : memref<1x16x128xbf16, #tpu.memory_space<vmem>>, vector<1x16x128xbf16>,
    } else {
    }
    return
  }
  func.func @transform_0(%arg0: i32, %arg1: i32, %arg2: i32) -> (i32, i32, i32) {
    %c0_i32 = arith.constant 0 : i32
    %c0_i32_0 = arith.constant 0 : i32
    return %arg0, %arg1, %c0_i32 : i32, i32, i32
  }
  func.func @transform_1(%arg0: i32, %arg1: i32, %arg2: i32) -> (i32, i32, i32) {
    %0 = arith.minsi %arg2, %arg1 : i32
    %c1_i32 = arith.constant 1 : i32
    %c0_i32 = arith.constant 0 : i32
    return %arg0, %0, %c1_i32 : i32, i32, i32
  }
  func.func @transform_2(%arg0: i32, %arg1: i32, %arg2: i32) -> (i32, i32, i32) {
    %0 = arith.minsi %arg2, %arg1 : i32
    %c2_i32 = arith.constant 2 : i32
    %c0_i32 = arith.constant 0 : i32
    return %arg0, %0, %c2_i32 : i32, i32, i32
  }
  func.func @transform_3(%arg0: i32, %arg1: i32, %arg2: i32) -> (i32, i32, i32) {
    %c0_i32 = arith.constant 0 : i32
    %c0_i32_0 = arith.constant 0 : i32
    return %arg0, %arg1, %c0_i32 : i32, i32, i32
  }
}

module attributes {stable_mosaic.version = 11 : i64} {
  func.func @_fused_ln_linear_kernel(%arg0: i32, %arg1: memref<32x128xf32, #tpu.memory_space<vmem>>, %arg2: memref<128x384xbf16, #tpu.memory_space<vmem>>, %arg3: memref<1x384xf32, #tpu.memory_space<vmem>>, %arg4: memref<1x128xf32, #tpu.memory_space<vmem>>, %arg5: memref<1x128xf32, #tpu.memory_space<vmem>>, %arg6: memref<32x384xbf16, #tpu.memory_space<vmem>>) attributes {dimension_semantics = [#tpu.dimension_semantics<parallel>], iteration_bounds = array<i64: 1>, scalar_prefetch = 0 : i64, scratch_operands = 0 : i64, tpu.core_type = #tpu.core_type<tc>, window_params = [{transform_indices = @transform_0, window_bounds = array<i64: 32, 128>}, {pipeline_mode = #tpu.pipeline_mode<synchronous>, transform_indices = @transform_1, window_bounds = array<i64: 128, 384>}, {pipeline_mode = #tpu.pipeline_mode<synchronous>, transform_indices = @transform_2, window_bounds = array<i64: 1, 384>}, {pipeline_mode = #tpu.pipeline_mode<synchronous>, transform_indices = @transform_3, window_bounds = array<i64: 1, 128>}, {pipeline_mode = #tpu.pipeline_mode<synchronous>, transform_indices = @transform_4, window_bounds = array<i64: 1, 128>}, {transform_indices = @transform_5, window_bounds = array<i64: 32, 384>}]} {
    %c0 = arith.constant 0 : index
    %c0_0 = arith.constant 0 : index
    %0 = vector.load %arg1[%c0, %c0_0] : memref<32x128xf32, #tpu.memory_space<vmem>>, vector<32x128xf32>
    %cst = arith.constant dense<0.000000e+00> : vector<32xf32>
    %1 = vector.multi_reduction <add>, %0, %cst [1] : vector<32x128xf32> to vector<32xf32>
    %2 = vector.shape_cast %1 : vector<32xf32> to vector<32x1xf32>
    %cst_1 = arith.constant 1.280000e+02 : f32
    %3 = vector.broadcast %cst_1 : f32 to vector<32x1xf32>
    %4 = arith.divf %2, %3 : vector<32x1xf32>
    %5 = vector.broadcast %4 : vector<32x1xf32> to vector<32x128xf32>
    %6 = arith.subf %0, %5 : vector<32x128xf32>
    %7 = arith.mulf %6, %6 : vector<32x128xf32>
    %cst_2 = arith.constant dense<0.000000e+00> : vector<32xf32>
    %8 = vector.multi_reduction <add>, %7, %cst_2 [1] : vector<32x128xf32> to vector<32xf32>
    %9 = vector.shape_cast %8 : vector<32xf32> to vector<32x1xf32>
    %cst_3 = arith.constant 1.280000e+02 : f32
    %10 = vector.broadcast %cst_3 : f32 to vector<32x1xf32>
    %11 = arith.divf %9, %10 : vector<32x1xf32>
    %cst_4 = arith.constant 9.99999974E-6 : f32
    %12 = vector.broadcast %cst_4 : f32 to vector<32x1xf32>
    %13 = arith.addf %11, %12 : vector<32x1xf32>
    %14 = math.rsqrt %13 : vector<32x1xf32>
    %15 = vector.broadcast %14 : vector<32x1xf32> to vector<32x128xf32>
    %16 = arith.mulf %6, %15 : vector<32x128xf32>
    %c0_5 = arith.constant 0 : index
    %c0_6 = arith.constant 0 : index
    %17 = vector.load %arg4[%c0_5, %c0_6] : memref<1x128xf32, #tpu.memory_space<vmem>>, vector<1x128xf32>
    %18 = vector.broadcast %17 : vector<1x128xf32> to vector<32x128xf32>
    %19 = arith.mulf %16, %18 : vector<32x128xf32>
    %c0_7 = arith.constant 0 : index
    %c0_8 = arith.constant 0 : index
    %20 = vector.load %arg5[%c0_7, %c0_8] : memref<1x128xf32, #tpu.memory_space<vmem>>, vector<1x128xf32>
    %21 = vector.broadcast %20 : vector<1x128xf32> to vector<32x128xf32>
    %22 = arith.addf %19, %21 : vector<32x128xf32>
    %23 = arith.truncf %22 : vector<32x128xf32> to vector<32x128xbf16>
    %c0_9 = arith.constant 0 : index
    %c0_10 = arith.constant 0 : index
    %24 = vector.load %arg2[%c0_9, %c0_10] : memref<128x384xbf16, #tpu.memory_space<vmem>>, vector<128x384xbf16>
    %cst_11 = arith.constant dense<0.000000e+00> : vector<32x384xf32>
    %25 = tpu.matmul %23, %24, %cst_11 {dimension_numbers = #tpu.dot_dimension_numbers<[1], [0], [0], [1], [0, 0, 1, 1], [], []>} : vector<32x128xbf16>, vector<128x384xbf16>, vector<32x384xf32> -> vector<32x384xf32>
    %c0_12 = arith.constant 0 : index
    %c0_13 = arith.constant 0 : index
    %26 = vector.load %arg3[%c0_12, %c0_13] : memref<1x384xf32, #tpu.memory_space<vmem>>, vector<1x384xf32>
    %27 = vector.broadcast %26 : vector<1x384xf32> to vector<32x384xf32>
    %28 = arith.addf %25, %27 : vector<32x384xf32>
    %29 = arith.truncf %28 : vector<32x384xf32> to vector<32x384xbf16>
    %c0_14 = arith.constant 0 : index
    %c0_15 = arith.constant 0 : index
    %30 = vector.load %arg6[%c0_14, %c0_15] : memref<32x384xbf16, #tpu.memory_space<vmem>>, vector<32x384xbf16>
    tpu.vector_store %arg6[%c0_14, %c0_15], %29 {strides = array<i32>} : memref<32x384xbf16, #tpu.memory_space<vmem>>, vector<32x384xbf16>,
    return
  }
  func.func @transform_0(%arg0: i32) -> (i32, i32) {
    %c0_i32 = arith.constant 0 : i32
    %c0_i32_0 = arith.constant 0 : i32
    return %arg0, %c0_i32 : i32, i32
  }
  func.func @transform_1(%arg0: i32) -> (i32, i32) {
    %c0_i32 = arith.constant 0 : i32
    %c0_i32_0 = arith.constant 0 : i32
    %c0_i32_1 = arith.constant 0 : i32
    return %c0_i32, %c0_i32_0 : i32, i32
  }
  func.func @transform_2(%arg0: i32) -> (i32, i32) {
    %c0_i32 = arith.constant 0 : i32
    %c0_i32_0 = arith.constant 0 : i32
    %c0_i32_1 = arith.constant 0 : i32
    return %c0_i32, %c0_i32_0 : i32, i32
  }
  func.func @transform_3(%arg0: i32) -> (i32, i32) {
    %c0_i32 = arith.constant 0 : i32
    %c0_i32_0 = arith.constant 0 : i32
    %c0_i32_1 = arith.constant 0 : i32
    return %c0_i32, %c0_i32_0 : i32, i32
  }
  func.func @transform_4(%arg0: i32) -> (i32, i32) {
    %c0_i32 = arith.constant 0 : i32
    %c0_i32_0 = arith.constant 0 : i32
    %c0_i32_1 = arith.constant 0 : i32
    return %c0_i32, %c0_i32_0 : i32, i32
  }
  func.func @transform_5(%arg0: i32) -> (i32, i32) {
    %c0_i32 = arith.constant 0 : i32
    %c0_i32_0 = arith.constant 0 : i32
    return %arg0, %c0_i32 : i32, i32
  }
}

module attributes {stable_mosaic.version = 11 : i64} {
  func.func @_fused_ln_linear_kernel(%arg0: i32, %arg1: memref<32x128xbf16, #tpu.memory_space<vmem>>, %arg2: memref<128x128xbf16, #tpu.memory_space<vmem>>, %arg3: memref<1x128xf32, #tpu.memory_space<vmem>>, %arg4: memref<32x128xf32, #tpu.memory_space<vmem>>, %arg5: memref<32x128xf32, #tpu.memory_space<vmem>>) attributes {dimension_semantics = [#tpu.dimension_semantics<parallel>], iteration_bounds = array<i64: 1>, scalar_prefetch = 0 : i64, scratch_operands = 0 : i64, tpu.core_type = #tpu.core_type<tc>, window_params = [{transform_indices = @transform_0, window_bounds = array<i64: 32, 128>}, {pipeline_mode = #tpu.pipeline_mode<synchronous>, transform_indices = @transform_1, window_bounds = array<i64: 128, 128>}, {pipeline_mode = #tpu.pipeline_mode<synchronous>, transform_indices = @transform_2, window_bounds = array<i64: 1, 128>}, {transform_indices = @transform_3, window_bounds = array<i64: 32, 128>}, {transform_indices = @transform_4, window_bounds = array<i64: 32, 128>}]} {
    %c0 = arith.constant 0 : index
    %c0_0 = arith.constant 0 : index
    %0 = vector.load %arg1[%c0, %c0_0] : memref<32x128xbf16, #tpu.memory_space<vmem>>, vector<32x128xbf16>
    %c0_1 = arith.constant 0 : index
    %c0_2 = arith.constant 0 : index
    %1 = vector.load %arg2[%c0_1, %c0_2] : memref<128x128xbf16, #tpu.memory_space<vmem>>, vector<128x128xbf16>
    %cst = arith.constant dense<0.000000e+00> : vector<32x128xf32>
    %2 = tpu.matmul %0, %1, %cst {dimension_numbers = #tpu.dot_dimension_numbers<[1], [0], [0], [1], [0, 0, 1, 1], [], []>} : vector<32x128xbf16>, vector<128x128xbf16>, vector<32x128xf32> -> vector<32x128xf32>
    %c0_3 = arith.constant 0 : index
    %c0_4 = arith.constant 0 : index
    %3 = vector.load %arg3[%c0_3, %c0_4] : memref<1x128xf32, #tpu.memory_space<vmem>>, vector<1x128xf32>
    %4 = vector.broadcast %3 : vector<1x128xf32> to vector<32x128xf32>
    %5 = arith.addf %2, %4 : vector<32x128xf32>
    %c0_5 = arith.constant 0 : index
    %c0_6 = arith.constant 0 : index
    %6 = vector.load %arg4[%c0_5, %c0_6] : memref<32x128xf32, #tpu.memory_space<vmem>>, vector<32x128xf32>
    %7 = arith.addf %5, %6 : vector<32x128xf32>
    %c0_7 = arith.constant 0 : index
    %c0_8 = arith.constant 0 : index
    %8 = vector.load %arg5[%c0_7, %c0_8] : memref<32x128xf32, #tpu.memory_space<vmem>>, vector<32x128xf32>
    tpu.vector_store %arg5[%c0_7, %c0_8], %7 {strides = array<i32>} : memref<32x128xf32, #tpu.memory_space<vmem>>, vector<32x128xf32>,
    return
  }
  func.func @transform_0(%arg0: i32) -> (i32, i32) {
    %c0_i32 = arith.constant 0 : i32
    %c0_i32_0 = arith.constant 0 : i32
    return %arg0, %c0_i32 : i32, i32
  }
  func.func @transform_1(%arg0: i32) -> (i32, i32) {
    %c0_i32 = arith.constant 0 : i32
    %c0_i32_0 = arith.constant 0 : i32
    %c0_i32_1 = arith.constant 0 : i32
    return %c0_i32, %c0_i32_0 : i32, i32
  }
  func.func @transform_2(%arg0: i32) -> (i32, i32) {
    %c0_i32 = arith.constant 0 : i32
    %c0_i32_0 = arith.constant 0 : i32
    %c0_i32_1 = arith.constant 0 : i32
    return %c0_i32, %c0_i32_0 : i32, i32
  }
  func.func @transform_3(%arg0: i32) -> (i32, i32) {
    %c0_i32 = arith.constant 0 : i32
    %c0_i32_0 = arith.constant 0 : i32
    return %arg0, %c0_i32 : i32, i32
  }
  func.func @transform_4(%arg0: i32) -> (i32, i32) {
    %c0_i32 = arith.constant 0 : i32
    %c0_i32_0 = arith.constant 0 : i32
    return %arg0, %c0_i32 : i32, i32
  }
}

module attributes {stable_mosaic.version = 11 : i64} {
  func.func @_fused_ln_linear_kernel(%arg0: i32, %arg1: memref<32x128xf32, #tpu.memory_space<vmem>>, %arg2: memref<128x512xbf16, #tpu.memory_space<vmem>>, %arg3: memref<1x512xf32, #tpu.memory_space<vmem>>, %arg4: memref<1x128xf32, #tpu.memory_space<vmem>>, %arg5: memref<1x128xf32, #tpu.memory_space<vmem>>, %arg6: memref<32x512xbf16, #tpu.memory_space<vmem>>) attributes {dimension_semantics = [#tpu.dimension_semantics<parallel>], iteration_bounds = array<i64: 1>, scalar_prefetch = 0 : i64, scratch_operands = 0 : i64, tpu.core_type = #tpu.core_type<tc>, window_params = [{transform_indices = @transform_0, window_bounds = array<i64: 32, 128>}, {pipeline_mode = #tpu.pipeline_mode<synchronous>, transform_indices = @transform_1, window_bounds = array<i64: 128, 512>}, {pipeline_mode = #tpu.pipeline_mode<synchronous>, transform_indices = @transform_2, window_bounds = array<i64: 1, 512>}, {pipeline_mode = #tpu.pipeline_mode<synchronous>, transform_indices = @transform_3, window_bounds = array<i64: 1, 128>}, {pipeline_mode = #tpu.pipeline_mode<synchronous>, transform_indices = @transform_4, window_bounds = array<i64: 1, 128>}, {transform_indices = @transform_5, window_bounds = array<i64: 32, 512>}]} {
    %c0 = arith.constant 0 : index
    %c0_0 = arith.constant 0 : index
    %0 = vector.load %arg1[%c0, %c0_0] : memref<32x128xf32, #tpu.memory_space<vmem>>, vector<32x128xf32>
    %cst = arith.constant dense<0.000000e+00> : vector<32xf32>
    %1 = vector.multi_reduction <add>, %0, %cst [1] : vector<32x128xf32> to vector<32xf32>
    %2 = vector.shape_cast %1 : vector<32xf32> to vector<32x1xf32>
    %cst_1 = arith.constant 1.280000e+02 : f32
    %3 = vector.broadcast %cst_1 : f32 to vector<32x1xf32>
    %4 = arith.divf %2, %3 : vector<32x1xf32>
    %5 = vector.broadcast %4 : vector<32x1xf32> to vector<32x128xf32>
    %6 = arith.subf %0, %5 : vector<32x128xf32>
    %7 = arith.mulf %6, %6 : vector<32x128xf32>
    %cst_2 = arith.constant dense<0.000000e+00> : vector<32xf32>
    %8 = vector.multi_reduction <add>, %7, %cst_2 [1] : vector<32x128xf32> to vector<32xf32>
    %9 = vector.shape_cast %8 : vector<32xf32> to vector<32x1xf32>
    %cst_3 = arith.constant 1.280000e+02 : f32
    %10 = vector.broadcast %cst_3 : f32 to vector<32x1xf32>
    %11 = arith.divf %9, %10 : vector<32x1xf32>
    %cst_4 = arith.constant 9.99999974E-6 : f32
    %12 = vector.broadcast %cst_4 : f32 to vector<32x1xf32>
    %13 = arith.addf %11, %12 : vector<32x1xf32>
    %14 = math.rsqrt %13 : vector<32x1xf32>
    %15 = vector.broadcast %14 : vector<32x1xf32> to vector<32x128xf32>
    %16 = arith.mulf %6, %15 : vector<32x128xf32>
    %c0_5 = arith.constant 0 : index
    %c0_6 = arith.constant 0 : index
    %17 = vector.load %arg4[%c0_5, %c0_6] : memref<1x128xf32, #tpu.memory_space<vmem>>, vector<1x128xf32>
    %18 = vector.broadcast %17 : vector<1x128xf32> to vector<32x128xf32>
    %19 = arith.mulf %16, %18 : vector<32x128xf32>
    %c0_7 = arith.constant 0 : index
    %c0_8 = arith.constant 0 : index
    %20 = vector.load %arg5[%c0_7, %c0_8] : memref<1x128xf32, #tpu.memory_space<vmem>>, vector<1x128xf32>
    %21 = vector.broadcast %20 : vector<1x128xf32> to vector<32x128xf32>
    %22 = arith.addf %19, %21 : vector<32x128xf32>
    %23 = arith.truncf %22 : vector<32x128xf32> to vector<32x128xbf16>
    %c0_9 = arith.constant 0 : index
    %c0_10 = arith.constant 0 : index
    %24 = vector.load %arg2[%c0_9, %c0_10] : memref<128x512xbf16, #tpu.memory_space<vmem>>, vector<128x512xbf16>
    %cst_11 = arith.constant dense<0.000000e+00> : vector<32x512xf32>
    %25 = tpu.matmul %23, %24, %cst_11 {dimension_numbers = #tpu.dot_dimension_numbers<[1], [0], [0], [1], [0, 0, 1, 1], [], []>} : vector<32x128xbf16>, vector<128x512xbf16>, vector<32x512xf32> -> vector<32x512xf32>
    %c0_12 = arith.constant 0 : index
    %c0_13 = arith.constant 0 : index
    %26 = vector.load %arg3[%c0_12, %c0_13] : memref<1x512xf32, #tpu.memory_space<vmem>>, vector<1x512xf32>
    %27 = vector.broadcast %26 : vector<1x512xf32> to vector<32x512xf32>
    %28 = arith.addf %25, %27 : vector<32x512xf32>
    %cst_14 = arith.constant 5.000000e-01 : f32
    %29 = vector.broadcast %cst_14 : f32 to vector<32x512xf32>
    %30 = arith.mulf %29, %28 : vector<32x512xf32>
    %cst_15 = arith.constant 4.471500e-02 : f32
    %31 = vector.broadcast %cst_15 : f32 to vector<32x512xf32>
    %32 = arith.mulf %31, %28 : vector<32x512xf32>
    %33 = arith.mulf %32, %28 : vector<32x512xf32>
    %34 = arith.mulf %33, %28 : vector<32x512xf32>
    %35 = arith.addf %28, %34 : vector<32x512xf32>
    %cst_16 = arith.constant 0.797884583 : f32
    %36 = vector.broadcast %cst_16 : f32 to vector<32x512xf32>
    %37 = arith.mulf %36, %35 : vector<32x512xf32>
    %38 = math.tanh %37 : vector<32x512xf32>
    %cst_17 = arith.constant 1.000000e+00 : f32
    %39 = vector.broadcast %cst_17 : f32 to vector<32x512xf32>
    %40 = arith.addf %39, %38 : vector<32x512xf32>
    %41 = arith.mulf %30, %40 : vector<32x512xf32>
    %42 = arith.truncf %41 : vector<32x512xf32> to vector<32x512xbf16>
    %c0_18 = arith.constant 0 : index
    %c0_19 = arith.constant 0 : index
    %43 = vector.load %arg6[%c0_18, %c0_19] : memref<32x512xbf16, #tpu.memory_space<vmem>>, vector<32x512xbf16>
    tpu.vector_store %arg6[%c0_18, %c0_19], %42 {strides = array<i32>} : memref<32x512xbf16, #tpu.memory_space<vmem>>, vector<32x512xbf16>,
    return
  }
  func.func @transform_0(%arg0: i32) -> (i32, i32) {
    %c0_i32 = arith.constant 0 : i32
    %c0_i32_0 = arith.constant 0 : i32
    return %arg0, %c0_i32 : i32, i32
  }
  func.func @transform_1(%arg0: i32) -> (i32, i32) {
    %c0_i32 = arith.constant 0 : i32
    %c0_i32_0 = arith.constant 0 : i32
    %c0_i32_1 = arith.constant 0 : i32
    return %c0_i32, %c0_i32_0 : i32, i32
  }
  func.func @transform_2(%arg0: i32) -> (i32, i32) {
    %c0_i32 = arith.constant 0 : i32
    %c0_i32_0 = arith.constant 0 : i32
    %c0_i32_1 = arith.constant 0 : i32
    return %c0_i32, %c0_i32_0 : i32, i32
  }
  func.func @transform_3(%arg0: i32) -> (i32, i32) {
    %c0_i32 = arith.constant 0 : i32
    %c0_i32_0 = arith.constant 0 : i32
    %c0_i32_1 = arith.constant 0 : i32
    return %c0_i32, %c0_i32_0 : i32, i32
  }
  func.func @transform_4(%arg0: i32) -> (i32, i32) {
    %c0_i32 = arith.constant 0 : i32
    %c0_i32_0 = arith.constant 0 : i32
    %c0_i32_1 = arith.constant 0 : i32
    return %c0_i32, %c0_i32_0 : i32, i32
  }
  func.func @transform_5(%arg0: i32) -> (i32, i32) {
    %c0_i32 = arith.constant 0 : i32
    %c0_i32_0 = arith.constant 0 : i32
    return %arg0, %c0_i32 : i32, i32
  }
}

module attributes {stable_mosaic.version = 11 : i64} {
  func.func @_fused_ln_linear_kernel(%arg0: i32, %arg1: memref<32x512xbf16, #tpu.memory_space<vmem>>, %arg2: memref<512x128xbf16, #tpu.memory_space<vmem>>, %arg3: memref<1x128xf32, #tpu.memory_space<vmem>>, %arg4: memref<32x128xf32, #tpu.memory_space<vmem>>, %arg5: memref<32x128xf32, #tpu.memory_space<vmem>>) attributes {dimension_semantics = [#tpu.dimension_semantics<parallel>], iteration_bounds = array<i64: 1>, scalar_prefetch = 0 : i64, scratch_operands = 0 : i64, tpu.core_type = #tpu.core_type<tc>, window_params = [{transform_indices = @transform_0, window_bounds = array<i64: 32, 512>}, {pipeline_mode = #tpu.pipeline_mode<synchronous>, transform_indices = @transform_1, window_bounds = array<i64: 512, 128>}, {pipeline_mode = #tpu.pipeline_mode<synchronous>, transform_indices = @transform_2, window_bounds = array<i64: 1, 128>}, {transform_indices = @transform_3, window_bounds = array<i64: 32, 128>}, {transform_indices = @transform_4, window_bounds = array<i64: 32, 128>}]} {
    %c0 = arith.constant 0 : index
    %c0_0 = arith.constant 0 : index
    %0 = vector.load %arg1[%c0, %c0_0] : memref<32x512xbf16, #tpu.memory_space<vmem>>, vector<32x512xbf16>
    %c0_1 = arith.constant 0 : index
    %c0_2 = arith.constant 0 : index
    %1 = vector.load %arg2[%c0_1, %c0_2] : memref<512x128xbf16, #tpu.memory_space<vmem>>, vector<512x128xbf16>
    %cst = arith.constant dense<0.000000e+00> : vector<32x128xf32>
    %2 = tpu.matmul %0, %1, %cst {dimension_numbers = #tpu.dot_dimension_numbers<[1], [0], [0], [1], [0, 0, 1, 1], [], []>} : vector<32x512xbf16>, vector<512x128xbf16>, vector<32x128xf32> -> vector<32x128xf32>
    %c0_3 = arith.constant 0 : index
    %c0_4 = arith.constant 0 : index
    %3 = vector.load %arg3[%c0_3, %c0_4] : memref<1x128xf32, #tpu.memory_space<vmem>>, vector<1x128xf32>
    %4 = vector.broadcast %3 : vector<1x128xf32> to vector<32x128xf32>
    %5 = arith.addf %2, %4 : vector<32x128xf32>
    %c0_5 = arith.constant 0 : index
    %c0_6 = arith.constant 0 : index
    %6 = vector.load %arg4[%c0_5, %c0_6] : memref<32x128xf32, #tpu.memory_space<vmem>>, vector<32x128xf32>
    %7 = arith.addf %5, %6 : vector<32x128xf32>
    %c0_7 = arith.constant 0 : index
    %c0_8 = arith.constant 0 : index
    %8 = vector.load %arg5[%c0_7, %c0_8] : memref<32x128xf32, #tpu.memory_space<vmem>>, vector<32x128xf32>
    tpu.vector_store %arg5[%c0_7, %c0_8], %7 {strides = array<i32>} : memref<32x128xf32, #tpu.memory_space<vmem>>, vector<32x128xf32>,
    return
  }
  func.func @transform_0(%arg0: i32) -> (i32, i32) {
    %c0_i32 = arith.constant 0 : i32
    %c0_i32_0 = arith.constant 0 : i32
    return %arg0, %c0_i32 : i32, i32
  }
  func.func @transform_1(%arg0: i32) -> (i32, i32) {
    %c0_i32 = arith.constant 0 : i32
    %c0_i32_0 = arith.constant 0 : i32
    %c0_i32_1 = arith.constant 0 : i32
    return %c0_i32, %c0_i32_0 : i32, i32
  }
  func.func @transform_2(%arg0: i32) -> (i32, i32) {
    %c0_i32 = arith.constant 0 : i32
    %c0_i32_0 = arith.constant 0 : i32
    %c0_i32_1 = arith.constant 0 : i32
    return %c0_i32, %c0_i32_0 : i32, i32
  }
  func.func @transform_3(%arg0: i32) -> (i32, i32) {
    %c0_i32 = arith.constant 0 : i32
    %c0_i32_0 = arith.constant 0 : i32
    return %arg0, %c0_i32 : i32, i32
  }
  func.func @transform_4(%arg0: i32) -> (i32, i32) {
    %c0_i32 = arith.constant 0 : i32
    %c0_i32_0 = arith.constant 0 : i32
    return %arg0, %c0_i32 : i32, i32
  }
}

</mosaic_0001>

<bundles_post_ra>
// kernel: block_forward.5
= control target key start
LH: loop header
LB: loop body
LE: loop exit
PB: predicated region body
PF: predicated region fallthrough
CT: control target
= control target key end

     0   :  { %10 = vsyncpa [#allocation3], 0  ;;  %s905_s0 = inlined_call_operand.hbm [shape: f32[32,128], index: 0, kind: input, shape index: {}]   ;;  %s906_s1 = inlined_call_operand.hbm [shape: bf16[128,384], index: 1, kind: input, shape index: {}]   ;;  %s907_s2 = inlined_call_operand.hbm [shape: f32[1,384], index: 2, kind: input, shape index: {}]   ;;  %s908_s3 = inlined_call_operand.hbm [shape: f32[1,128], index: 3, kind: input, shape index: {}]   ;;  %s909_s4 = inlined_call_operand.hbm [shape: f32[1,128], index: 4, kind: input, shape index: {}]   ;;  %s910_s5 = inlined_call_operand.hbm [shape: bf16[32,384], index: 5, kind: output, shape index: {}]  }
   0x1   :  { %11 = vsyncpa [#allocation6], 0 }
   0x2   :  { %12 = vsyncpa [#allocation9], 0 }
   0x3   :  { %13 = vsyncpa [#allocation4], 0  ;;  %s766_s18 = smov [#allocation5]   ;;  %s626_s22 = scalar_lea.hbm %s906_s1, 3072 }
   0x4   :  { %s31_s19 = sshll.u32 %s766_s18, 4  ;;  %p627_p0 = scmp.ne.s32.totalorder %s906_s1, %s626_s22  ;;  %s32_s19 = int_to_ptr.vmem [resolvable:$true] %s31_s19 }
   0x5   :  { %p630_p1 = scmp.lt.u32.totalorder %s626_s22, %s906_s1 }
   0x7   :  { %p632_p2 = pnand %p630_p1, %p627_p0 }
   0x9   :  { %635 = shalt.err (!%p632_p2)
}
   0xa   :  { %s636_s27 = scalar_lea.vmem %s32_s19, 3072  ;;  %p641_p4 = scmp.lt.s32.totalorder %s32_s19, %s32_s19 }
   0xb   :  { %p637_p3 = scmp.ne.s32.totalorder %s32_s19, %s636_s27  ;;  %p642_p5 = scmp.lt.s32.totalorder %s636_s27, %s636_s27 }
   0xd   :  { %p643_p6 = por %p642_p5, %p641_p4 }
   0xf   :  { %p644_p7 = pnand %p643_p6, %p637_p3 }
  0x11   :  { %647 = shalt.err (!%p644_p7)
}
  0x12   :  { %s767_s28 = smov 192   ;;  %s768_s29 = smov 12  }
  0x13   :  { %37 = dma.hbm_to_vmem [thread:$0]  %s906_s1, 3072, %s32_s19, [#allocation6], %s767_s28, %s767_s28, %s768_s29  }
  0x14   :  { %s769_s7 = smov [#allocation8]   ;;  %s770_s9 = smov [#allocation2]  }
  0x15   :  { %s54_s8 = sshll.u32 %s769_s7, 4  ;;  %s19_s10 = sshll.u32 %s770_s9, 4  ;;  %s55_s8 = int_to_ptr.vmem [resolvable:$true] %s54_s8  ;;  %s20_s10 = int_to_ptr.vmem [resolvable:$true] %s19_s10 }
  0x16   :  { %s648_s13 = scalar_lea.hbm %s908_s3, 16 }
  0x17   :  { %p649_p8 = scmp.ne.s32.totalorder %s908_s3, %s648_s13  ;;  %p652_p9 = scmp.lt.u32.totalorder %s648_s13, %s908_s3 }
  0x19   :  { %p654_p10 = pnand %p652_p9, %p649_p8 }
  0x1b   :  { %657 = shalt.err (!%p654_p10)
}
  0x1c   :  { %s658_s1 = scalar_lea.vmem %s55_s8, 16  ;;  %s662_s18 = scalar_lea.vmem %s55_s8, 32 }
  0x1d   :  { %p659_p11 = scmp.ne.s32.totalorder %s55_s8, %s658_s1  ;;  %p663_p12 = scmp.lt.s32.totalorder %s55_s8, %s55_s8 }
  0x1e   :  { %p664_p13 = scmp.lt.s32.totalorder %s662_s18, %s658_s1 }
  0x20   :  { %p665_p0 = por %p664_p13, %p663_p12 }
  0x22   :  { %p666_p1 = pnand %p665_p0, %p659_p11 }
  0x24   :  { %669 = shalt.err (!%p666_p1)
}
  0x25   :  { %57 = dma.hbm_to_vmem [thread:$0]  %s908_s3, 16, %s55_s8, [#allocation9]  }
  0x26   :  { %s670_s23 = scalar_lea.hbm %s905_s0, 512 }
  0x27   :  { %p671_p2 = scmp.ne.s32.totalorder %s905_s0, %s670_s23  ;;  %p674_p3 = scmp.lt.u32.totalorder %s670_s23, %s905_s0 }
  0x29   :  { %p676_p4 = pnand %p674_p3, %p671_p2 }
  0x2b   :  { %679 = shalt.err (!%p676_p4)
}
  0x2c   :  { %s680_s30 = scalar_lea.vmem %s20_s10, 512  ;;  %p685_p6 = scmp.lt.s32.totalorder %s20_s10, %s20_s10 }
  0x2d   :  { %p681_p5 = scmp.ne.s32.totalorder %s20_s10, %s680_s30  ;;  %p686_p7 = scmp.lt.s32.totalorder %s680_s30, %s680_s30 }
  0x2f   :  { %p687_p8 = por %p686_p7, %p685_p6 }
  0x31   :  { %p688_p9 = pnand %p687_p8, %p681_p5 }
  0x33   :  { %691 = shalt.err (!%p688_p9)
}
  0x34   :  { %s771_s3 = smov 128   ;;  %s772_s6 = smov 8  }
  0x35   :  { %25 = dma.hbm_to_vmem [thread:$0]  %s905_s0, 512, %s20_s10, [#allocation3], %s771_s3, %s771_s3, %s772_s6  }
  0x36   :  { %s773_s9 = smov [#allocation7]   ;;  %s774_s12 = smov [#allocation10]  }
  0x37   :  { %s44_s11 = sshll.u32 %s773_s9, 4  ;;  %s64_s13 = sshll.u32 %s774_s12, 4  ;;  %s45_s11 = int_to_ptr.vmem [resolvable:$true] %s44_s11  ;;  %s65_s13 = int_to_ptr.vmem [resolvable:$true] %s64_s13 }
  0x38   :  { %s692_s16 = scalar_lea.hbm %s907_s2, 48 }
  0x39   :  { %p693_p10 = scmp.ne.s32.totalorder %s907_s2, %s692_s16  ;;  %p696_p11 = scmp.lt.u32.totalorder %s692_s16, %s907_s2 }
  0x3b   :  { %p698_p12 = pnand %p696_p11, %p693_p10 }
  0x3d   :  { %701 = shalt.err (!%p698_p12)
}
  0x3e   :  { %s702_s0 = scalar_lea.vmem %s45_s11, 48  ;;  %s706_s10 = scalar_lea.vmem %s45_s11, 64 }
  0x3f   :  { %p703_p13 = scmp.ne.s32.totalorder %s45_s11, %s702_s0  ;;  %p707_p0 = scmp.lt.s32.totalorder %s45_s11, %s45_s11 }
  0x40   :  { %p708_p1 = scmp.lt.s32.totalorder %s706_s10, %s702_s0 }
  0x42   :  { %p709_p2 = por %p708_p1, %p707_p0 }
  0x44   :  { %p710_p3 = pnand %p709_p2, %p703_p13 }
  0x46   :  { %713 = shalt.err (!%p710_p3)
}
  0x47   :  { %47 = dma.hbm_to_vmem [thread:$0]  %s907_s2, 48, %s45_s11, [#allocation6]  }
  0x48   :  { %s714_s24 = scalar_lea.hbm %s909_s4, 16 }
  0x49   :  { %p715_p4 = scmp.ne.s32.totalorder %s909_s4, %s714_s24  ;;  %p718_p5 = scmp.lt.u32.totalorder %s714_s24, %s909_s4 }
  0x4b   :  { %p720_p6 = pnand %p718_p5, %p715_p4 }
  0x4d   :  { %723 = shalt.err (!%p720_p6)
}
  0x4e   :  { %s724_s3 = scalar_lea.vmem %s65_s13, 16  ;;  %s728_s6 = scalar_lea.vmem %s65_s13, 32 }
  0x4f   :  { %p725_p7 = scmp.ne.s32.totalorder %s65_s13, %s724_s3  ;;  %p729_p8 = scmp.lt.s32.totalorder %s65_s13, %s65_s13 }
  0x50   :  { %p730_p9 = scmp.lt.s32.totalorder %s728_s6, %s724_s3 }
  0x52   :  { %p731_p10 = por %p730_p9, %p729_p8 }
  0x54   :  { %p732_p11 = pnand %p731_p10, %p725_p7 }
  0x56   :  { %735 = shalt.err (!%p732_p11)
}
  0x57   :  { %67 = dma.hbm_to_vmem [thread:$0]  %s909_s4, 16, %s65_s13, [#allocation9]  }
  0x58   :  { %758 = dma.done.wait [#allocation3], 512  }
  0x59   :  { %759 = vsyncadd [#allocation3], 4294966784 }
  0x5a   :  { %760 = dma.done.wait [#allocation6], 3120  }
  0x5b   :  { %761 = vsyncadd [#allocation6], 4294964176 }
  0x5c   :  { %762 = dma.done.wait [#allocation9], 32  }
  0x5d   :  { %763 = vsyncadd [#allocation9], 4294967264  ;;  %v84_v0 = vld [vmem:[#allocation2] sm:$0xff]  ;;  %v86_v1 = vld [vmem:[#allocation2 + $0x10] sm:$0xff]  ;;  %v775_v39 = vmov 0   ;;  %s776_s4 = smov [#allocation11]  }
  0x5e   :  { %v85_v2 = vld [vmem:[#allocation2 + $0x8] sm:$0xff]  ;;  %88 = vadd.xlane.f32.xlu0 %v84_v0  ;;  %92 = vadd.xlane.f32.xlu1 %v86_v1  ;;  %v87_v3 = vld [vmem:[#allocation2 + $0x18] sm:$0xff]  ;;  %v586_v4 = vld [vmem:[#allocation5 + $0x4] ss:$12 sps:$4 sm:$0xff]   ;;  %s489_s8 = sshll.u32 %s776_s4, 4  ;;  %s490_s8 = int_to_ptr.vmem [resolvable:$true] %s489_s8 }
  0x5f   :  { %v588_v5 = vld [vmem:[#allocation5] ss:$12 sps:$4 sm:$0xff]   ;;  %v589_v6 = vld [vmem:[#allocation5 + $0x1c] ss:$12 sps:$4 sm:$0xff]   ;;  %334 = vmatprep.subr.bf16.mxu0 %v586_v4  ;;  %v592_v24 = vld [vmem:[#allocation5 + $0x18] ss:$12 sps:$4 sm:$0xff]   ;;  %366 = vmatprep.mubr.bf16.mxu0 %v775_v39  ;;  %p741_p13 = scmp.lt.s32.totalorder %s490_s8, %s490_s8 }
  0x60   :  { %v591_v7 = vld [vmem:[#allocation5 + $0x8] ss:$12 sps:$4 sm:$0xff]   ;;  %335 = vmatpush1.bf16.msra.mxu0 %v588_v5  ;;  %v595_v26 = vld [vmem:[#allocation5 + $0x20] ss:$12 sps:$4 sm:$0xff]   ;;  %v596_v27 = vld [vmem:[#allocation5 + $0x30] ss:$12 sps:$4 sm:$0xff]  }
  0x61   :  { %555 = vmatprep.subr.bf16.mxu1 %v591_v7  ;;  %336 = vmatprep.subr.bf16.mxu0 %v589_v6  ;;  %v593_v25 = vld [vmem:[#allocation5 + $0x34] ss:$12 sps:$4 sm:$0xff]   ;;  %v597_v28 = vld [vmem:[#allocation5 + $0x4c] ss:$12 sps:$4 sm:$0xff]   ;;  %v601_v31 = vld [vmem:[#allocation5 + $0x64] ss:$12 sps:$4 sm:$0xff]  }
  0x62   :  { %90 = vadd.xlane.f32.xlu0 %v85_v2  ;;  %94 = vadd.xlane.f32.xlu1 %v87_v3  ;;  %v599_v29 = vld [vmem:[#allocation5 + $0x38] ss:$12 sps:$4 sm:$0xff]   ;;  %v600_v30 = vld [vmem:[#allocation5 + $0x48] ss:$12 sps:$4 sm:$0xff]   ;;  %v603_v32 = vld [vmem:[#allocation5 + $0x50] ss:$12 sps:$4 sm:$0xff]  }
  0x63   :  { %556 = vmatpush3.bf16.msra.mxu1 %v591_v7  ;;  %v604_v33 = vld [vmem:[#allocation5 + $0x60] ss:$12 sps:$4 sm:$0xff]   ;;  %v605_v34 = vld [vmem:[#allocation5 + $0x7c] ss:$12 sps:$4 sm:$0xff]   ;;  %v608_v36 = vld [vmem:[#allocation5 + $0x78] ss:$12 sps:$4 sm:$0xff]  }
  0x64   :  { %337 = vmatpush1.bf16.msra.mxu0 %v592_v24  ;;  %557 = vmatprep.subr.bf16.mxu1 %v595_v26  ;;  %v607_v35 = vld [vmem:[#allocation5 + $0x68] ss:$12 sps:$4 sm:$0xff]   ;;  %v611_v38 = vld [vmem:[#allocation5 + $0x80] ss:$12 sps:$4 sm:$0xff]   ;;  %v612_v40 = vld [vmem:[#allocation5 + $0x90] ss:$12 sps:$4 sm:$0xff]  }
  0x65   :  { %338 = vmatprep.subr.bf16.mxu0 %v593_v25  ;;  %v609_v37 = vld [vmem:[#allocation5 + $0x94] ss:$12 sps:$4 sm:$0xff]   ;;  %v613_v41 = vld [vmem:[#allocation5 + $0xac] ss:$12 sps:$4 sm:$0xff]   ;;  %v617_v44 = vld [vmem:[#allocation5 + $0xb0] ss:$12 sps:$4 sm:$0xff]  }
  0x66   :  { %v615_v42 = vld [vmem:[#allocation5 + $0x98] ss:$12 sps:$4 sm:$0xff]   ;;  %v616_v43 = vld [vmem:[#allocation5 + $0xa8] ss:$12 sps:$4 sm:$0xff]   ;;  %s736_s9 = scalar_lea.vmem %s490_s8, 768 }
  0x67   :  { %558 = vmatpush3.bf16.msra.mxu1 %v595_v26  ;;  %v503_v59 = vld [vmem:[#allocation8] ss:$0 sm:$0xff]  ;;  %p737_p12 = scmp.ne.s32.totalorder %s490_s8, %s736_s9  ;;  %p742_p0 = scmp.lt.s32.totalorder %s736_s9, %s736_s9 }
  0x68   :  { %339 = vmatpush1.bf16.msra.mxu0 %v596_v27  ;;  %559 = vmatprep.subr.bf16.mxu1 %v599_v29 }
  0x69   :  { %340 = vmatprep.subr.bf16.mxu0 %v597_v28  ;;  %p743_p1 = por %p742_p0, %p741_p13 }
  0x6b   :  { %560 = vmatpush3.bf16.msra.mxu1 %v599_v29  ;;  %p744_p2 = pnand %p743_p1, %p737_p12 }
  0x6c   :  { %341 = vmatpush1.bf16.msra.mxu0 %v600_v30  ;;  %561 = vmatprep.subr.bf16.mxu1 %v603_v32 }
  0x6d   :  { %342 = vmatprep.subr.bf16.mxu0 %v601_v31 }
  0x6f   :  { %562 = vmatpush3.bf16.msra.mxu1 %v603_v32 }
  0x70   :  { %343 = vmatpush1.bf16.msra.mxu0 %v604_v33  ;;  %563 = vmatprep.subr.bf16.mxu1 %v607_v35 }
  0x71   :  { %344 = vmatprep.subr.bf16.mxu0 %v605_v34 }
  0x73   :  { %564 = vmatpush3.bf16.msra.mxu1 %v607_v35 }
  0x74   :  { %345 = vmatpush1.bf16.msra.mxu0 %v608_v36  ;;  %565 = vmatprep.subr.bf16.mxu1 %v611_v38 }
  0x75   :  { %346 = vmatprep.subr.bf16.mxu0 %v609_v37 }
  0x77   :  { %566 = vmatpush3.bf16.msra.mxu1 %v611_v38 }
  0x78   :  { %347 = vmatpush1.bf16.msra.mxu0 %v612_v40  ;;  %567 = vmatprep.subr.bf16.mxu1 %v615_v42 }
  0x79   :  { %348 = vmatprep.subr.bf16.mxu0 %v613_v41 }
  0x7b   :  { %568 = vmatpush3.bf16.msra.mxu1 %v615_v42 }
  0x7c   :  { %349 = vmatpush1.bf16.msra.mxu0 %v616_v43  ;;  %569 = vmatprep.subr.bf16.mxu1 %v617_v44 }
  0x7f   :  { %570 = vmatpush3.bf16.msra.mxu1 %v617_v44 }
  0xeb   :  { %v89_v8 = vpop.xlane.xlu0 %88  ;;  %v93_v9 = vpop.xlane.xlu1 %92 }
  0xec   :  { %v97_v10 = vmul.f32 0.0078125, %v89_v8  ;;  %v99_v11 = vmul.f32 0.0078125, %v93_v9 }
  0xee   :  { %v870_v12 = vsub.f32 %v84_v0, %v97_v10  ;;  %v872_v13 = vsub.f32 %v86_v1, %v99_v11  ;;  %v504_v0 = vld [vmem:[#allocation10] ss:$0 sm:$0xff] }
  0xef   :  { %v91_v14 = vpop.xlane.xlu0 %90  ;;  %v95_v15 = vpop.xlane.xlu1 %94 }
  0xf0   :  { %v98_v16 = vmul.f32 0.0078125, %v91_v14  ;;  %v105_v17 = vmul.f32 %v870_v12, %v870_v12  ;;  %v100_v18 = vmul.f32 0.0078125, %v95_v15  ;;  %v107_v21 = vmul.f32 %v872_v13, %v872_v13 }
  0xf1   :  { %v191_v14 = vlaneseq }
  0xf2   :  { %v876_v19 = vsub.f32 %v85_v2, %v98_v16  ;;  %109 = vadd.xlane.f32.xlu0 %v105_v17  ;;  %v878_v20 = vsub.f32 %v87_v3, %v100_v18  ;;  %v189_v16 = vld [vmem:[#allocation7] sm:$0x7] }
  0xf3   :  { %v192_v15 = vshrl.u32 %v191_v14, 7 }
  0xf4   :  { %v106_v22 = vmul.f32 %v876_v19, %v876_v19  ;;  %v108_v23 = vmul.f32 %v878_v20, %v878_v20 }
  0xf5   :  { %v197_v17 = vsub.s32 1, %v192_v15 }
  0xf6   :  { %113 = vadd.xlane.f32.xlu0 %v107_v21  ;;  %111 = vadd.xlane.f32.xlu1 %v106_v22 }
  0xf7   :  { %v198_v21 = vrot.slane %v189_v16, %v197_v17 }
  0xfa   :  { %115 = vadd.xlane.f32.xlu1 %v108_v23 }
 0x17f   :  { %v110_v45 = vpop.xlane.xlu0 %109 }
 0x180   :  { %v117_v46 = vmul.f32 0.0078125, %v110_v45 }
 0x182   :  { %v121_v47 = vadd.f32 1e-05, %v117_v46 }
 0x183   :  { %v112_v48 = vpop.xlane.xlu1 %111  ;;  %v114_v49 = vpop.xlane.xlu0 %113 }
 0x184   :  { %618 = vrsqrt.f32 %v121_v47  ;;  %v118_v50 = vmul.f32 0.0078125, %v112_v48  ;;  %v119_v51 = vmul.f32 0.0078125, %v114_v49 }
 0x186   :  { %v122_v52 = vadd.f32 1e-05, %v118_v50  ;;  %v123_v53 = vadd.f32 1e-05, %v119_v51 }
 0x187   :  { %v116_v54 = vpop.xlane.xlu1 %115 }
 0x188   :  { %620 = vrsqrt.f32 %v122_v52  ;;  %v120_v55 = vmul.f32 0.0078125, %v116_v54 }
 0x189   :  { %622 = vrsqrt.f32 %v123_v53 }
 0x18a   :  { %v124_v56 = vadd.f32 1e-05, %v120_v55 }
 0x18c   :  { %624 = vrsqrt.f32 %v124_v56 }
 0x18e   :  { %v619_v57 = vpop.eup %618 }
 0x18f   :  { %v129_v58 = vmul.f32 %v619_v57, %v870_v12 }
 0x191   :  { %v140_v63 = vmul.f32 %v503_v59, %v129_v58 }
 0x192   :  { %v621_v60 = vpop.eup %620 }
 0x193   :  { %v623_v61 = vpop.eup %622  ;;  %v130_v62 = vmul.f32 %v621_v60, %v876_v19  ;;  %v151_v4 = vadd.f32 %v504_v0, %v140_v63  ;;  %v201_v19 = vsub.s32 2, %v192_v15 }
 0x194   :  { %v131_v1 = vmul.f32 %v623_v61, %v872_v13  ;;  %v193_v13 = vsub.s32 0, %v192_v15 }
 0x195   :  { %v141_v2 = vmul.f32 %v503_v59, %v130_v62  ;;  %v202_v24 = vrot.slane %v189_v16, %v201_v19 }
 0x196   :  { %v625_v3 = vpop.eup %624  ;;  %v142_v7 = vmul.f32 %v503_v59, %v131_v1  ;;  %v194_v18 = vrot.slane %v189_v16, %v193_v13 }
 0x197   :  { %v152_v5 = vadd.f32 %v504_v0, %v141_v2  ;;  %v132_v6 = vmul.f32 %v625_v3, %v878_v20 }
 0x198   :  { %v153_v10 = vadd.f32 %v504_v0, %v142_v7 }
 0x199   :  { %v155_v8 = vpack.c.bf16 %v152_v5, %v151_v4  ;;  %v143_v9 = vmul.f32 %v503_v59, %v132_v6 }
 0x19b   :  { %367 = vmatmul.mubr.bf16.vlgmr.msra.gmra.mrb[0].mxu0 %v155_v8  ;;  %571 = vmatprep.mubr.bf16.mxu1 %v155_v8  ;;  %v154_v11 = vadd.f32 %v504_v0, %v143_v9 }
 0x19c   :  { %376 = vmatprep.mubr.bf16.mxu0 %v775_v39 }
 0x19d   :  { %v156_v12 = vpack.c.bf16 %v154_v11, %v153_v10 }
 0x19f   :  { %572 = vmatmul.mubr.bf16.vlgmr.msra.gmra.mrb[0].mxu1 %v156_v12 }
 0x1a3   :  { %377 = vmatmul.mubr.bf16.gmra.mrb[4].mxu0 %v156_v12 }
 0x26e   :  { %v368_v20 = vpop.f32.mrb[0].mxu0 }
 0x26f   :  { %v369_v22 = vadd.f32 %v368_v20, %v194_v18  ;;  %v370_v23 = vpop.f32.mrb[1].mxu0 }
 0x270   :  { %v371_v25 = vadd.f32 %v370_v23, %v198_v21  ;;  %v372_v26 = vpop.f32.mrb[2].mxu0 }
 0x271   :  { %v373_v27 = vadd.f32 %v372_v26, %v194_v18  ;;  %v374_v28 = vpop.f32.mrb[3].mxu0 }
 0x272   :  { %v537_v29 = vpack.c.bf16 %v371_v25, %v369_v22  ;;  %v375_v30 = vadd.f32 %v374_v28, %v198_v21  ;;  %v573_v31 = vpop.f32.mrb[0].mxu1 }
 0x273   :  { %v430_v32 = vadd.f32 %v573_v31, %v202_v24  ;;  %v421_v33 = vpop.f32.mrb[1].mxu1 }
 0x274   :  { %476 = vst [vmem:[#allocation11] sm:$0xff] %v537_v29  ;;  %v539_v34 = vpack.c.bf16 %v375_v30, %v373_v27  ;;  %v422_v35 = vadd.f32 %v421_v33, %v202_v24  ;;  %v574_v36 = vpop.f32.mrb[2].mxu1 }
 0x275   :  { %v542_v37 = vpack.c.bf16 %v430_v32, %v430_v32  ;;  %v433_v38 = vadd.f32 %v574_v36, %v202_v24  ;;  %v424_v39 = vpop.f32.mrb[3].mxu1 }
 0x276   :  { %478 = vst [vmem:[#allocation11 + $0xc] sm:$0xff] %v539_v34  ;;  %v538_v40 = vpack.c.bf16 %v422_v35, %v422_v35  ;;  %v425_v41 = vadd.f32 %v424_v39, %v202_v24  ;;  %v378_v42 = vpop.f32.mrb[4].mxu0 }
 0x277   :  { %481 = vst [vmem:[#allocation11 + $0x20] sm:$0xf] %v542_v37  ;;  %v544_v43 = vpack.c.bf16 %v433_v38, %v433_v38  ;;  %v379_v44 = vadd.f32 %v378_v42, %v194_v18  ;;  %v380_v45 = vpop.f32.mrb[5].mxu0 }
 0x278   :  { %477 = vst [vmem:[#allocation11 + $0x8] sm:$0xf] %v538_v40  ;;  %v540_v46 = vpack.c.bf16 %v425_v41, %v425_v41  ;;  %v381_v47 = vadd.f32 %v380_v45, %v198_v21  ;;  %v382_v48 = vpop.f32.mrb[6].mxu0 }
 0x279   :  { %483 = vst [vmem:[#allocation11 + $0x2c] sm:$0xf] %v544_v43  ;;  %v383_v49 = vadd.f32 %v382_v48, %v194_v18  ;;  %v384_v50 = vpop.f32.mrb[7].mxu0 }
 0x27a   :  { %479 = vst [vmem:[#allocation11 + $0x14] sm:$0xf] %v540_v46  ;;  %v541_v51 = vpack.c.bf16 %v381_v47, %v379_v44  ;;  %v385_v52 = vadd.f32 %v384_v50, %v198_v21 }
 0x27c   :  { %480 = vst [vmem:[#allocation11 + $0x18] sm:$0xff] %v541_v51  ;;  %v543_v53 = vpack.c.bf16 %v385_v52, %v383_v49 }
 0x27e   :  { %482 = vst [vmem:[#allocation11 + $0x24] sm:$0xff] %v543_v53 }
 0x27f   :  { %747 = shalt.err (!%p744_p2)
}
 0x280   :  { %s748_s13 = scalar_lea.hbm %s910_s5, 768 }
 0x281   :  { %p749_p3 = scmp.ne.s32.totalorder %s910_s5, %s748_s13  ;;  %p752_p4 = scmp.lt.u32.totalorder %s748_s13, %s910_s5 }
 0x283   :  { %p754_p5 = pnand %p752_p4, %p749_p3 }
 0x285   :  { %757 = shalt.err (!%p754_p5)
}
 0x286   :  { %495 = dma.vmem_to_hbm [thread:$0]  %s490_s8, 768, %s910_s5, [#allocation4], %s767_s28, %s767_s28, %s768_s29  }
 0x287   :  { %764 = dma.done.wait [#allocation4], 768  }
 0x288   :  { %765 = vsyncadd [#allocation4], 4294966528 }
 0x289   :  { %499 = vsyncpa [#allocation3], 1 }
 0x28a   :  { %500 = vsyncpa [#allocation6], 1 }
 0x28b   :  { %501 = vsyncpa [#allocation9], 1 }
 0x28c   :  { %502 = vsyncpa [#allocation4], 1 }

// kernel: block_forward.7
= control target key start
LH: loop header
LB: loop body
LE: loop exit
PB: predicated region body
PF: predicated region fallthrough
CT: control target
= control target key end

     0   :  { %9 = vsyncpa [#allocation3], 0  ;;  %s531_s0 = inlined_call_operand.hbm [shape: bf16[32,128], index: 0, kind: input, shape index: {}]   ;;  %s532_s1 = inlined_call_operand.hbm [shape: bf16[128,128], index: 1, kind: input, shape index: {}]   ;;  %s533_s2 = inlined_call_operand.hbm [shape: f32[1,128], index: 2, kind: input, shape index: {}]   ;;  %s534_s3 = inlined_call_operand.hbm [shape: f32[32,128], index: 3, kind: input, shape index: {}]   ;;  %s535_s4 = inlined_call_operand.hbm [shape: f32[32,128], index: 4, kind: output, shape index: {}]  }
   0x1   :  { %10 = vsyncpa [#allocation6], 0 }
   0x2   :  { %11 = vsyncpa [#allocation9], 0 }
   0x3   :  { %12 = vsyncpa [#allocation4], 0  ;;  %s417_s15 = smov [#allocation5]   ;;  %s418_s17 = smov [#allocation2]  }
   0x4   :  { %s30_s16 = sshll.u32 %s417_s15, 4  ;;  %s18_s18 = sshll.u32 %s418_s17, 4  ;;  %s31_s16 = int_to_ptr.vmem [resolvable:$true] %s30_s16  ;;  %s451_s18 = int_to_ptr.vmem [resolvable:$true] %s18_s18 }
   0x5   :  { %s299_s21 = scalar_lea.hbm %s532_s1, 1024 }
   0x6   :  { %p300_p0 = scmp.ne.s32.totalorder %s532_s1, %s299_s21  ;;  %p303_p1 = scmp.lt.u32.totalorder %s299_s21, %s532_s1 }
   0x8   :  { %p305_p2 = pnand %p303_p1, %p300_p0 }
   0xa   :  { %308 = shalt.err (!%p305_p2)
}
   0xb   :  { %s309_s26 = scalar_lea.vmem %s31_s16, 1024  ;;  %p314_p4 = scmp.lt.s32.totalorder %s31_s16, %s31_s16 }
   0xc   :  { %p310_p3 = scmp.ne.s32.totalorder %s31_s16, %s309_s26  ;;  %p315_p5 = scmp.lt.s32.totalorder %s309_s26, %s309_s26 }
   0xe   :  { %p316_p6 = por %p315_p5, %p314_p4 }
  0x10   :  { %p317_p7 = pnand %p316_p6, %p310_p3 }
  0x12   :  { %320 = shalt.err (!%p317_p7)
}
  0x13   :  { %s419_s27 = smov 64   ;;  %s420_s28 = smov 4  }
  0x14   :  { %36 = dma.hbm_to_vmem [thread:$0]  %s532_s1, 1024, %s31_s16, [#allocation6], %s419_s27, %s419_s27, %s420_s28  }
  0x15   :  { %s321_s7 = scalar_lea.hbm %s531_s0, 256 }
  0x16   :  { %p322_p8 = scmp.ne.s32.totalorder %s531_s0, %s321_s7  ;;  %p325_p9 = scmp.lt.u32.totalorder %s321_s7, %s531_s0 }
  0x18   :  { %p327_p10 = pnand %p325_p9, %p322_p8 }
  0x1a   :  { %330 = shalt.err (!%p327_p10)
}
  0x1b   :  { %s331_s12 = scalar_lea.vmem %s451_s18, 256  ;;  %p336_p12 = scmp.lt.s32.totalorder %s451_s18, %s451_s18 }
  0x1c   :  { %p332_p11 = scmp.ne.s32.totalorder %s451_s18, %s331_s12  ;;  %p337_p13 = scmp.lt.s32.totalorder %s331_s12, %s331_s12 }
  0x1e   :  { %p338_p0 = por %p337_p13, %p336_p12 }
  0x20   :  { %p339_p1 = pnand %p338_p0, %p332_p11 }
  0x22   :  { %342 = shalt.err (!%p339_p1)
}
  0x23   :  { %24 = dma.hbm_to_vmem [thread:$0]  %s531_s0, 256, %s451_s18, [#allocation3], %s419_s27, %s419_s27, %s420_s28  }
  0x24   :  { %s421_s14 = smov [#allocation7]   ;;  %s422_s16 = smov [#allocation8]  }
  0x25   :  { %s43_s15 = sshll.u32 %s421_s14, 4  ;;  %s52_s17 = sshll.u32 %s422_s16, 4  ;;  %s44_s15 = int_to_ptr.vmem [resolvable:$true] %s43_s15  ;;  %s482_s17 = int_to_ptr.vmem [resolvable:$true] %s52_s17 }
  0x26   :  { %s343_s21 = scalar_lea.hbm %s533_s2, 16 }
  0x27   :  { %p344_p2 = scmp.ne.s32.totalorder %s533_s2, %s343_s21  ;;  %p347_p3 = scmp.lt.u32.totalorder %s343_s21, %s533_s2 }
  0x29   :  { %p349_p4 = pnand %p347_p3, %p344_p2 }
  0x2b   :  { %352 = shalt.err (!%p349_p4)
}
  0x2c   :  { %s353_s0 = scalar_lea.vmem %s44_s15, 16  ;;  %s357_s18 = scalar_lea.vmem %s44_s15, 32 }
  0x2d   :  { %p354_p5 = scmp.ne.s32.totalorder %s44_s15, %s353_s0  ;;  %p358_p6 = scmp.lt.s32.totalorder %s44_s15, %s44_s15 }
  0x2e   :  { %p359_p7 = scmp.lt.s32.totalorder %s357_s18, %s353_s0 }
  0x30   :  { %p360_p8 = por %p359_p7, %p358_p6 }
  0x32   :  { %p361_p9 = pnand %p360_p8, %p354_p5 }
  0x34   :  { %364 = shalt.err (!%p361_p9)
}
  0x35   :  { %46 = dma.hbm_to_vmem [thread:$0]  %s533_s2, 16, %s44_s15, [#allocation6]  }
  0x36   :  { %s365_s30 = scalar_lea.hbm %s534_s3, 512 }
  0x37   :  { %p366_p10 = scmp.ne.s32.totalorder %s534_s3, %s365_s30  ;;  %p369_p11 = scmp.lt.u32.totalorder %s365_s30, %s534_s3 }
  0x39   :  { %p371_p12 = pnand %p369_p11, %p366_p10 }
  0x3b   :  { %374 = shalt.err (!%p371_p12)
}
  0x3c   :  { %s375_s9 = scalar_lea.vmem %s482_s17, 512  ;;  %p380_p0 = scmp.lt.s32.totalorder %s482_s17, %s482_s17 }
  0x3d   :  { %p376_p13 = scmp.ne.s32.totalorder %s482_s17, %s375_s9  ;;  %p381_p1 = scmp.lt.s32.totalorder %s375_s9, %s375_s9 }
  0x3f   :  { %p382_p2 = por %p381_p1, %p380_p0 }
  0x41   :  { %p383_p3 = pnand %p382_p2, %p376_p13 }
  0x43   :  { %386 = shalt.err (!%p383_p3)
}
  0x44   :  { %s423_s2 = smov 128   ;;  %s424_s10 = smov 8  }
  0x45   :  { %58 = dma.hbm_to_vmem [thread:$0]  %s534_s3, 512, %s482_s17, [#allocation9], %s423_s2, %s423_s2, %s424_s10  }
  0x46   :  { %409 = dma.done.wait [#allocation3], 256  }
  0x47   :  { %410 = vsyncadd [#allocation3], 4294967040 }
  0x48   :  { %411 = dma.done.wait [#allocation6], 1040  }
  0x49   :  { %412 = vsyncadd [#allocation6], 4294966256 }
  0x4a   :  { %413 = dma.done.wait [#allocation9], 512  }
  0x4b   :  { %414 = vsyncadd [#allocation9], 4294966784  ;;  %v289_v0 = vld [vmem:[#allocation5] sm:$0xff]   ;;  %v290_v1 = vld [vmem:[#allocation5 + $0x8] sm:$0xff]   ;;  %s425_s3 = smov [#allocation10]  }
  0x4c   :  { %260 = vmatprep.subr.bf16.mxu0 %v289_v0  ;;  %v291_v2 = vld [vmem:[#allocation5 + $0x10] sm:$0xff]   ;;  %v292_v3 = vld [vmem:[#allocation5 + $0x18] sm:$0xff]   ;;  %v293_v5 = vld [vmem:[#allocation5 + $0x20] sm:$0xff]   ;;  %s225_s1 = sshll.u32 %s425_s3, 4  ;;  %s226_s1 = int_to_ptr.vmem [resolvable:$true] %s225_s1 }
  0x4d   :  { %261 = vmatpush3.bf16.msra.mxu0 %v289_v0  ;;  %v297_v4 = vld [vmem:[#allocation2] sm:$0xff]   ;;  %v294_v6 = vld [vmem:[#allocation5 + $0x28] sm:$0xff]   ;;  %v296_v8 = vld [vmem:[#allocation5 + $0x38] sm:$0xff]   ;;  %s387_s13 = scalar_lea.vmem %s226_s1, 512  ;;  %p392_p5 = scmp.lt.s32.totalorder %s226_s1, %s226_s1 }
  0x4e   :  { %262 = vmatprep.subr.bf16.mxu0 %v290_v1  ;;  %276 = vmatprep.mubr.bf16.mxu0 %v297_v4  ;;  %v295_v7 = vld [vmem:[#allocation5 + $0x30] sm:$0xff]   ;;  %v298_v9 = vld [vmem:[#allocation2 + $0x8] sm:$0xff]   ;;  %v239_v10 = vld [vmem:[#allocation7] ss:$0 sm:$0xff]  ;;  %p388_p4 = scmp.ne.s32.totalorder %s226_s1, %s387_s13  ;;  %p393_p6 = scmp.lt.s32.totalorder %s387_s13, %s387_s13 }
  0x4f   :  { %v210_v12 = vld [vmem:[#allocation8 + $0x10] sm:$0xff]  ;;  %v208_v15 = vld [vmem:[#allocation8] sm:$0xff]  ;;  %v211_v18 = vld [vmem:[#allocation8 + $0x18] sm:$0xff] }
  0x50   :  { %v209_v22 = vld [vmem:[#allocation8 + $0x8] sm:$0xff]  ;;  %p394_p7 = por %p393_p6, %p392_p5 }
  0x51   :  { %263 = vmatpush3.bf16.msra.mxu0 %v290_v1 }
  0x52   :  { %264 = vmatprep.subr.bf16.mxu0 %v291_v2  ;;  %p395_p8 = pnand %p394_p7, %p388_p4 }
  0x55   :  { %265 = vmatpush3.bf16.msra.mxu0 %v291_v2 }
  0x56   :  { %266 = vmatprep.subr.bf16.mxu0 %v292_v3 }
  0x59   :  { %267 = vmatpush3.bf16.msra.mxu0 %v292_v3 }
  0x5a   :  { %268 = vmatprep.subr.bf16.mxu0 %v293_v5 }
  0x5d   :  { %269 = vmatpush3.bf16.msra.mxu0 %v293_v5 }
  0x5e   :  { %270 = vmatprep.subr.bf16.mxu0 %v294_v6 }
  0x61   :  { %271 = vmatpush3.bf16.msra.mxu0 %v294_v6 }
  0x62   :  { %272 = vmatprep.subr.bf16.mxu0 %v295_v7 }
  0x65   :  { %273 = vmatpush3.bf16.msra.mxu0 %v295_v7 }
  0x66   :  { %274 = vmatprep.subr.bf16.mxu0 %v296_v8 }
  0x69   :  { %275 = vmatpush3.bf16.msra.mxu0 %v296_v8 }
  0x6c   :  { %277 = vmatmul.mubr.bf16.vlgmr.msra.gmra.mrb[0].mxu0 %v298_v9 }
 0x13f   :  { %v278_v11 = vpop.f32.mrb[0].mxu0 }
 0x140   :  { %v202_v13 = vadd.f32 %v278_v11, %v239_v10  ;;  %v193_v14 = vpop.f32.mrb[1].mxu0 }
 0x141   :  { %v194_v16 = vadd.f32 %v239_v10, %v193_v14  ;;  %v279_v17 = vpop.f32.mrb[2].mxu0 }
 0x142   :  { %v214_v19 = vadd.f32 %v210_v12, %v202_v13  ;;  %v205_v20 = vadd.f32 %v279_v17, %v239_v10  ;;  %v196_v21 = vpop.f32.mrb[3].mxu0 }
 0x143   :  { %v212_v23 = vadd.f32 %v208_v15, %v194_v16  ;;  %v197_v24 = vadd.f32 %v239_v10, %v196_v21 }
 0x144   :  { %218 = vst [vmem:[#allocation10 + $0x10] sm:$0xff] %v214_v19  ;;  %v215_v25 = vadd.f32 %v211_v18, %v205_v20 }
 0x145   :  { %216 = vst [vmem:[#allocation10] sm:$0xff] %v212_v23  ;;  %v213_v26 = vadd.f32 %v209_v22, %v197_v24 }
 0x146   :  { %219 = vst [vmem:[#allocation10 + $0x18] sm:$0xff] %v215_v25 }
 0x147   :  { %217 = vst [vmem:[#allocation10 + $0x8] sm:$0xff] %v213_v26 }
 0x148   :  { %398 = shalt.err (!%p395_p8)
}
 0x149   :  { %s399_s16 = scalar_lea.hbm %s535_s4, 512 }
 0x14a   :  { %p400_p9 = scmp.ne.s32.totalorder %s535_s4, %s399_s16  ;;  %p403_p10 = scmp.lt.u32.totalorder %s399_s16, %s535_s4 }
 0x14c   :  { %p405_p11 = pnand %p403_p10, %p400_p9 }
 0x14e   :  { %408 = shalt.err (!%p405_p11)
}
 0x14f   :  { %231 = dma.vmem_to_hbm [thread:$0]  %s226_s1, 512, %s535_s4, [#allocation4], %s423_s2, %s423_s2, %s424_s10  }
 0x150   :  { %415 = dma.done.wait [#allocation4], 512  }
 0x151   :  { %416 = vsyncadd [#allocation4], 4294966784 }
 0x152   :  { %235 = vsyncpa [#allocation3], 1 }
 0x153   :  { %236 = vsyncpa [#allocation6], 1 }
 0x154   :  { %237 = vsyncpa [#allocation9], 1 }
 0x155   :  { %238 = vsyncpa [#allocation4], 1 }

// kernel: block_forward.8
= control target key start
LH: loop header
LB: loop body
LE: loop exit
PB: predicated region body
PF: predicated region fallthrough
CT: control target
= control target key end

     0   :  { %10 = vsyncpa [#allocation3], 0  ;;  %s1255_s0 = inlined_call_operand.hbm [shape: f32[32,128], index: 0, kind: input, shape index: {}]   ;;  %s1256_s1 = inlined_call_operand.hbm [shape: bf16[128,512], index: 1, kind: input, shape index: {}]   ;;  %s1257_s2 = inlined_call_operand.hbm [shape: f32[1,512], index: 2, kind: input, shape index: {}]   ;;  %s1258_s3 = inlined_call_operand.hbm [shape: f32[1,128], index: 3, kind: input, shape index: {}]   ;;  %s1259_s4 = inlined_call_operand.hbm [shape: f32[1,128], index: 4, kind: input, shape index: {}]   ;;  %s1260_s5 = inlined_call_operand.hbm [shape: bf16[32,512], index: 5, kind: output, shape index: {}]  }
   0x1   :  { %11 = vsyncpa [#allocation6], 0 }
   0x2   :  { %12 = vsyncpa [#allocation9], 0 }
   0x3   :  { %13 = vsyncpa [#allocation4], 0  ;;  %s985_s18 = smov [#allocation5]   ;;  %s845_s22 = scalar_lea.hbm %s1256_s1, 4096 }
   0x4   :  { %s31_s19 = sshll.u32 %s985_s18, 4  ;;  %p846_p0 = scmp.ne.s32.totalorder %s1256_s1, %s845_s22  ;;  %s32_s19 = int_to_ptr.vmem [resolvable:$true] %s31_s19 }
   0x5   :  { %p849_p1 = scmp.lt.u32.totalorder %s845_s22, %s1256_s1 }
   0x7   :  { %p851_p2 = pnand %p849_p1, %p846_p0 }
   0x9   :  { %854 = shalt.err (!%p851_p2)
}
   0xa   :  { %s855_s27 = scalar_lea.vmem %s32_s19, 4096  ;;  %p860_p4 = scmp.lt.s32.totalorder %s32_s19, %s32_s19 }
   0xb   :  { %p856_p3 = scmp.ne.s32.totalorder %s32_s19, %s855_s27  ;;  %p861_p5 = scmp.lt.s32.totalorder %s855_s27, %s855_s27 }
   0xd   :  { %p862_p6 = por %p861_p5, %p860_p4 }
   0xf   :  { %p863_p7 = pnand %p862_p6, %p856_p3 }
  0x11   :  { %866 = shalt.err (!%p863_p7)
}
  0x12   :  { %s986_s28 = smov 256   ;;  %s987_s29 = smov 16  }
  0x13   :  { %37 = dma.hbm_to_vmem [thread:$0]  %s1256_s1, 4096, %s32_s19, [#allocation6], %s986_s28, %s986_s28, %s987_s29  }
  0x14   :  { %s988_s7 = smov [#allocation8]   ;;  %s989_s9 = smov [#allocation2]  }
  0x15   :  { %s54_s8 = sshll.u32 %s988_s7, 4  ;;  %s19_s10 = sshll.u32 %s989_s9, 4  ;;  %s55_s8 = int_to_ptr.vmem [resolvable:$true] %s54_s8  ;;  %s20_s10 = int_to_ptr.vmem [resolvable:$true] %s19_s10 }
  0x16   :  { %s867_s13 = scalar_lea.hbm %s1258_s3, 16 }
  0x17   :  { %p868_p8 = scmp.ne.s32.totalorder %s1258_s3, %s867_s13  ;;  %p871_p9 = scmp.lt.u32.totalorder %s867_s13, %s1258_s3 }
  0x19   :  { %p873_p10 = pnand %p871_p9, %p868_p8 }
  0x1b   :  { %876 = shalt.err (!%p873_p10)
}
  0x1c   :  { %s877_s1 = scalar_lea.vmem %s55_s8, 16  ;;  %s881_s18 = scalar_lea.vmem %s55_s8, 32 }
  0x1d   :  { %p878_p11 = scmp.ne.s32.totalorder %s55_s8, %s877_s1  ;;  %p882_p12 = scmp.lt.s32.totalorder %s55_s8, %s55_s8 }
  0x1e   :  { %p883_p13 = scmp.lt.s32.totalorder %s881_s18, %s877_s1 }
  0x20   :  { %p884_p0 = por %p883_p13, %p882_p12 }
  0x22   :  { %p885_p1 = pnand %p884_p0, %p878_p11 }
  0x24   :  { %888 = shalt.err (!%p885_p1)
}
  0x25   :  { %57 = dma.hbm_to_vmem [thread:$0]  %s1258_s3, 16, %s55_s8, [#allocation9]  }
  0x26   :  { %s889_s23 = scalar_lea.hbm %s1255_s0, 512 }
  0x27   :  { %p890_p2 = scmp.ne.s32.totalorder %s1255_s0, %s889_s23  ;;  %p893_p3 = scmp.lt.u32.totalorder %s889_s23, %s1255_s0 }
  0x29   :  { %p895_p4 = pnand %p893_p3, %p890_p2 }
  0x2b   :  { %898 = shalt.err (!%p895_p4)
}
  0x2c   :  { %s899_s30 = scalar_lea.vmem %s20_s10, 512  ;;  %p904_p6 = scmp.lt.s32.totalorder %s20_s10, %s20_s10 }
  0x2d   :  { %p900_p5 = scmp.ne.s32.totalorder %s20_s10, %s899_s30  ;;  %p905_p7 = scmp.lt.s32.totalorder %s899_s30, %s899_s30 }
  0x2f   :  { %p906_p8 = por %p905_p7, %p904_p6 }
  0x31   :  { %p907_p9 = pnand %p906_p8, %p900_p5 }
  0x33   :  { %910 = shalt.err (!%p907_p9)
}
  0x34   :  { %s990_s3 = smov 128   ;;  %s991_s6 = smov 8  }
  0x35   :  { %25 = dma.hbm_to_vmem [thread:$0]  %s1255_s0, 512, %s20_s10, [#allocation3], %s990_s3, %s990_s3, %s991_s6  }
  0x36   :  { %s992_s9 = smov [#allocation7]   ;;  %s993_s12 = smov [#allocation10]  }
  0x37   :  { %s44_s11 = sshll.u32 %s992_s9, 4  ;;  %s64_s13 = sshll.u32 %s993_s12, 4  ;;  %s45_s11 = int_to_ptr.vmem [resolvable:$true] %s44_s11  ;;  %s65_s13 = int_to_ptr.vmem [resolvable:$true] %s64_s13 }
  0x38   :  { %s911_s16 = scalar_lea.hbm %s1257_s2, 64 }
  0x39   :  { %p912_p10 = scmp.ne.s32.totalorder %s1257_s2, %s911_s16  ;;  %p915_p11 = scmp.lt.u32.totalorder %s911_s16, %s1257_s2 }
  0x3b   :  { %p917_p12 = pnand %p915_p11, %p912_p10 }
  0x3d   :  { %920 = shalt.err (!%p917_p12)
}
  0x3e   :  { %s921_s0 = scalar_lea.vmem %s45_s11, 64  ;;  %p926_p0 = scmp.lt.s32.totalorder %s45_s11, %s45_s11 }
  0x3f   :  { %p922_p13 = scmp.ne.s32.totalorder %s45_s11, %s921_s0  ;;  %p927_p1 = scmp.lt.s32.totalorder %s921_s0, %s921_s0 }
  0x41   :  { %p928_p2 = por %p927_p1, %p926_p0 }
  0x43   :  { %p929_p3 = pnand %p928_p2, %p922_p13 }
  0x45   :  { %932 = shalt.err (!%p929_p3)
}
  0x46   :  { %47 = dma.hbm_to_vmem [thread:$0]  %s1257_s2, 64, %s45_s11, [#allocation6]  }
  0x47   :  { %s933_s23 = scalar_lea.hbm %s1259_s4, 16 }
  0x48   :  { %p934_p4 = scmp.ne.s32.totalorder %s1259_s4, %s933_s23  ;;  %p937_p5 = scmp.lt.u32.totalorder %s933_s23, %s1259_s4 }
  0x4a   :  { %p939_p6 = pnand %p937_p5, %p934_p4 }
  0x4c   :  { %942 = shalt.err (!%p939_p6)
}
  0x4d   :  { %s943_s30 = scalar_lea.vmem %s65_s13, 16  ;;  %s947_s3 = scalar_lea.vmem %s65_s13, 32 }
  0x4e   :  { %p944_p7 = scmp.ne.s32.totalorder %s65_s13, %s943_s30  ;;  %p948_p8 = scmp.lt.s32.totalorder %s65_s13, %s65_s13 }
  0x4f   :  { %p949_p9 = scmp.lt.s32.totalorder %s947_s3, %s943_s30 }
  0x51   :  { %p950_p10 = por %p949_p9, %p948_p8 }
  0x53   :  { %p951_p11 = pnand %p950_p10, %p944_p7 }
  0x55   :  { %954 = shalt.err (!%p951_p11)
}
  0x56   :  { %67 = dma.hbm_to_vmem [thread:$0]  %s1259_s4, 16, %s65_s13, [#allocation9]  }
  0x57   :  { %977 = dma.done.wait [#allocation3], 512  }
  0x58   :  { %978 = vsyncadd [#allocation3], 4294966784 }
  0x59   :  { %979 = dma.done.wait [#allocation6], 4160  }
  0x5a   :  { %980 = vsyncadd [#allocation6], 4294963136 }
  0x5b   :  { %981 = dma.done.wait [#allocation9], 32  }
  0x5c   :  { %982 = vsyncadd [#allocation9], 4294967264  ;;  %v84_v0 = vld [vmem:[#allocation2] sm:$0xff]  ;;  %v86_v1 = vld [vmem:[#allocation2 + $0x10] sm:$0xff]  ;;  %v994_v50 = vmov 0   ;;  %s995_s4 = smov [#allocation11]  }
  0x5d   :  { %v85_v2 = vld [vmem:[#allocation2 + $0x8] sm:$0xff]  ;;  %88 = vadd.xlane.f32.xlu0 %v84_v0  ;;  %92 = vadd.xlane.f32.xlu1 %v86_v1  ;;  %v87_v3 = vld [vmem:[#allocation2 + $0x18] sm:$0xff]  ;;  %v757_v4 = vld [vmem:[#allocation5 + $0x4] ss:$16 sps:$4 sm:$0xff]   ;;  %s682_s7 = sshll.u32 %s995_s4, 4  ;;  %s683_s7 = int_to_ptr.vmem [resolvable:$true] %s682_s7 }
  0x5e   :  { %v759_v5 = vld [vmem:[#allocation5 + $0xc] ss:$16 sps:$4 sm:$0xff]   ;;  %v761_v6 = vld [vmem:[#allocation5] ss:$16 sps:$4 sm:$0xff]   ;;  %v762_v7 = vld [vmem:[#allocation5 + $0x8] ss:$16 sps:$4 sm:$0xff]   ;;  %371 = vmatprep.subr.bf16.mxu0 %v757_v4  ;;  %403 = vmatprep.mubr.bf16.mxu0 %v994_v50  ;;  %p960_p13 = scmp.lt.s32.totalorder %s683_s7, %s683_s7 }
  0x5f   :  { %v763_v8 = vld [vmem:[#allocation5 + $0x24] ss:$16 sps:$4 sm:$0xff]   ;;  %v765_v9 = vld [vmem:[#allocation5 + $0x2c] ss:$16 sps:$4 sm:$0xff]   ;;  %424 = vmatprep.subr.bf16.mxu1 %v759_v5  ;;  %372 = vmatpush1.bf16.msra.mxu0 %v761_v6  ;;  %v767_v26 = vld [vmem:[#allocation5 + $0x20] ss:$16 sps:$4 sm:$0xff]  }
  0x60   :  { %425 = vmatpush1.bf16.msra.mxu1 %v762_v7  ;;  %373 = vmatprep.subr.bf16.mxu0 %v763_v8  ;;  %v768_v27 = vld [vmem:[#allocation5 + $0x28] ss:$16 sps:$4 sm:$0xff]   ;;  %v769_v28 = vld [vmem:[#allocation5 + $0x44] ss:$16 sps:$4 sm:$0xff]   ;;  %v771_v29 = vld [vmem:[#allocation5 + $0x4c] ss:$16 sps:$4 sm:$0xff]  }
  0x61   :  { %90 = vadd.xlane.f32.xlu0 %v85_v2  ;;  %94 = vadd.xlane.f32.xlu1 %v87_v3  ;;  %v773_v30 = vld [vmem:[#allocation5 + $0x40] ss:$16 sps:$4 sm:$0xff]   ;;  %v774_v31 = vld [vmem:[#allocation5 + $0x48] ss:$16 sps:$4 sm:$0xff]   ;;  %v775_v32 = vld [vmem:[#allocation5 + $0x64] ss:$16 sps:$4 sm:$0xff]  }
  0x62   :  { %426 = vmatprep.subr.bf16.mxu1 %v765_v9  ;;  %v777_v33 = vld [vmem:[#allocation5 + $0x6c] ss:$16 sps:$4 sm:$0xff]   ;;  %v779_v34 = vld [vmem:[#allocation5 + $0x60] ss:$16 sps:$4 sm:$0xff]   ;;  %v780_v35 = vld [vmem:[#allocation5 + $0x68] ss:$16 sps:$4 sm:$0xff]   ;;  %456 = vmatprep.mubr.bf16.mxu1 %v994_v50 }
  0x63   :  { %374 = vmatpush1.bf16.msra.mxu0 %v767_v26  ;;  %v781_v36 = vld [vmem:[#allocation5 + $0x84] ss:$16 sps:$4 sm:$0xff]   ;;  %v783_v37 = vld [vmem:[#allocation5 + $0x8c] ss:$16 sps:$4 sm:$0xff]   ;;  %v785_v38 = vld [vmem:[#allocation5 + $0x80] ss:$16 sps:$4 sm:$0xff]  }
  0x64   :  { %427 = vmatpush1.bf16.msra.mxu1 %v768_v27  ;;  %375 = vmatprep.subr.bf16.mxu0 %v769_v28  ;;  %v786_v39 = vld [vmem:[#allocation5 + $0x88] ss:$16 sps:$4 sm:$0xff]   ;;  %v787_v40 = vld [vmem:[#allocation5 + $0xa4] ss:$16 sps:$4 sm:$0xff]   ;;  %v789_v41 = vld [vmem:[#allocation5 + $0xac] ss:$16 sps:$4 sm:$0xff]  }
  0x65   :  { %428 = vmatprep.subr.bf16.mxu1 %v771_v29  ;;  %v791_v42 = vld [vmem:[#allocation5 + $0xa0] ss:$16 sps:$4 sm:$0xff]   ;;  %v792_v43 = vld [vmem:[#allocation5 + $0xa8] ss:$16 sps:$4 sm:$0xff]   ;;  %v793_v44 = vld [vmem:[#allocation5 + $0xc4] ss:$16 sps:$4 sm:$0xff]  }
  0x66   :  { %v795_v45 = vld [vmem:[#allocation5 + $0xcc] ss:$16 sps:$4 sm:$0xff]   ;;  %v797_v46 = vld [vmem:[#allocation5 + $0xc0] ss:$16 sps:$4 sm:$0xff]   ;;  %v798_v47 = vld [vmem:[#allocation5 + $0xc8] ss:$16 sps:$4 sm:$0xff]  }
  0x67   :  { %376 = vmatpush1.bf16.msra.mxu0 %v773_v30  ;;  %v799_v48 = vld [vmem:[#allocation5 + $0xe4] ss:$16 sps:$4 sm:$0xff]   ;;  %v801_v49 = vld [vmem:[#allocation5 + $0xec] ss:$16 sps:$4 sm:$0xff]   ;;  %v803_v51 = vld [vmem:[#allocation5 + $0xe0] ss:$16 sps:$4 sm:$0xff]  }
  0x68   :  { %429 = vmatpush1.bf16.msra.mxu1 %v774_v31  ;;  %377 = vmatprep.subr.bf16.mxu0 %v775_v32  ;;  %v804_v52 = vld [vmem:[#allocation5 + $0xe8] ss:$16 sps:$4 sm:$0xff]   ;;  %v697_v8 = vld [vmem:[#allocation10] ss:$0 sm:$0xff]  ;;  %v189_v27 = vld [vmem:[#allocation7] sm:$0xf] }
  0x69   :  { %430 = vmatprep.subr.bf16.mxu1 %v777_v33  ;;  %s955_s8 = scalar_lea.vmem %s683_s7, 1024 }
  0x6a   :  { %p956_p12 = scmp.ne.s32.totalorder %s683_s7, %s955_s8  ;;  %p961_p0 = scmp.lt.s32.totalorder %s955_s8, %s955_s8 }
  0x6b   :  { %378 = vmatpush1.bf16.msra.mxu0 %v779_v34 }
  0x6c   :  { %431 = vmatpush1.bf16.msra.mxu1 %v780_v35  ;;  %379 = vmatprep.subr.bf16.mxu0 %v781_v36  ;;  %p962_p1 = por %p961_p0, %p960_p13 }
  0x6d   :  { %432 = vmatprep.subr.bf16.mxu1 %v783_v37 }
  0x6e   :  { %p963_p2 = pnand %p962_p1, %p956_p12 }
  0x6f   :  { %380 = vmatpush1.bf16.msra.mxu0 %v785_v38 }
  0x70   :  { %433 = vmatpush1.bf16.msra.mxu1 %v786_v39  ;;  %381 = vmatprep.subr.bf16.mxu0 %v787_v40 }
  0x71   :  { %434 = vmatprep.subr.bf16.mxu1 %v789_v41 }
  0x73   :  { %382 = vmatpush1.bf16.msra.mxu0 %v791_v42 }
  0x74   :  { %435 = vmatpush1.bf16.msra.mxu1 %v792_v43  ;;  %383 = vmatprep.subr.bf16.mxu0 %v793_v44 }
  0x75   :  { %436 = vmatprep.subr.bf16.mxu1 %v795_v45 }
  0x77   :  { %384 = vmatpush1.bf16.msra.mxu0 %v797_v46 }
  0x78   :  { %437 = vmatpush1.bf16.msra.mxu1 %v798_v47  ;;  %385 = vmatprep.subr.bf16.mxu0 %v799_v48 }
  0x79   :  { %438 = vmatprep.subr.bf16.mxu1 %v801_v49 }
  0x7b   :  { %386 = vmatpush1.bf16.msra.mxu0 %v803_v51 }
  0x7c   :  { %439 = vmatpush1.bf16.msra.mxu1 %v804_v52 }
  0xea   :  { %v89_v10 = vpop.xlane.xlu0 %88  ;;  %v93_v11 = vpop.xlane.xlu1 %92 }
  0xeb   :  { %v97_v12 = vmul.f32 0.0078125, %v89_v10  ;;  %v99_v13 = vmul.f32 0.0078125, %v93_v11 }
  0xed   :  { %v1089_v14 = vsub.f32 %v84_v0, %v97_v12  ;;  %v1091_v15 = vsub.f32 %v86_v1, %v99_v13 }
  0xee   :  { %v91_v16 = vpop.xlane.xlu0 %90  ;;  %v95_v17 = vpop.xlane.xlu1 %94 }
  0xef   :  { %v98_v18 = vmul.f32 0.0078125, %v91_v16  ;;  %v105_v19 = vmul.f32 %v1089_v14, %v1089_v14  ;;  %v100_v20 = vmul.f32 0.0078125, %v95_v17  ;;  %v107_v23 = vmul.f32 %v1091_v15, %v1091_v15 }
  0xf1   :  { %v1095_v21 = vsub.f32 %v85_v2, %v98_v18  ;;  %109 = vadd.xlane.f32.xlu0 %v105_v19  ;;  %v1097_v22 = vsub.f32 %v87_v3, %v100_v20  ;;  %v696_v3 = vld [vmem:[#allocation8] ss:$0 sm:$0xff] }
  0xf3   :  { %v106_v24 = vmul.f32 %v1095_v21, %v1095_v21  ;;  %v108_v25 = vmul.f32 %v1097_v22, %v1097_v22 }
  0xf5   :  { %113 = vadd.xlane.f32.xlu0 %v107_v23  ;;  %111 = vadd.xlane.f32.xlu1 %v106_v24  ;;  %v191_v23 = vlaneseq }
  0xf7   :  { %v192_v24 = vshrl.u32 %v191_v23, 7 }
  0xf9   :  { %115 = vadd.xlane.f32.xlu1 %v108_v25  ;;  %v193_v25 = vsub.s32 0, %v192_v24  ;;  %v201_v26 = vsub.s32 2, %v192_v24  ;;  %v205_v28 = vsub.s32 3, %v192_v24 }
  0xfb   :  { %v1111_v29 = vrot.slane %v189_v27, %v201_v26  ;;  %v1115_v31 = vrot.slane %v189_v27, %v205_v28 }
 0x17e   :  { %v110_v53 = vpop.xlane.xlu0 %109 }
 0x17f   :  { %v117_v54 = vmul.f32 0.0078125, %v110_v53 }
 0x181   :  { %v121_v55 = vadd.f32 1e-05, %v117_v54 }
 0x182   :  { %v112_v56 = vpop.xlane.xlu1 %111  ;;  %v114_v57 = vpop.xlane.xlu0 %113 }
 0x183   :  { %805 = vrsqrt.f32 %v121_v55  ;;  %v118_v58 = vmul.f32 0.0078125, %v112_v56  ;;  %v119_v59 = vmul.f32 0.0078125, %v114_v57 }
 0x185   :  { %v122_v60 = vadd.f32 1e-05, %v118_v58  ;;  %v123_v61 = vadd.f32 1e-05, %v119_v59 }
 0x186   :  { %v116_v62 = vpop.xlane.xlu1 %115 }
 0x187   :  { %807 = vrsqrt.f32 %v122_v60  ;;  %v120_v63 = vmul.f32 0.0078125, %v116_v62 }
 0x188   :  { %809 = vrsqrt.f32 %v123_v61 }
 0x189   :  { %v124_v0 = vadd.f32 1e-05, %v120_v63 }
 0x18b   :  { %811 = vrsqrt.f32 %v124_v0 }
 0x18d   :  { %v806_v1 = vpop.eup %805 }
 0x18e   :  { %v129_v2 = vmul.f32 %v806_v1, %v1089_v14 }
 0x190   :  { %v140_v6 = vmul.f32 %v696_v3, %v129_v2 }
 0x191   :  { %v808_v4 = vpop.eup %807 }
 0x192   :  { %v130_v5 = vmul.f32 %v808_v4, %v1095_v21  ;;  %v810_v7 = vpop.eup %809  ;;  %v151_v11 = vadd.f32 %v697_v8, %v140_v6 }
 0x193   :  { %v131_v13 = vmul.f32 %v810_v7, %v1091_v15  ;;  %v197_v15 = vsub.s32 1, %v192_v24 }
 0x194   :  { %v141_v9 = vmul.f32 %v696_v3, %v130_v5 }
 0x195   :  { %v812_v10 = vpop.eup %811  ;;  %v142_v14 = vmul.f32 %v696_v3, %v131_v13  ;;  %v1113_v30 = vrot.slane %v189_v27, %v197_v15 }
 0x196   :  { %v152_v12 = vadd.f32 %v697_v8, %v141_v9  ;;  %v132_v16 = vmul.f32 %v812_v10, %v1097_v22  ;;  %v1109_v22 = vrot.slane %v189_v27, %v193_v25 }
 0x197   :  { %v153_v20 = vadd.f32 %v697_v8, %v142_v14 }
 0x198   :  { %v155_v17 = vpack.c.bf16 %v152_v12, %v151_v11  ;;  %v143_v18 = vmul.f32 %v696_v3, %v132_v16 }
 0x19a   :  { %404 = vmatmul.mubr.bf16.vlgmr.msra.gmra.mrb[0].mxu0 %v155_v17  ;;  %457 = vmatmul.mubr.bf16.vlgmr.msra.gmra.mrb[0].mxu1 %v155_v17  ;;  %v154_v19 = vadd.f32 %v697_v8, %v143_v18 }
 0x19b   :  { %413 = vmatprep.mubr.bf16.mxu0 %v994_v50  ;;  %466 = vmatprep.mubr.bf16.mxu1 %v994_v50 }
 0x19c   :  { %v156_v21 = vpack.c.bf16 %v154_v19, %v153_v20 }
 0x1a2   :  { %414 = vmatmul.mubr.bf16.gmra.mrb[4].mxu0 %v156_v21  ;;  %467 = vmatmul.mubr.bf16.gmra.mrb[4].mxu1 %v156_v21 }
 0x26d   :  { %v405_v32 = vpop.f32.mrb[0].mxu0  ;;  %v458_v33 = vpop.f32.mrb[0].mxu1 }
 0x26e   :  { %v1118_v34 = vadd.f32 %v405_v32, %v1109_v22  ;;  %v1121_v35 = vadd.f32 %v458_v33, %v1111_v29  ;;  %v407_v36 = vpop.f32.mrb[1].mxu0  ;;  %v460_v37 = vpop.f32.mrb[1].mxu1 }
 0x26f   :  { %v1124_v38 = vadd.f32 %v407_v36, %v1113_v30  ;;  %v1127_v39 = vadd.f32 %v460_v37, %v1115_v31  ;;  %v409_v40 = vpop.f32.mrb[2].mxu0  ;;  %v462_v41 = vpop.f32.mrb[2].mxu1 }
 0x270   :  { %v493_v42 = vmul.f32 0.044715, %v1118_v34  ;;  %v495_v43 = vmul.f32 0.044715, %v1121_v35  ;;  %v1136_v48 = vadd.f32 %v409_v40, %v1109_v22  ;;  %v1139_v49 = vadd.f32 %v462_v41, %v1111_v29  ;;  %v411_v50 = vpop.f32.mrb[3].mxu0  ;;  %v464_v51 = vpop.f32.mrb[3].mxu1 }
 0x271   :  { %v494_v44 = vmul.f32 0.044715, %v1124_v38  ;;  %v496_v45 = vmul.f32 0.044715, %v1127_v39  ;;  %v1144_v54 = vadd.f32 %v411_v50, %v1113_v30  ;;  %v1156_v2 = vadd.f32 %v464_v51, %v1115_v31 }
 0x272   :  { %v509_v46 = vmul.f32 %v493_v42, %v1118_v34  ;;  %v511_v47 = vmul.f32 %v495_v43, %v1121_v35  ;;  %v497_v57 = vmul.f32 0.044715, %v1136_v48  ;;  %v499_v60 = vmul.f32 0.044715, %v1139_v49 }
 0x273   :  { %v510_v52 = vmul.f32 %v494_v44, %v1124_v38  ;;  %v512_v53 = vmul.f32 %v496_v45, %v1127_v39  ;;  %v498_v8 = vmul.f32 0.044715, %v1144_v54  ;;  %v500_v23 = vmul.f32 0.044715, %v1156_v2 }
 0x274   :  { %v525_v55 = vmul.f32 %v509_v46, %v1118_v34  ;;  %v527_v56 = vmul.f32 %v511_v47, %v1121_v35  ;;  %v513_v1 = vmul.f32 %v497_v57, %v1136_v48  ;;  %v515_v7 = vmul.f32 %v499_v60, %v1139_v49 }
 0x275   :  { %v526_v58 = vmul.f32 %v510_v52, %v1124_v38  ;;  %v528_v59 = vmul.f32 %v512_v53, %v1127_v39  ;;  %v415_v61 = vpop.f32.mrb[4].mxu0  ;;  %v468_v62 = vpop.f32.mrb[4].mxu1  ;;  %v514_v19 = vmul.f32 %v498_v8, %v1144_v54  ;;  %v516_v28 = vmul.f32 %v500_v23, %v1156_v2 }
 0x276   :  { %v541_v63 = vadd.f32 %v525_v55, %v1118_v34  ;;  %v543_v0 = vadd.f32 %v527_v56, %v1121_v35  ;;  %v417_v3 = vpop.f32.mrb[5].mxu0  ;;  %v470_v4 = vpop.f32.mrb[5].mxu1  ;;  %v529_v13 = vmul.f32 %v513_v1, %v1136_v48  ;;  %v531_v14 = vmul.f32 %v515_v7, %v1139_v49 }
 0x277   :  { %v542_v5 = vadd.f32 %v526_v58, %v1124_v38  ;;  %v544_v6 = vadd.f32 %v528_v59, %v1127_v39  ;;  %v419_v9 = vpop.f32.mrb[6].mxu0  ;;  %v1162_v10 = vpop.f32.mrb[6].mxu1  ;;  %v1174_v24 = vadd.f32 %v415_v61, %v1109_v22  ;;  %v530_v26 = vmul.f32 %v514_v19, %v1144_v54 }
 0x278   :  { %v557_v11 = vmul.f32 0.7978846, %v541_v63  ;;  %v559_v12 = vmul.f32 0.7978846, %v543_v0  ;;  %v1165_v16 = vpop.f32.mrb[7].mxu0  ;;  %v1169_v20 = vpop.f32.mrb[7].mxu1  ;;  %v545_v21 = vadd.f32 %v529_v13, %v1136_v48  ;;  %v547_v25 = vadd.f32 %v531_v14, %v1139_v49 }
 0x279   :  { %v558_v17 = vmul.f32 0.7978846, %v542_v5  ;;  %v560_v18 = vmul.f32 0.7978846, %v544_v6  ;;  %v1179_v27 = vadd.f32 %v468_v62, %v1111_v29  ;;  %v546_v33 = vadd.f32 %v530_v26, %v1144_v54 }
 0x27a   :  { %813 = vtanh.f32 %v557_v11  ;;  %v561_v15 = vmul.f32 0.7978846, %v545_v21  ;;  %v563_v32 = vmul.f32 0.7978846, %v547_v25  ;;  %v501_v36 = vmul.f32 0.044715, %v1174_v24 }
 0x27b   :  { %815 = vtanh.f32 %v559_v12  ;;  %v477_v37 = vmul.f32 0.5, %v1118_v34  ;;  %v532_v40 = vmul.f32 %v516_v28, %v1156_v2  ;;  %v503_v41 = vmul.f32 0.044715, %v1179_v27 }
 0x27c   :  { %817 = vtanh.f32 %v558_v17  ;;  %v562_v42 = vmul.f32 0.7978846, %v546_v33  ;;  %v517_v43 = vmul.f32 %v501_v36, %v1174_v24  ;;  %v1189_v44 = vadd.f32 %v417_v3, %v1113_v30 }
 0x27d   :  { %819 = vtanh.f32 %v560_v18  ;;  %v548_v45 = vadd.f32 %v532_v40, %v1156_v2  ;;  %v519_v46 = vmul.f32 %v503_v41, %v1179_v27  ;;  %v1194_v47 = vadd.f32 %v470_v4, %v1115_v31 }
 0x27e   :  { %821 = vtanh.f32 %v561_v15  ;;  %v1197_v34 = vadd.f32 %v419_v9, %v1109_v22  ;;  %v479_v50 = vmul.f32 0.5, %v1121_v35  ;;  %v533_v51 = vmul.f32 %v517_v43, %v1174_v24 }
 0x27f   :  { %823 = vtanh.f32 %v563_v32  ;;  %v502_v52 = vmul.f32 0.044715, %v1189_v44  ;;  %v478_v53 = vmul.f32 0.5, %v1124_v38  ;;  %v564_v55 = vmul.f32 0.7978846, %v548_v45 }
 0x280   :  { %825 = vtanh.f32 %v562_v42  ;;  %v535_v56 = vmul.f32 %v519_v46, %v1179_v27  ;;  %v504_v57 = vmul.f32 0.044715, %v1194_v47  ;;  %v480_v58 = vmul.f32 0.5, %v1127_v39 }
 0x281   :  { %v549_v59 = vadd.f32 %v533_v51, %v1174_v24  ;;  %v518_v22 = vmul.f32 %v502_v52, %v1189_v44  ;;  %v505_v35 = vmul.f32 0.044715, %v1197_v34  ;;  %v481_v61 = vmul.f32 0.5, %v1136_v48 }
 0x282   :  { %827 = vtanh.f32 %v564_v55  ;;  %v551_v62 = vadd.f32 %v535_v56, %v1179_v27  ;;  %v520_v38 = vmul.f32 %v504_v57, %v1194_v47  ;;  %v1217_v48 = vadd.f32 %v1162_v10, %v1111_v29 }
 0x283   :  { %v565_v1 = vmul.f32 0.7978846, %v549_v59  ;;  %v534_v3 = vmul.f32 %v518_v22, %v1189_v44  ;;  %v521_v39 = vmul.f32 %v505_v35, %v1197_v34  ;;  %v482_v10 = vmul.f32 0.5, %v1144_v54 }
 0x284   :  { %v814_v60 = vpop.eup %813  ;;  %v567_v6 = vmul.f32 0.7978846, %v551_v62  ;;  %v536_v7 = vmul.f32 %v520_v38, %v1194_v47  ;;  %v507_v28 = vmul.f32 0.044715, %v1217_v48  ;;  %v483_v43 = vmul.f32 0.5, %v1139_v49 }
 0x285   :  { %v816_v63 = vpop.eup %815  ;;  %v589_v0 = vadd.f32 1.0, %v814_v60  ;;  %829 = vtanh.f32 %v565_v1  ;;  %v550_v12 = vadd.f32 %v534_v3, %v1189_v44  ;;  %v537_v26 = vmul.f32 %v521_v39, %v1197_v34 }
 0x286   :  { %v818_v4 = vpop.eup %817  ;;  %v591_v5 = vadd.f32 1.0, %v816_v63  ;;  %831 = vtanh.f32 %v567_v6  ;;  %v552_v14 = vadd.f32 %v536_v7, %v1194_v47  ;;  %v523_v45 = vmul.f32 %v507_v28, %v1217_v48 }
 0x287   :  { %v820_v8 = vpop.eup %819  ;;  %v605_v9 = vmul.f32 %v589_v0, %v477_v37  ;;  %v590_v11 = vadd.f32 1.0, %v818_v4  ;;  %v566_v25 = vmul.f32 0.7978846, %v550_v12  ;;  %v553_v42 = vadd.f32 %v537_v26, %v1197_v34 }
 0x288   :  { %v822_v13 = vpop.eup %821  ;;  %v607_v17 = vmul.f32 %v591_v5, %v479_v50  ;;  %v592_v18 = vadd.f32 1.0, %v820_v8  ;;  %v568_v15 = vmul.f32 0.7978846, %v552_v14  ;;  %v422_v54 = vadd.f32 %v1165_v16, %v1113_v30 }
 0x289   :  { %v824_v19 = vpop.eup %823  ;;  %v606_v21 = vmul.f32 %v590_v11, %v478_v53  ;;  %v593_v23 = vadd.f32 1.0, %v822_v13  ;;  %833 = vtanh.f32 %v566_v25  ;;  %v475_v46 = vadd.f32 %v1169_v20, %v1115_v31 }
 0x28a   :  { %v608_v29 = vmul.f32 %v592_v18, %v480_v58  ;;  %v826_v32 = vpop.eup %825  ;;  %v595_v37 = vadd.f32 1.0, %v824_v19  ;;  %835 = vtanh.f32 %v568_v15  ;;  %v484_v53 = vmul.f32 0.5, %v1156_v2 }
 0x28b   :  { %v738_v33 = vpack.c.bf16 %v606_v21, %v605_v9  ;;  %v609_v36 = vmul.f32 %v593_v23, %v481_v61  ;;  %v594_v41 = vadd.f32 1.0, %v826_v32  ;;  %v539_v56 = vmul.f32 %v523_v45, %v1217_v48 }
 0x28c   :  { %v739_v40 = vpack.c.bf16 %v608_v29, %v607_v17  ;;  %v828_v50 = vpop.eup %827  ;;  %v611_v52 = vmul.f32 %v595_v37, %v483_v43  ;;  %v569_v58 = vmul.f32 0.7978846, %v553_v42  ;;  %v506_v49 = vmul.f32 0.044715, %v422_v54 }
 0x28d   :  { %669 = vst [vmem:[#allocation11] sm:$0xff] %v738_v33  ;;  %v610_v51 = vmul.f32 %v594_v41, %v482_v10  ;;  %v596_v55 = vadd.f32 1.0, %v828_v50  ;;  %v508_v59 = vmul.f32 0.044715, %v475_v46  ;;  %v555_v30 = vadd.f32 %v539_v56, %v1217_v48 }
 0x28e   :  { %670 = vst [vmem:[#allocation11 + $0x8] sm:$0xff] %v739_v40  ;;  %v522_v20 = vmul.f32 %v506_v49, %v422_v54  ;;  %v485_v2 = vmul.f32 0.5, %v1174_v24  ;;  %837 = vtanh.f32 %v569_v58  ;;  %v487_v3 = vmul.f32 0.5, %v1179_v27 }
 0x28f   :  { %v740_v57 = vpack.c.bf16 %v610_v51, %v609_v36  ;;  %v830_v22 = vpop.eup %829  ;;  %v612_v35 = vmul.f32 %v596_v55, %v484_v53  ;;  %v524_v60 = vmul.f32 %v508_v59, %v475_v46  ;;  %v571_v38 = vmul.f32 0.7978846, %v555_v30 }
 0x290   :  { %v832_v16 = vpop.eup %831  ;;  %v597_v31 = vadd.f32 1.0, %v830_v22  ;;  %v538_v63 = vmul.f32 %v522_v20, %v422_v54  ;;  %v486_v39 = vmul.f32 0.5, %v1189_v44  ;;  %v488_v11 = vmul.f32 0.5, %v1194_v47 }
 0x291   :  { %671 = vst [vmem:[#allocation11 + $0x10] sm:$0xff] %v740_v57  ;;  %v741_v61 = vpack.c.bf16 %v612_v35, %v611_v52  ;;  %v599_v62 = vadd.f32 1.0, %v832_v16  ;;  %v540_v0 = vmul.f32 %v524_v60, %v475_v46  ;;  %839 = vtanh.f32 %v571_v38 }
 0x292   :  { %v613_v5 = vmul.f32 %v597_v31, %v485_v2  ;;  %v554_v7 = vadd.f32 %v538_v63, %v422_v54  ;;  %v489_v25 = vmul.f32 0.5, %v1197_v34  ;;  %v491_v47 = vmul.f32 0.5, %v1217_v48 }
 0x293   :  { %v834_v1 = vpop.eup %833  ;;  %672 = vst [vmem:[#allocation11 + $0x18] sm:$0xff] %v741_v61  ;;  %v556_v8 = vadd.f32 %v540_v0, %v475_v46  ;;  %v615_v9 = vmul.f32 %v599_v62, %v487_v3  ;;  %v490_v15 = vmul.f32 0.5, %v422_v54  ;;  %v492_v33 = vmul.f32 0.5, %v475_v46 }
 0x294   :  { %v836_v4 = vpop.eup %835  ;;  %v598_v6 = vadd.f32 1.0, %v834_v1  ;;  %v570_v13 = vmul.f32 0.7978846, %v554_v7 }
 0x295   :  { %v600_v12 = vadd.f32 1.0, %v836_v4  ;;  %v572_v17 = vmul.f32 0.7978846, %v556_v8 }
 0x296   :  { %v614_v24 = vmul.f32 %v598_v6, %v486_v39  ;;  %841 = vtanh.f32 %v570_v13 }
 0x297   :  { %v616_v18 = vmul.f32 %v600_v12, %v488_v11  ;;  %843 = vtanh.f32 %v572_v17 }
 0x298   :  { %v742_v14 = vpack.c.bf16 %v614_v24, %v613_v5  ;;  %v838_v27 = vpop.eup %837 }
 0x299   :  { %v743_v19 = vpack.c.bf16 %v616_v18, %v615_v9  ;;  %v601_v21 = vadd.f32 1.0, %v838_v27 }
 0x29a   :  { %673 = vst [vmem:[#allocation11 + $0x20] sm:$0xff] %v742_v14 }
 0x29b   :  { %674 = vst [vmem:[#allocation11 + $0x28] sm:$0xff] %v743_v19  ;;  %v840_v44 = vpop.eup %839  ;;  %v617_v10 = vmul.f32 %v601_v21, %v489_v25 }
 0x29c   :  { %v603_v23 = vadd.f32 1.0, %v840_v44 }
 0x29e   :  { %v619_v32 = vmul.f32 %v603_v23, %v491_v47 }
 0x2a0   :  { %v842_v26 = vpop.eup %841 }
 0x2a1   :  { %v844_v29 = vpop.eup %843  ;;  %v602_v28 = vadd.f32 1.0, %v842_v26 }
 0x2a2   :  { %v604_v36 = vadd.f32 1.0, %v844_v29 }
 0x2a3   :  { %v618_v37 = vmul.f32 %v602_v28, %v490_v15 }
 0x2a4   :  { %v620_v40 = vmul.f32 %v604_v36, %v492_v33 }
 0x2a5   :  { %v744_v41 = vpack.c.bf16 %v618_v37, %v617_v10 }
 0x2a6   :  { %v745_v42 = vpack.c.bf16 %v620_v40, %v619_v32 }
 0x2a7   :  { %675 = vst [vmem:[#allocation11 + $0x30] sm:$0xff] %v744_v41 }
 0x2a8   :  { %676 = vst [vmem:[#allocation11 + $0x38] sm:$0xff] %v745_v42 }
 0x2a9   :  { %966 = shalt.err (!%p963_p2)
}
 0x2aa   :  { %s967_s12 = scalar_lea.hbm %s1260_s5, 1024 }
 0x2ab   :  { %p968_p3 = scmp.ne.s32.totalorder %s1260_s5, %s967_s12  ;;  %p971_p4 = scmp.lt.u32.totalorder %s967_s12, %s1260_s5 }
 0x2ad   :  { %p973_p5 = pnand %p971_p4, %p968_p3 }
 0x2af   :  { %976 = shalt.err (!%p973_p5)
}
 0x2b0   :  { %688 = dma.vmem_to_hbm [thread:$0]  %s683_s7, 1024, %s1260_s5, [#allocation4], %s986_s28, %s986_s28, %s987_s29  }
 0x2b1   :  { %983 = dma.done.wait [#allocation4], 1024  }
 0x2b2   :  { %984 = vsyncadd [#allocation4], 4294966272 }
 0x2b3   :  { %692 = vsyncpa [#allocation3], 1 }
 0x2b4   :  { %693 = vsyncpa [#allocation6], 1 }
 0x2b5   :  { %694 = vsyncpa [#allocation9], 1 }
 0x2b6   :  { %695 = vsyncpa [#allocation4], 1 }

// kernel: block_forward.6
= control target key start
LH: loop header
LB: loop body
LE: loop exit
PB: predicated region body
PF: predicated region fallthrough
CT: control target
= control target key end

     0   :  { %s2137_s0 = inlined_call_operand.hbm [shape: bf16[2,16,384], index: 0, kind: input, shape index: {}, may-alias: {0,1,2}]   ;;  %s2138_s1 = inlined_call_operand.hbm [shape: bf16[2,16,384], index: 1, kind: input, shape index: {}, may-alias: {0,1,2}]   ;;  %s2139_s2 = inlined_call_operand.hbm [shape: bf16[2,16,384], index: 2, kind: input, shape index: {}, may-alias: {0,1,2}]   ;;  %s2140_s3 = inlined_call_operand.hbm [shape: bf16[2,16,128], index: 3, kind: output, shape index: {}]  }
   0x1   :  { %2152 = sst [smem:[#allocation18_spill]] %s2137_s0 }
   0x2   :  { %2153 = sst [smem:[#allocation19_spill]] %s2138_s1 }
   0x3   :  { %8 = vsyncpa [#allocation6], 0 }
   0x4   :  { %10 = vsyncpa [#allocation6 + $0x1], 0 }
   0x5   :  { %11 = vsyncpa [#allocation9], 0 }
   0x6   :  { %13 = vsyncpa [#allocation9 + $0x1], 0 }
   0x7   :  { %14 = vsyncpa [#allocation7], 0 }
   0x8   :  { %16 = vsyncpa [#allocation7 + $0x1], 0  ;;  %s1731_s12 = smov 0   ;;  %s1733_s13 = smov 0  }
   0x9   :  { %s1735_s14 = smov 0   ;;  %s1737_s15 = smov 0  }
   0xa   :  { %s1739_s16 = smov 0   ;;  %s1741_s17 = smov 0  }
   0xb LB: > { %2154 = sst [smem:[#allocation15_spill]] %s1692_s16  ;;  %s1762_s18 = sadd.s32 4294967295, %s1696_s17   ;;  %s1696_s17 = sphi %s1741_s17, %s22_s17   ;;  %s1692_s16 = sphi %s1739_s16, %s2177_s16   ;;  %s1688_s15 = sphi %s1737_s15, %s2176_s15   ;;  %s1684_s14 = sphi %s1735_s14, %s2180_s14   ;;  %s1680_s13 = sphi %s1733_s13, %s2179_s13   ;;  %s1676_s12 = sphi %s1731_s12, %s2178_s12  }
   0xc   : > { %s1323_s19 = sadd.s32 4294967294, %s1696_s17   ;;  %s41_s20 = sadd.s32 1, %s1692_s16 }
   0xd   : > { %s50_s21 = sadd.s32 1, %s1684_s14  ;;  %p43_p0 = scmp.ge.s32.totalorder %s41_s20, 2 }
   0xe   : > { %p57_p1 = scmp.ne.s32.totalorder %s1684_s14, %s1680_s13  ;;  %p58_p2 = scmp.eq.s32.totalorder %s1696_s17, 0 }
   0xf   : > { %p63_p3 = scmp.ne.s32.totalorder %s1680_s13, %s1676_s12  ;;  %s2182_s20 = smov (%p43_p0, %s41_s20), 0 }
  0x10   : > { %2155 = sst [smem:[#allocation16_spill]] %s2182_s20  ;;  %p1774_p4 = por %p58_p2, %p57_p1 }
  0x11   : > { %p64_p5 = scmp.eq.s32.totalorder %s1762_s18, 0  ;;  %s45_s23 = ssub.s32 %s1692_s16, %s2182_s20 }
  0x12   : > { %p153_p6 = scmp.eq.s32.totalorder %s1762_s18, 1  ;;  %p48_p7 = scmp.eq.s32.totalorder %s45_s23, 0 }
  0x13   : > { %p1782_p8 = por %p64_p5, %p63_p3  ;;  %p159_p10 = scmp.eq.s32.totalorder %s1323_s19, 1 }
  0x14   : > { %p1786_p9 = por %p153_p6, %p57_p1  ;;  %p1427_p13 = scmp.lt.s32.totalorder %s1696_s17, 2 }
  0x15   : > { %s2157_s24 = scalar_select %p1782_p8, 1, 0 }
  0x16   : > { %s2158_s25 = scalar_select %p1786_p9, 1, 0 }
  0x17   : > { %s1791_s26 = scalar_select %p48_p7, %s1684_s14, %s50_s21  }
  0x18   : > { %p1793_p11 = por %p159_p10, %p63_p3  ;;  %s2141_s28 = sand.u32 1, %s1684_s14  }
  0x19   : > { %2159 = sst [smem:[#allocation17_spill]] %s1791_s26  ;;  %s1802_s29 = sshll.u32 %s2141_s28, 3 }
  0x1a   : > { %s2160_s27 = scalar_select %p1793_p11, 1, 0 }
  0x1b   : > { %s1805_s30 = smul.u32 384, %s1692_s16  ;;  %p1809_p0 = pnand %p1427_p13, %p1774_p4 }
  0x1c   : > { %s203_s5 = sand.u32 1, %s1696_s17   ;;  %s2162_s1 = sld [smem:[#allocation19_spill]] }
  0x1d   : > { %s207_s9 = scalar_lea.vmem [#allocation8], %s1802_s29  ;;  %s1823_s19 = scalar_lea.sflag [#allocation9], %s203_s5 }
  0x1e   : > { %s220_s10 = sshll.u32 %s207_s9, 4  ;;  %p1828_p2 = pneg %p1809_p0  ;;  %s1821_s10 = int_to_ptr.vmem [resolvable:$true] %s220_s10 }
  0x22   : > { %s1226_s8 = scalar_lea.hbm %s2162_s1, %s1805_s30  ;;  %s1523_s7 = scalar_lea.hbm %s2162_s1, 768 }
  0x23   : > { %s1819_s11 = scalar_lea.hbm %s1226_s8, 64  ;;  %s1548_s21 = scalar_lea.hbm %s1226_s8, 192 }
  0x24   : > { %p1519_p1 = scmp.ne.s32.totalorder %s1819_s11, %s1548_s21  ;;  %p1524_p5 = scmp.lt.u32.totalorder %s1819_s11, %s2162_s1 }
  0x25   : > { %p1525_p6 = scmp.lt.u32.totalorder %s1523_s7, %s1548_s21  ;;  %p1527_p10 = scmp.lt.u32.totalorder %s1548_s21, %s1819_s11 }
  0x26   : > { %p1521_p3 = pnand %p1828_p2, %p1519_p1 }
  0x27   : > { %p1526_p7 = por %p1525_p6, %p1524_p5 }
  0x28   : > { %p1522_p4 = pneg %p1521_p3 }
  0x29   : > { %p1528_p13 = por %p1527_p10, %p1526_p7 }
  0x2b   : > { %p1529_p12 = pnand %p1528_p13, %p1522_p4 }
  0x2d   : > { %1532 = shalt.err (!%p1529_p12)
}
  0x2e   : > { %s1533_s5 = scalar_lea.vmem %s1821_s10, 128  ;;  %s1698_s8 = smov [#allocation8]  }
  0x2f   : > { %p1534_p1 = scmp.ne.s32.totalorder %s1821_s10, %s1533_s5  ;;  %s1538_s23 = sshll.u32 %s1698_s8, 4  ;;  %s1539_s23 = int_to_ptr.vmem [resolvable:$false] %s1538_s23 }
  0x30   : > { %s1540_s28 = scalar_lea.vmem %s1539_s23, 256  ;;  %p1541_p9 = scmp.lt.s32.totalorder %s1821_s10, %s1539_s23 }
  0x31   : > { %p1536_p3 = pnand %p1534_p1, %p1828_p2  ;;  %p1542_p8 = scmp.lt.s32.totalorder %s1540_s28, %s1533_s5 }
  0x33   : > { %p1537_p11 = pneg %p1536_p3  ;;  %p1543_p5 = por %p1542_p8, %p1541_p9 }
  0x35   : > { %p1544_p6 = pnand %p1543_p5, %p1537_p11 }
  0x37   : > { %1547 = shalt.err (!%p1544_p6)
}
  0x38   : > { %s2144_s21 = smov 192   ;;  %s2146_s6 = smov 64  }
  0x39   : > { %s2148_s7 = smov 4   ;;  %p1332_p8 = scmp.ge.s32.totalorder %s1696_s17, 1 }
  0x3a   : > { %1419 = dma.hbm_to_vmem [thread:$0]  (!%p1809_p0), %s1819_s11, 128, %s1821_s10, %s1823_s19, %s2144_s21, %s2146_s6, %s2148_s7  }
  0x3b   : > { %p255_p9 = scmp.lt.s32.totalorder %s1696_s17, 3  ;;  %s2165_s0 = sld [smem:[#allocation18_spill]] }
  0x3c   : > { %s183_s28 = scalar_lea.vmem [#allocation5], %s1802_s29  ;;  %s1874_s21 = scalar_lea.hbm %s2139_s2, %s1805_s30 }
  0x3d   : > { %p1857_p11 = pnand %p1332_p8, %p255_p9  ;;  %s193_s1 = sshll.u32 %s183_s28, 4  ;;  %s1868_s1 = int_to_ptr.vmem [resolvable:$true] %s193_s1 }
  0x3e   : > { %s2166_s6 = sand.u32 1, %s1684_s14  }
  0x3f   : > { %s2164_s9 = scalar_select %p1857_p11, 1, 0 }
  0x40   : > { %s1878_s7 = scalar_lea.sflag [#allocation6], %s2166_s6 }
  0x41   : > { %s1865_s23 = scalar_lea.hbm %s2165_s0, %s1805_s30  ;;  %s1554_s16 = scalar_lea.hbm %s2165_s0, 768 }
  0x42   : > { %s1549_s20 = scalar_lea.hbm %s1865_s23, 128  ;;  %p1555_p10 = scmp.lt.u32.totalorder %s1865_s23, %s2165_s0 }
  0x43   : > { %p1550_p12 = scmp.ne.s32.totalorder %s1865_s23, %s1549_s20  ;;  %p1556_p13 = scmp.lt.u32.totalorder %s1554_s16, %s1549_s20 }
  0x44   : > { %p1558_p3 = scmp.lt.u32.totalorder %s1549_s20, %s1865_s23 }
  0x45   : > { %p1552_p4 = pnand %p1550_p12, %p1828_p2  ;;  %p1557_p1 = por %p1556_p13, %p1555_p10 }
  0x47   : > { %p1553_p7 = pneg %p1552_p4  ;;  %p1559_p5 = por %p1558_p3, %p1557_p1 }
  0x49   : > { %p1560_p6 = pnand %p1559_p5, %p1553_p7 }
  0x4b   : > { %1563 = shalt.err (!%p1560_p6)
}
  0x4c   : > { %s1564_s30 = scalar_lea.vmem %s1868_s1, 128  ;;  %s1702_s6 = smov [#allocation5]  }
  0x4d   : > { %p1565_p8 = scmp.ne.s32.totalorder %s1868_s1, %s1564_s30  ;;  %s1569_s10 = sshll.u32 %s1702_s6, 4  ;;  %s1570_s10 = int_to_ptr.vmem [resolvable:$false] %s1569_s10 }
  0x4e   : > { %s1571_s26 = scalar_lea.vmem %s1570_s10, 256  ;;  %p1572_p4 = scmp.lt.s32.totalorder %s1868_s1, %s1570_s10 }
  0x4f   : > { %p1567_p9 = pnand %p1565_p8, %p1828_p2  ;;  %p1573_p11 = scmp.lt.s32.totalorder %s1571_s26, %s1564_s30 }
  0x51   : > { %p1568_p12 = pneg %p1567_p9  ;;  %p1574_p10 = por %p1573_p11, %p1572_p4 }
  0x53   : > { %p1575_p13 = pnand %p1574_p10, %p1568_p12 }
  0x55   : > { %1578 = shalt.err (!%p1575_p13)
}
  0x56   : > { %s2167_s16 = smov 4   ;;  %s2168_s20 = smov 64  }
  0x57   : > { %s2169_s11 = smov 192   ;;  %s1906_s5 = scalar_lea.hbm %s1874_s21, 128 }
  0x58   : > { %1416 = dma.hbm_to_vmem [thread:$0]  (!%p1809_p0), %s1865_s23, 128, %s1868_s1, %s1878_s7, %s2169_s11, %s2168_s20, %s2167_s16  }
  0x59   : > { %s234_s8 = scalar_lea.vmem [#allocation10], %s1802_s29  ;;  %s1609_s30 = scalar_lea.hbm %s1874_s21, 256 }
  0x5a   : > { %s247_s28 = sshll.u32 %s234_s8, 4  ;;  %p1580_p11 = scmp.ne.s32.totalorder %s1906_s5, %s1609_s30  ;;  %s1909_s28 = int_to_ptr.vmem [resolvable:$true] %s247_s28 }
  0x5b   : > { %s1584_s26 = scalar_lea.hbm %s2139_s2, 768  ;;  %p1585_p3 = scmp.lt.u32.totalorder %s1906_s5, %s2139_s2 }
  0x5c   : > { %p1582_p7 = pnand %p1580_p11, %p1828_p2  ;;  %p1586_p5 = scmp.lt.u32.totalorder %s1584_s26, %s1609_s30 }
  0x5d   : > { %p1588_p8 = scmp.lt.u32.totalorder %s1609_s30, %s1906_s5 }
  0x5e   : > { %p1583_p1 = pneg %p1582_p7  ;;  %p1587_p6 = por %p1586_p5, %p1585_p3 }
  0x60   : > { %p1589_p9 = por %p1588_p8, %p1587_p6 }
  0x62   : > { %p1590_p12 = pnand %p1589_p9, %p1583_p1 }
  0x64   : > { %1593 = shalt.err (!%p1590_p12)
}
  0x65   : > { %s1594_s29 = scalar_lea.vmem %s1909_s28, 128  ;;  %s1703_s21 = smov [#allocation10]  }
  0x66   : > { %p1595_p4 = scmp.ne.s32.totalorder %s1909_s28, %s1594_s29  ;;  %s1599_s7 = sshll.u32 %s1703_s21, 4  ;;  %s1600_s7 = int_to_ptr.vmem [resolvable:$false] %s1599_s7 }
  0x67   : > { %s1601_s0 = scalar_lea.vmem %s1600_s7, 256  ;;  %p1602_p11 = scmp.lt.s32.totalorder %s1909_s28, %s1600_s7 }
  0x68   : > { %p1597_p10 = pnand %p1595_p4, %p1828_p2  ;;  %p1603_p7 = scmp.lt.s32.totalorder %s1601_s0, %s1594_s29 }
  0x6a   : > { %p1598_p13 = pneg %p1597_p10  ;;  %p1604_p3 = por %p1603_p7, %p1602_p11 }
  0x6c   : > { %p1605_p5 = pnand %p1604_p3, %p1598_p13 }
  0x6e   : > { %1608 = shalt.err (!%p1605_p5)
}
  0x6f   : > { %1422 = dma.hbm_to_vmem [thread:$0]  (!%p1809_p0), %s1906_s5, 128, %s1909_s28, %s1823_s19, %s2169_s11, %s2168_s20, %s2167_s16  }
  0x70   : > { %p2170_p2 = scmp.ne.s32.totalorder %s2164_s9, 0 }
  0x71   : > { %s1939_s22 = sand.u32 (!%p2170_p2), 1, %s1680_s13   ;;  %p2171_p1 = scmp.ne.s32.totalorder (!%p2170_p2), %s2157_s24, 0 }
  0x72   : > { %259 = sbr.rel (%p2170_p2) target bundleno = 1506 (0x5e2), region = 32  ;;  %s1942_s23 = sshll.u32 (!%p2170_p2), %s1939_s22, 3 }
  0x73   : > { %s262_s4 = scalar_lea.sflag (!%p2170_p2), [#allocation6], %s1939_s22  ;;  %s265_s8 = scalar_lea.vmem (!%p2170_p2), [#allocation5], %s1942_s23 }
  0x79   : > { %1663 = dma.done.wait (%p2171_p1), %s262_s4, 128  }
  0x7a   : > { %1665 = vsyncadd (%p2171_p1), %s262_s4, 4294967168  ;;  %s270_s19 = sand.u32 1, %s1762_s18   ;;  %s274_s16 = scalar_lea.vmem [#allocation8], %s1942_s23 }
  0x7b   : > { %s271_s9 = scalar_lea.sflag [#allocation9], %s270_s19 }
  0x7c   : > { %1667 = dma.done.wait (%p2171_p1), %s271_s9, 256  }
  0x7d   : > { %1669 = vsyncadd (%p2171_p1), %s271_s9, 4294967040  ;;  %v1704_v0 = vmov 0.0   ;;  %vm1705_vm0 = vmmov 0   ;;  %vm753_vm1 = vcmask 523264   ;;  %v1488_v1 = vld [vmem:[%s274_s16] sm:$0xff]   ;;  %v1489_v3 = vld [vmem:[%s265_s8] sm:$0xff]   ;;  %v724_v5 = vlaneseq }
  0x7e   : > { %1380 = vmatprep.subr.bf16.mxu0 %v1704_v0  ;;  %1382 = vmatprep.mubr.msk.bf16.mxu0 %vm1705_vm0, %v1704_v0  ;;  %v758_v2 = vsel %vm753_vm1, %v1488_v1, 0  ;;  %vm329_vm2 = vcmask 7168   ;;  %v1706_v4 = vmov -1e+30   ;;  %vm805_vm4 = vcmask 130048   ;;  %v1490_v18 = vld [vmem:[%s274_s16] sm:$0xff]  }
  0x7f   : > { %1386 = vmatprep.subr.bf16.mxu1 %v1704_v0  ;;  %1388 = vmatprep.mubr.msk.bf16.mxu1 %vm1705_vm0, %v1704_v0  ;;  %330 = vst.msk [vmem:[#allocation2] sm:$0xff] %vm329_vm2, %v1706_v4  ;;  %331 = vst.msk [vmem:[#allocation2 + $0x8] sm:$0xff] %vm329_vm2, %v1706_v4  ;;  %v1983_v6 = vshrl.u32 %v724_v5, 7  ;;  %v1985_v7 = vand.u32 127, %v724_v5  ;;  %v1707_v17 = vmov 0   ;;  %s1708_s18 = smov 64  }
  0x80   : > { %1381 = vmatpush3.bf16.xpose.msra.mxu0 %v758_v2  ;;  %332 = vst.msk [vmem:[#allocation2 + $0x10] sm:$0xff] %vm329_vm2, %v1706_v4  ;;  %333 = vst.msk [vmem:[#allocation2 + $0x18] sm:$0xff] %vm329_vm2, %v1706_v4  ;;  %1486 = vset.pattern.permute.xlu1 %v1707_v17  ;;  %v1491_v27 = vld [vmem:[%s265_s8] sm:$0xff]   ;;  %s283_s24 = scalar_lea.vmem [#allocation10], %s1942_s23  ;;  %s1366_s20 = sshll.u32 %s1688_s15, 7 }
  0x81   : > { %1398 = vmatprep.subr.bf16.mxu0 %v1704_v0  ;;  %334 = vst.msk [vmem:[#allocation3] sm:$0xff] %vm329_vm2, %v1704_v0  ;;  %335 = vst.msk [vmem:[#allocation3 + $0x8] sm:$0xff] %vm329_vm2, %v1704_v0  ;;  %v1988_v8 = vadd.s32 8, %v1983_v6  ;;  %vm735_vm3 = vcmp.le.s32.totalorder %v1985_v7, %v1983_v6  ;;  %1487 = vset.pattern.permute.xlu0 %v1707_v17  ;;  %v1492_v28 = vld [vmem:[%s283_s24] sm:$0xff]   ;;  %s315_s11 = scalar_lea.vmem [#allocation11], %s1942_s23  ;;  %s2084_s6 = scalar_lea.hbm %s2140_s3, %s1366_s20 }
  0x82   : > { %336 = vst.msk [vmem:[#allocation3 + $0x10] sm:$0xff] %vm329_vm2, %v1704_v0  ;;  %337 = vst.msk [vmem:[#allocation3 + $0x18] sm:$0xff] %vm329_vm2, %v1704_v0  ;;  %1387 = vmatpush3.bf16.msra.mxu1 %v1492_v28  ;;  %v1493_v60 = vld [vmem:[%s283_s24] sm:$0xff]   ;;  %s1181_s5 = sshll.u32 %s315_s11, 4  ;;  %s1166_s15 = scalar_lea.sflag [#allocation7], %s1939_s22  ;;  %s2086_s5 = int_to_ptr.vmem [resolvable:$true] %s1181_s5 }
  0x83   : > { %vm736_vm5 = vcmp.le.s32.totalorder %v1985_v7, %v1988_v8  ;;  %1392 = vmatprep.subr.bf16.mxu1 %v1704_v0  ;;  %s1610_s10 = scalar_lea.vmem %s2086_s5, 128  ;;  %p2172_p6 = scmp.ne.s32.totalorder %s2158_s25, 0 }
  0x84   : > { %p1611_p0 = scmp.ne.s32.totalorder %s2086_s5, %s1610_s10  ;;  %s1709_s26 = smov [#allocation11]  }
  0x85   : > { %s1614_s1 = sshll.u32 %s1709_s26, 4  ;;  %s1615_s1 = int_to_ptr.vmem [resolvable:$false] %s1614_s1 }
  0x86   : > { %v2005_v19 = vld [vmem:[#allocation2] sm:$0xff]  ;;  %v2010_v22 = vld [vmem:[#allocation2 + $0x8] sm:$0xff]  ;;  %p1612_p8 = pnand %p1611_p0, %p2172_p6  ;;  %s1616_s29 = scalar_lea.vmem %s1615_s1, 256 }
  0x87   : > { %1383 = vmatmul.mubr.msk.bf16.vlgmr.msra.gmra.mrb[0].mxu0 %vm753_vm1, %v1489_v3  ;;  %v984_v53 = vld [vmem:[#allocation2 + $0x10] sm:$0xff]  ;;  %v985_v55 = vld [vmem:[#allocation2 + $0x18] sm:$0xff]  ;;  %p1617_p12 = scmp.lt.s32.totalorder %s2086_s5, %s1615_s1  ;;  %p1618_p4 = scmp.lt.s32.totalorder %s1616_s29, %s1610_s10 }
  0x88   : > { %1400 = vmatprep.mubr.msk.bf16.mxu0 %vm1705_vm0, %v1704_v0  ;;  %p1613_p9 = pneg %p1612_p8 }
  0x89   : > { %p1619_p10 = por %p1618_p4, %p1617_p12 }
  0x8b   : > { %p1620_p13 = pnand %p1619_p10, %p1613_p9 }
 0x15a   : > { %v794_v9 = vpop.f32.mrb[0].mxu0 }
 0x15b   : > { %v801_v10 = vsel %vm735_vm3, %v794_v9, -1e+30  ;;  %v1384_v11 = vpop.f32.mrb[1].mxu0 }
 0x15c   : > { %v797_v12 = vpop.f32.mrb[2].mxu0  ;;  %v806_v13 = vsel %vm805_vm4, %v801_v10, -inf }
 0x15d   : > { %v802_v14 = vsel %vm736_vm5, %v797_v12, -1e+30  ;;  %807 = vmax.xlane.f32.xlu0 %v806_v13  ;;  %v1385_v15 = vpop.f32.mrb[3].mxu0 }
 0x15e   : > { %v809_v16 = vsel %vm805_vm4, %v802_v14, -inf }
 0x161   : > { %810 = vmax.xlane.f32.xlu0 %v809_v16 }
 0x177   : > { %932 = vrot.lane.b32.xlu0 %v1490_v18, %s1708_s18 }
 0x1ea   : > { %v808_v20 = vpop.xlane.xlu0 %807 }
 0x1eb   : > { %v2008_v21 = vmax.f32 %v2005_v19, %v808_v20  ;;  %v837_v20 = vld [vmem:[#allocation3 + $0x8] sm:$0xff] }
 0x1ed   : > { %v814_v23 = vsub.f32 %v2005_v19, %v2008_v21  ;;  %851 = vst.msk [vmem:[#allocation2] sm:$0xff] %vm329_vm2, %v2008_v21  ;;  %822 = vperm.xlu1 %1486, %v2008_v21   ;;  %v836_v19 = vld [vmem:[#allocation3] sm:$0xff] }
 0x1ee   : > { %v811_v24 = vpop.xlane.xlu0 %810 }
 0x1ef   : > { %v2018_v25 = vmax.f32 %v2010_v22, %v811_v24 }
 0x1f1   : > { %v815_v26 = vsub.f32 %v2010_v22, %v2018_v25  ;;  %852 = vst.msk [vmem:[#allocation2 + $0x8] sm:$0xff] %vm329_vm2, %v2018_v25  ;;  %827 = vperm.xlu1 %1486, %v2018_v25  }
 0x1f2   : > { %v933_v35 = vpop.permute.xlu0 %932 }
 0x1f3   : > { %v938_v38 = vsel %vm753_vm1, %v933_v35, 0  ;;  %v818_v15 = vmul.f32 1.442695, %v815_v26  ;;  %v1018_v35 = vld [vmem:[#allocation3 + $0x18] sm:$0xff] }
 0x1f5   : > { %925 = vrot.lane.b32.xlu1 %v1491_v27, %s1708_s18 }
 0x26c   : > { %v823_v29 = vpop.permute.xlu1 %822 }
 0x26d   : > { %v830_v30 = vsub.f32 %v801_v10, %v823_v29 }
 0x26f   : > { %v832_v31 = vmul.f32 1.442695, %v830_v30 }
 0x270   : > { %v828_v32 = vpop.permute.xlu1 %827 }
 0x271   : > { %v831_v33 = vsub.f32 %v802_v14, %v828_v32  ;;  %1494 = vpow2.f32 %v832_v31  ;;  %v816_v14 = vmul.f32 1.442695, %v814_v23  ;;  %v1017_v32 = vld [vmem:[#allocation3 + $0x10] sm:$0xff] }
 0x273   : > { %v834_v34 = vmul.f32 1.442695, %v831_v33 }
 0x274   : > { %v926_v40 = vpop.permute.xlu1 %925 }
 0x275   : > { %1496 = vpow2.f32 %v834_v34 }
 0x27b   : > { %v1495_v36 = vpop.eup %1494 }
 0x27c   : > { %v840_v63 = vsel %vm805_vm4, %v1495_v36, 0.0 }
 0x27f   : > { %v1497_v37 = vpop.eup %1496 }
 0x280   : > { %v853_v39 = vpack.c.bf16 %v1497_v37, %v1495_v36  ;;  %v843_v61 = vsel %vm805_vm4, %v1497_v37, 0.0 }
 0x282   : > { %1389 = vmatmul.mubr.msk.bf16.vlgmr.msra.gmra.mrb[0].mxu1 %vm805_vm4, %v853_v39 }
 0x283   : > { %1393 = vmatpush3.bf16.xpose.msra.mxu1 %v938_v38  ;;  %1394 = vmatprep.mubr.msk.bf16.mxu1 %vm1705_vm0, %v1704_v0 }
 0x28a   : > { %1395 = vmatmul.mubr.msk.bf16.vlgmr.msra.gmra.mrb[4].mxu1 %vm753_vm1, %v926_v40 }
 0x355   : > { %v2037_v41 = vpop.f32.mrb[0].mxu1 }
 0x356   : > { %v1390_v42 = vpop.f32.mrb[1].mxu1 }
 0x357   : > { %v2039_v43 = vpop.f32.mrb[2].mxu1 }
 0x358   : > { %v1391_v44 = vpop.f32.mrb[3].mxu1 }
 0x35d   : > { %v974_v45 = vpop.f32.mrb[4].mxu1 }
 0x35e   : > { %v981_v46 = vsel %vm735_vm3, %v974_v45, -1e+30  ;;  %v1396_v47 = vpop.f32.mrb[5].mxu1 }
 0x35f   : > { %v977_v48 = vpop.f32.mrb[6].mxu1  ;;  %v986_v49 = vsel %vm805_vm4, %v981_v46, -inf }
 0x360   : > { %v982_v50 = vsel %vm736_vm5, %v977_v48, -1e+30  ;;  %987 = vmax.xlane.f32.xlu1 %v986_v49  ;;  %v1397_v51 = vpop.f32.mrb[7].mxu1 }
 0x361   : > { %v989_v52 = vsel %vm805_vm4, %v982_v50, -inf }
 0x362   : > { %990 = vmax.xlane.f32.xlu0 %v989_v52 }
 0x3ed   : > { %v988_v54 = vpop.xlane.xlu1 %987 }
 0x3ee   : > { %v992_v56 = vmax.f32 %v984_v53, %v988_v54 }
 0x3ef   : > { %v991_v57 = vpop.xlane.xlu0 %990 }
 0x3f0   : > { %v994_v58 = vsub.f32 %v984_v53, %v992_v56  ;;  %1031 = vst.msk [vmem:[#allocation2 + $0x10] sm:$0xff] %vm329_vm2, %v992_v56  ;;  %v993_v59 = vmax.f32 %v985_v55, %v991_v57  ;;  %1002 = vperm.xlu1 %1486, %v992_v56  }
 0x3f2   : > { %1032 = vst.msk [vmem:[#allocation2 + $0x18] sm:$0xff] %vm329_vm2, %v993_v59  ;;  %1007 = vperm.xlu0 %1487, %v993_v59   ;;  %v995_v62 = vsub.f32 %v985_v55, %v993_v59  ;;  %v996_v16 = vmul.f32 1.442695, %v994_v58 }
 0x3f4   : > { %1039 = vrot.lane.b32.xlu1 %v1493_v60, %s1708_s18  ;;  %v998_v0 = vmul.f32 1.442695, %v995_v62 }
 0x3f6   : > { %1498 = vpow2.f32 %v998_v0 }
 0x400   : > { %v1499_v1 = vpop.eup %1498 }
 0x401   : > { %v1020_v37 = vmul.f32 %v1499_v1, %v1018_v35 }
 0x411   : > { %844 = vadd.xlane.f32.xlu0 %v843_v61 }
 0x418   : > { %841 = vadd.xlane.f32.xlu1 %v840_v63 }
 0x427   : > { %1093 = vperm.xlu0 %1487, %v1499_v1  }
 0x46f   : > { %v1003_v2 = vpop.permute.xlu1 %1002 }
 0x470   : > { %v1010_v3 = vsub.f32 %v981_v46, %v1003_v2 }
 0x471   : > { %v1008_v4 = vpop.permute.xlu0 %1007 }
 0x472   : > { %v1012_v5 = vmul.f32 1.442695, %v1010_v3  ;;  %v1011_v6 = vsub.f32 %v982_v50, %v1008_v4 }
 0x473   : > { %v1040_v7 = vpop.permute.xlu1 %1039 }
 0x474   : > { %1500 = vpow2.f32 %v1012_v5  ;;  %v1014_v8 = vmul.f32 1.442695, %v1011_v6  ;;  %1399 = vmatpush3.bf16.msra.mxu0 %v1040_v7 }
 0x476   : > { %1502 = vpow2.f32 %v1014_v8 }
 0x477   : > { %1504 = vpow2.f32 %v816_v14 }
 0x478   : > { %1506 = vpow2.f32 %v818_v15 }
 0x479   : > { %1508 = vpow2.f32 %v996_v16 }
 0x47e   : > { %v1501_v9 = vpop.eup %1500 }
 0x47f   : > { %v1021_v10 = vsel %vm805_vm4, %v1501_v9, 0.0 }
 0x480   : > { %v1503_v11 = vpop.eup %1502  ;;  %1022 = vadd.xlane.f32.xlu1 %v1021_v10 }
 0x481   : > { %v1033_v12 = vpack.c.bf16 %v1503_v11, %v1501_v9  ;;  %v1024_v13 = vsel %vm805_vm4, %v1503_v11, 0.0  ;;  %v1505_v17 = vpop.eup %1504 }
 0x482   : > { %v1507_v18 = vpop.eup %1506  ;;  %v838_v21 = vmul.f32 %v1505_v17, %v836_v19 }
 0x483   : > { %1401 = vmatmul.mubr.msk.bf16.vlgmr.msra.gmra.mrb[4].mxu0 %vm805_vm4, %v1033_v12  ;;  %v1509_v24 = vpop.eup %1508  ;;  %v839_v27 = vmul.f32 %v1507_v18, %v837_v20 }
 0x484   : > { %1025 = vadd.xlane.f32.xlu1 %v1024_v13  ;;  %v1019_v33 = vmul.f32 %v1509_v24, %v1017_v32 }
 0x495   : > { %906 = vperm.xlu1 %1486, %v1505_v17  }
 0x499   : > { %911 = vperm.xlu1 %1486, %v1507_v18  }
 0x49d   : > { %1088 = vperm.xlu1 %1486, %v1509_v24  }
 0x49e   : > { %v845_v28 = vpop.xlane.xlu0 %844 }
 0x49f   : > { %v847_v29 = vadd.f32 %v845_v28, %v839_v27 }
 0x4a1   : > { %850 = vst.msk [vmem:[#allocation3 + $0x8] sm:$0xff] %vm329_vm2, %v847_v29 }
 0x4a5   : > { %v842_v23 = vpop.xlane.xlu1 %841 }
 0x4a6   : > { %v846_v22 = vadd.f32 %v842_v23, %v838_v21  ;;  %v1094_v58 = vpop.permute.xlu0 %1093 }
 0x4a8   : > { %849 = vst.msk [vmem:[#allocation3] sm:$0xff] %vm329_vm2, %v846_v22  ;;  %v1120_v26 = vld [vmem:[#allocation3 + $0x8] sm:$0xff] }
 0x4af   : > { %v1119_v25 = vld [vmem:[#allocation3] sm:$0xff] }
 0x4b0   : > { %1510 = vrcp.f32 %v1119_v25 }
 0x4b1   : > { %1512 = vrcp.f32 %v1120_v26 }
 0x4ba   : > { %v1511_v30 = vpop.eup %1510 }
 0x4bb   : > { %1125 = vperm.xlu1 %1486, %v1511_v30   ;;  %v1513_v31 = vpop.eup %1512 }
 0x4bf   : > { %1130 = vperm.xlu1 %1486, %v1513_v31  }
 0x50d   : > { %v1023_v34 = vpop.xlane.xlu1 %1022 }
 0x50e   : > { %v1027_v36 = vadd.f32 %v1023_v34, %v1019_v33 }
 0x510   : > { %1029 = vst.msk [vmem:[#allocation3 + $0x10] sm:$0xff] %vm329_vm2, %v1027_v36 }
 0x511   : > { %v1026_v38 = vpop.xlane.xlu1 %1025 }
 0x512   : > { %v1028_v39 = vadd.f32 %v1026_v38, %v1020_v37 }
 0x514   : > { %1030 = vst.msk [vmem:[#allocation3 + $0x18] sm:$0xff] %vm329_vm2, %v1028_v39 }
 0x515   : > { %v907_v50 = vpop.permute.xlu1 %906 }
 0x517   : > { %v1134_v40 = vld [vmem:[#allocation3 + $0x10] sm:$0xff] }
 0x518   : > { %1514 = vrcp.f32 %v1134_v40 }
 0x519   : > { %v912_v51 = vpop.permute.xlu1 %911 }
 0x51a   : > { %v1107_v59 = vsel %vm753_vm1, %v912_v51, %v1094_v58 }
 0x51b   : > { %v1135_v42 = vld [vmem:[#allocation3 + $0x18] sm:$0xff]  ;;  %v1111_v63 = vmul.f32 0.0, %v1107_v59 }
 0x51c   : > { %1516 = vrcp.f32 %v1135_v42 }
 0x51d   : > { %v1089_v52 = vpop.permute.xlu1 %1088 }
 0x51e   : > { %v1106_v57 = vsel %vm753_vm1, %v907_v50, %v1089_v52 }
 0x51f   : > { %v1110_v60 = vmul.f32 0.0, %v1106_v57 }
 0x522   : > { %v1515_v44 = vpop.eup %1514 }
 0x523   : > { %1140 = vperm.xlu1 %1486, %v1515_v44  }
 0x526   : > { %v1517_v45 = vpop.eup %1516 }
 0x527   : > { %1145 = vperm.xlu1 %1486, %v1517_v45  }
 0x53a   : > { %v1126_v53 = vpop.permute.xlu1 %1125 }
 0x53e   : > { %v1131_v54 = vpop.permute.xlu1 %1130 }
 0x556   : > { %v1079_v46 = vpop.f32.mrb[4].mxu0 }
 0x557   : > { %v1402_v47 = vpop.f32.mrb[5].mxu0  ;;  %1098 = vrot.lane.b32.xlu1 %v1079_v46, %s1708_s18 }
 0x558   : > { %v1082_v48 = vpop.f32.mrb[6].mxu0 }
 0x559   : > { %v1403_v49 = vpop.f32.mrb[7].mxu0  ;;  %1100 = vrot.lane.b32.xlu0 %v1082_v48, %s1708_s18 }
 0x5a2   : > { %v1141_v55 = vpop.permute.xlu1 %1140 }
 0x5a3   : > { %v1149_v4 = vsel %vm753_vm1, %v1126_v53, %v1141_v55 }
 0x5a6   : > { %v1146_v56 = vpop.permute.xlu1 %1145 }
 0x5a7   : > { %v1150_v5 = vsel %vm753_vm1, %v1131_v54, %v1146_v56 }
 0x5c9   : > { %v1099_v61 = vpop.permute.xlu1 %1098 }
 0x5ca   : > { %v1104_v62 = vsel %vm753_vm1, %v2037_v41, %v1099_v61 }
 0x5cb   : > { %v1112_v0 = vadd.f32 %v1110_v60, %v1104_v62  ;;  %v1101_v1 = vpop.permute.xlu0 %1100 }
 0x5cc   : > { %v1105_v2 = vsel %vm753_vm1, %v2039_v43, %v1101_v1 }
 0x5cd   : > { %v1113_v3 = vadd.f32 %v1111_v63, %v1105_v2  ;;  %v1153_v6 = vmul.f32 %v1149_v4, %v1112_v0 }
 0x5cf   : > { %v1154_v7 = vmul.f32 %v1150_v5, %v1113_v3 }
 0x5d1   : > { %v1370_v41 = vpack.c.bf16 %v1154_v7, %v1153_v6 }
 0x5d3   : > { %1371 = vst [vmem:[%s315_s11] sm:$0xff] %v1370_v41  }
 0x5d4   : > { %1623 = shalt.err (!%p1620_p13)
}
 0x5d5   : > { %s1624_s21 = scalar_lea.hbm %s2084_s6, 128  ;;  %s1628_s23 = scalar_lea.hbm %s2140_s3, 256 }
 0x5d6   : > { %p1625_p11 = scmp.ne.s32.totalorder %s2084_s6, %s1624_s21  ;;  %p1629_p5 = scmp.lt.u32.totalorder %s2084_s6, %s2140_s3 }
 0x5d7   : > { %p1630_p2 = scmp.lt.u32.totalorder %s1628_s23, %s1624_s21  ;;  %p1632_p0 = scmp.lt.u32.totalorder %s1624_s21, %s2084_s6 }
 0x5d8   : > { %p1626_p7 = pnand %p1625_p11, %p2172_p6 }
 0x5d9   : > { %p1631_p1 = por %p1630_p2, %p1629_p5 }
 0x5da   : > { %p1627_p3 = pneg %p1626_p7 }
 0x5db   : > { %p1633_p8 = por %p1632_p0, %p1631_p1 }
 0x5dd   : > { %p1634_p9 = pnand %p1633_p8, %p1627_p3 }
 0x5df   : > { %1637 = shalt.err (!%p1634_p9)
}
 0x5e0   : > { %s1710_s19 = smov 4  }
 0x5e1   : > { %1411 = dma.vmem_to_hbm [thread:$0]  (%p2172_p6), %s2086_s5, 128, %s2084_s6, %s1166_s15, %s1708_s18, %s1708_s18, %s1710_s19  }
 0x5e2 PF: > { %s1196_s9 = sand.u32 1, %s1676_s12   ;;  %p2173_p12 = scmp.ne.s32.totalorder %s2160_s27, 0 }
 0x5e3   : > { %p2174_p4 = scmp.ge.s32.totalorder %s1696_s17, 2  ;;  %s1197_s16 = scalar_lea.sflag [#allocation7], %s1196_s9 }
 0x5e5   : > { %p1424_p10 = pnand %p2174_p4, %p2173_p12 }
 0x5e7   : > { %1671 = dma.done.wait (!%p1424_p10), %s1197_s16, 128  }
 0x5e8   : > { %1673 = vsyncadd (!%p1424_p10), %s1197_s16, 4294967168  ;;  %s22_s17 = sadd.s32 1, %s1696_s17   ;;  %s2175_s25 = sld [smem:[#allocation17_spill]] }
 0x5e9   : > { %p19_p13 = scmp.ge.s32.totalorder %s22_s17, 4   ;;  %s2176_s15 = sld [smem:[#allocation15_spill]] }
 0x5ea   : > { %s2177_s16 = sld [smem:[#allocation16_spill]]  ;;  %s2178_s12 = smov %s1680_s13 }
 0x5eb   : > { %s2179_s13 = smov %s1684_s14  ;;  %21 = sbr.rel (!%p19_p13) target bundleno = 11 (0xb), region = 122 }
 0x5ee   : > { %s2180_s14 = smov %s2175_s25 }
 0x5f2   :  { %1202 = vsyncpa [#allocation6], 1 }
 0x5f3   :  { %1204 = vsyncpa [#allocation6 + $0x1], 1 }
 0x5f4   :  { %1205 = vsyncpa [#allocation9], 1 }
 0x5f5   :  { %1207 = vsyncpa [#allocation9 + $0x1], 1 }
 0x5f6   :  { %1208 = vsyncpa [#allocation7], 1 }
 0x5f7   :  { %1210 = vsyncpa [#allocation7 + $0x1], 1 }

// kernel: block_forward.9
= control target key start
LH: loop header
LB: loop body
LE: loop exit
PB: predicated region body
PF: predicated region fallthrough
CT: control target
= control target key end

     0   :  { %9 = vsyncpa [#allocation3], 0  ;;  %s891_s0 = inlined_call_operand.hbm [shape: bf16[32,512], index: 0, kind: input, shape index: {}]   ;;  %s892_s1 = inlined_call_operand.hbm [shape: bf16[512,128], index: 1, kind: input, shape index: {}]   ;;  %s893_s2 = inlined_call_operand.hbm [shape: f32[1,128], index: 2, kind: input, shape index: {}]   ;;  %s894_s3 = inlined_call_operand.hbm [shape: f32[32,128], index: 3, kind: input, shape index: {}]   ;;  %s895_s4 = inlined_call_operand.hbm [shape: f32[32,128], index: 4, kind: output, shape index: {}]  }
   0x1   :  { %10 = vsyncpa [#allocation6], 0 }
   0x2   :  { %11 = vsyncpa [#allocation9], 0 }
   0x3   :  { %12 = vsyncpa [#allocation4], 0  ;;  %s782_s15 = smov [#allocation5]   ;;  %s664_s19 = scalar_lea.hbm %s892_s1, 4096 }
   0x4   :  { %s30_s16 = sshll.u32 %s782_s15, 4  ;;  %p665_p0 = scmp.ne.s32.totalorder %s892_s1, %s664_s19  ;;  %s31_s16 = int_to_ptr.vmem [resolvable:$true] %s30_s16 }
   0x5   :  { %p668_p1 = scmp.lt.u32.totalorder %s664_s19, %s892_s1 }
   0x7   :  { %p670_p2 = pnand %p668_p1, %p665_p0 }
   0x9   :  { %673 = shalt.err (!%p670_p2)
}
   0xa   :  { %s674_s24 = scalar_lea.vmem %s31_s16, 4096  ;;  %p679_p4 = scmp.lt.s32.totalorder %s31_s16, %s31_s16 }
   0xb   :  { %p675_p3 = scmp.ne.s32.totalorder %s31_s16, %s674_s24  ;;  %p680_p5 = scmp.lt.s32.totalorder %s674_s24, %s674_s24 }
   0xd   :  { %p681_p6 = por %p680_p5, %p679_p4 }
   0xf   :  { %p682_p7 = pnand %p681_p6, %p675_p3 }
  0x11   :  { %685 = shalt.err (!%p682_p7)
}
  0x12   :  { %s783_s25 = smov 64   ;;  %s784_s26 = smov 4  }
  0x13   :  { %36 = dma.hbm_to_vmem [thread:$0]  %s892_s1, 4096, %s31_s16, [#allocation6], %s783_s25, %s783_s25, %s784_s26  }
  0x14   :  { %s785_s29 = smov [#allocation2]   ;;  %s686_s7 = scalar_lea.hbm %s891_s0, 1024 }
  0x15   :  { %s18_s30 = sshll.u32 %s785_s29, 4  ;;  %p687_p8 = scmp.ne.s32.totalorder %s891_s0, %s686_s7  ;;  %s19_s30 = int_to_ptr.vmem [resolvable:$true] %s18_s30 }
  0x16   :  { %p690_p9 = scmp.lt.u32.totalorder %s686_s7, %s891_s0 }
  0x18   :  { %p692_p10 = pnand %p690_p9, %p687_p8 }
  0x1a   :  { %695 = shalt.err (!%p692_p10)
}
  0x1b   :  { %s696_s12 = scalar_lea.vmem %s19_s30, 1024  ;;  %p701_p12 = scmp.lt.s32.totalorder %s19_s30, %s19_s30 }
  0x1c   :  { %p697_p11 = scmp.ne.s32.totalorder %s19_s30, %s696_s12  ;;  %p702_p13 = scmp.lt.s32.totalorder %s696_s12, %s696_s12 }
  0x1e   :  { %p703_p0 = por %p702_p13, %p701_p12 }
  0x20   :  { %p704_p1 = pnand %p703_p0, %p697_p11 }
  0x22   :  { %707 = shalt.err (!%p704_p1)
}
  0x23   :  { %s786_s1 = smov 256   ;;  %s787_s13 = smov 16  }
  0x24   :  { %24 = dma.hbm_to_vmem [thread:$0]  %s891_s0, 1024, %s19_s30, [#allocation3], %s786_s1, %s786_s1, %s787_s13  }
  0x25   :  { %s788_s16 = smov [#allocation7]   ;;  %s789_s18 = smov [#allocation8]  }
  0x26   :  { %s43_s17 = sshll.u32 %s788_s16, 4  ;;  %s52_s19 = sshll.u32 %s789_s18, 4  ;;  %s44_s17 = int_to_ptr.vmem [resolvable:$true] %s43_s17  ;;  %s842_s19 = int_to_ptr.vmem [resolvable:$true] %s52_s19 }
  0x27   :  { %s708_s22 = scalar_lea.hbm %s893_s2, 16 }
  0x28   :  { %p709_p2 = scmp.ne.s32.totalorder %s893_s2, %s708_s22  ;;  %p712_p3 = scmp.lt.u32.totalorder %s708_s22, %s893_s2 }
  0x2a   :  { %p714_p4 = pnand %p712_p3, %p709_p2 }
  0x2c   :  { %717 = shalt.err (!%p714_p4)
}
  0x2d   :  { %s718_s0 = scalar_lea.vmem %s44_s17, 16  ;;  %s722_s27 = scalar_lea.vmem %s44_s17, 32 }
  0x2e   :  { %p719_p5 = scmp.ne.s32.totalorder %s44_s17, %s718_s0  ;;  %p723_p6 = scmp.lt.s32.totalorder %s44_s17, %s44_s17 }
  0x2f   :  { %p724_p7 = scmp.lt.s32.totalorder %s722_s27, %s718_s0 }
  0x31   :  { %p725_p8 = por %p724_p7, %p723_p6 }
  0x33   :  { %p726_p9 = pnand %p725_p8, %p719_p5 }
  0x35   :  { %729 = shalt.err (!%p726_p9)
}
  0x36   :  { %46 = dma.hbm_to_vmem [thread:$0]  %s893_s2, 16, %s44_s17, [#allocation6]  }
  0x37   :  { %s730_s6 = scalar_lea.hbm %s894_s3, 512 }
  0x38   :  { %p731_p10 = scmp.ne.s32.totalorder %s894_s3, %s730_s6  ;;  %p734_p11 = scmp.lt.u32.totalorder %s730_s6, %s894_s3 }
  0x3a   :  { %p736_p12 = pnand %p734_p11, %p731_p10 }
  0x3c   :  { %739 = shalt.err (!%p736_p12)
}
  0x3d   :  { %s740_s11 = scalar_lea.vmem %s842_s19, 512  ;;  %p745_p0 = scmp.lt.s32.totalorder %s842_s19, %s842_s19 }
  0x3e   :  { %p741_p13 = scmp.ne.s32.totalorder %s842_s19, %s740_s11  ;;  %p746_p1 = scmp.lt.s32.totalorder %s740_s11, %s740_s11 }
  0x40   :  { %p747_p2 = por %p746_p1, %p745_p0 }
  0x42   :  { %p748_p3 = pnand %p747_p2, %p741_p13 }
  0x44   :  { %751 = shalt.err (!%p748_p3)
}
  0x45   :  { %s790_s2 = smov 128   ;;  %s791_s12 = smov 8  }
  0x46   :  { %58 = dma.hbm_to_vmem [thread:$0]  %s894_s3, 512, %s842_s19, [#allocation9], %s790_s2, %s790_s2, %s791_s12  }
  0x47   :  { %774 = dma.done.wait [#allocation3], 1024  }
  0x48   :  { %775 = vsyncadd [#allocation3], 4294966272 }
  0x49   :  { %776 = dma.done.wait [#allocation6], 4112  }
  0x4a   :  { %777 = vsyncadd [#allocation6], 4294963184 }
  0x4b   :  { %778 = dma.done.wait [#allocation9], 512  }
  0x4c   :  { %779 = vsyncadd [#allocation9], 4294966784  ;;  %v620_v0 = vld [vmem:[#allocation5 + $0x40] sm:$0xff]   ;;  %v624_v4 = vld [vmem:[#allocation5 + $0x48] sm:$0xff]   ;;  %s792_s3 = smov [#allocation10]  }
  0x4d   :  { %v621_v1 = vld [vmem:[#allocation5 + $0xc0] sm:$0xff]   ;;  %553 = vmatprep.subr.bf16.mxu0 %v620_v0  ;;  %v625_v5 = vld [vmem:[#allocation5 + $0xc8] sm:$0xff]   ;;  %v628_v8 = vld [vmem:[#allocation5 + $0x50] sm:$0xff]   ;;  %s498_s14 = sshll.u32 %s792_s3, 4  ;;  %s499_s14 = int_to_ptr.vmem [resolvable:$true] %s498_s14 }
  0x4e   :  { %v622_v2 = vld [vmem:[#allocation5] sm:$0xff]   ;;  %581 = vmatprep.subr.bf16.mxu1 %v621_v1  ;;  %v626_v6 = vld [vmem:[#allocation5 + $0x8] sm:$0xff]   ;;  %v629_v9 = vld [vmem:[#allocation5 + $0xd0] sm:$0xff]   ;;  %s752_s15 = scalar_lea.vmem %s499_s14, 512  ;;  %p757_p5 = scmp.lt.s32.totalorder %s499_s14, %s499_s14 }
  0x4f   :  { %v623_v3 = vld [vmem:[#allocation5 + $0x80] sm:$0xff]   ;;  %554 = vmatpush3.bf16.msra.mxu0 %v622_v2  ;;  %v627_v7 = vld [vmem:[#allocation5 + $0x88] sm:$0xff]   ;;  %v630_v10 = vld [vmem:[#allocation5 + $0x10] sm:$0xff]   ;;  %p753_p4 = scmp.ne.s32.totalorder %s499_s14, %s752_s15  ;;  %p758_p6 = scmp.lt.s32.totalorder %s752_s15, %s752_s15 }
  0x50   :  { %582 = vmatpush3.bf16.msra.mxu1 %v623_v3  ;;  %555 = vmatprep.subr.bf16.mxu0 %v624_v4  ;;  %v631_v11 = vld [vmem:[#allocation5 + $0x90] sm:$0xff]   ;;  %v632_v12 = vld [vmem:[#allocation5 + $0x58] sm:$0xff]   ;;  %v636_v16 = vld [vmem:[#allocation5 + $0x60] sm:$0xff]  }
  0x51   :  { %583 = vmatprep.subr.bf16.mxu1 %v625_v5  ;;  %v633_v13 = vld [vmem:[#allocation5 + $0xd8] sm:$0xff]   ;;  %v637_v17 = vld [vmem:[#allocation5 + $0xe0] sm:$0xff]   ;;  %v640_v20 = vld [vmem:[#allocation5 + $0x68] sm:$0xff]   ;;  %p759_p7 = por %p758_p6, %p757_p5 }
  0x52   :  { %v634_v14 = vld [vmem:[#allocation5 + $0x18] sm:$0xff]   ;;  %v638_v18 = vld [vmem:[#allocation5 + $0x20] sm:$0xff]   ;;  %v641_v21 = vld [vmem:[#allocation5 + $0xe8] sm:$0xff]  }
  0x53   :  { %556 = vmatpush3.bf16.msra.mxu0 %v626_v6  ;;  %v635_v15 = vld [vmem:[#allocation5 + $0x98] sm:$0xff]   ;;  %v639_v19 = vld [vmem:[#allocation5 + $0xa0] sm:$0xff]   ;;  %v642_v22 = vld [vmem:[#allocation5 + $0x28] sm:$0xff]   ;;  %p760_p8 = pnand %p759_p7, %p753_p4 }
  0x54   :  { %584 = vmatpush3.bf16.msra.mxu1 %v627_v7  ;;  %557 = vmatprep.subr.bf16.mxu0 %v628_v8  ;;  %v643_v23 = vld [vmem:[#allocation5 + $0xa8] sm:$0xff]   ;;  %v644_v24 = vld [vmem:[#allocation5 + $0x70] sm:$0xff]   ;;  %v648_v28 = vld [vmem:[#allocation5 + $0x78] sm:$0xff]  }
  0x55   :  { %585 = vmatprep.subr.bf16.mxu1 %v629_v9  ;;  %v645_v25 = vld [vmem:[#allocation5 + $0xf0] sm:$0xff]   ;;  %v649_v29 = vld [vmem:[#allocation5 + $0xf8] sm:$0xff]   ;;  %v512_v42 = vld [vmem:[#allocation7] ss:$0 sm:$0xff] }
  0x56   :  { %v646_v26 = vld [vmem:[#allocation5 + $0x30] sm:$0xff]   ;;  %v650_v30 = vld [vmem:[#allocation5 + $0x38] sm:$0xff]   ;;  %v481_v53 = vld [vmem:[#allocation8] sm:$0xff] }
  0x57   :  { %558 = vmatpush3.bf16.msra.mxu0 %v630_v10  ;;  %v647_v27 = vld [vmem:[#allocation5 + $0xb0] sm:$0xff]   ;;  %v651_v31 = vld [vmem:[#allocation5 + $0xb8] sm:$0xff]  }
  0x58   :  { %586 = vmatpush3.bf16.msra.mxu1 %v631_v11  ;;  %559 = vmatprep.subr.bf16.mxu0 %v632_v12  ;;  %v652_v32 = vld [vmem:[#allocation2] ss:$16 sps:$4 sm:$0xff]   ;;  %v654_v33 = vld [vmem:[#allocation2 + $0x4] ss:$16 sps:$4 sm:$0xff]   ;;  %v655_v34 = vld [vmem:[#allocation2 + $0x8] ss:$16 sps:$4 sm:$0xff]  }
  0x59   :  { %587 = vmatprep.subr.bf16.mxu1 %v633_v13  ;;  %v657_v35 = vld [vmem:[#allocation2 + $0xc] ss:$16 sps:$4 sm:$0xff]   ;;  %415 = vmatprep.mubr.bf16.mxu0 %v654_v33  ;;  %v658_v36 = vld [vmem:[#allocation2 + $0x24] ss:$16 sps:$4 sm:$0xff]   ;;  %v662_v38 = vld [vmem:[#allocation2 + $0x20] ss:$16 sps:$4 sm:$0xff]  }
  0x5a   :  { %464 = vmatprep.mubr.bf16.mxu1 %v657_v35  ;;  %v660_v37 = vld [vmem:[#allocation2 + $0x2c] ss:$16 sps:$4 sm:$0xff]   ;;  %v663_v39 = vld [vmem:[#allocation2 + $0x28] ss:$16 sps:$4 sm:$0xff]  }
  0x5b   :  { %560 = vmatpush3.bf16.msra.mxu0 %v634_v14  ;;  %v482_v57 = vld [vmem:[#allocation8 + $0x8] sm:$0xff]  ;;  %v483_v9 = vld [vmem:[#allocation8 + $0x10] sm:$0xff]  ;;  %v484_v13 = vld [vmem:[#allocation8 + $0x18] sm:$0xff] }
  0x5c   :  { %588 = vmatpush3.bf16.msra.mxu1 %v635_v15  ;;  %561 = vmatprep.subr.bf16.mxu0 %v636_v16 }
  0x5d   :  { %589 = vmatprep.subr.bf16.mxu1 %v637_v17 }
  0x5f   :  { %562 = vmatpush3.bf16.msra.mxu0 %v638_v18 }
  0x60   :  { %590 = vmatpush3.bf16.msra.mxu1 %v639_v19  ;;  %563 = vmatprep.subr.bf16.mxu0 %v640_v20 }
  0x61   :  { %591 = vmatprep.subr.bf16.mxu1 %v641_v21 }
  0x63   :  { %564 = vmatpush3.bf16.msra.mxu0 %v642_v22 }
  0x64   :  { %592 = vmatpush3.bf16.msra.mxu1 %v643_v23  ;;  %565 = vmatprep.subr.bf16.mxu0 %v644_v24 }
  0x65   :  { %593 = vmatprep.subr.bf16.mxu1 %v645_v25 }
  0x67   :  { %566 = vmatpush3.bf16.msra.mxu0 %v646_v26 }
  0x68   :  { %594 = vmatpush3.bf16.msra.mxu1 %v647_v27  ;;  %567 = vmatprep.subr.bf16.mxu0 %v648_v28 }
  0x69   :  { %595 = vmatprep.subr.bf16.mxu1 %v649_v29 }
  0x6b   :  { %568 = vmatpush3.bf16.msra.mxu0 %v650_v30 }
  0x6c   :  { %596 = vmatpush3.bf16.msra.mxu1 %v651_v31 }
  0x6e   :  { %416 = vmatmul.mubr.bf16.vlgmr.msra.gmra.mrb[0].mxu0 %v652_v32 }
  0x6f   :  { %465 = vmatmul.mubr.bf16.vlgmr.msra.gmra.mrb[0].mxu1 %v655_v34  ;;  %423 = vmatprep.mubr.bf16.mxu0 %v658_v36 }
  0x70   :  { %472 = vmatprep.mubr.bf16.mxu1 %v660_v37 }
  0x76   :  { %424 = vmatmul.mubr.bf16.gmra.mrb[4].mxu0 %v662_v38 }
  0x77   :  { %473 = vmatmul.mubr.bf16.gmra.mrb[4].mxu1 %v663_v39 }
 0x141   :  { %v569_v40 = vpop.f32.mrb[0].mxu0 }
 0x142   :  { %v597_v41 = vpop.f32.mrb[0].mxu1  ;;  %v570_v43 = vpop.f32.mrb[1].mxu0 }
 0x143   :  { %v571_v44 = vadd.f32 %v570_v43, %v569_v40  ;;  %v598_v45 = vpop.f32.mrb[1].mxu1  ;;  %v572_v46 = vpop.f32.mrb[2].mxu0 }
 0x144   :  { %v599_v47 = vadd.f32 %v598_v45, %v597_v41  ;;  %v600_v48 = vpop.f32.mrb[2].mxu1  ;;  %v573_v49 = vpop.f32.mrb[3].mxu0 }
 0x145   :  { %v418_v50 = vadd.f32 %v571_v44, %v512_v42  ;;  %v574_v51 = vadd.f32 %v573_v49, %v572_v46  ;;  %v601_v52 = vpop.f32.mrb[3].mxu1 }
 0x146   :  { %v602_v54 = vadd.f32 %v601_v52, %v600_v48 }
 0x147   :  { %v467_v55 = vadd.f32 %v599_v47, %v418_v50  ;;  %v421_v56 = vadd.f32 %v574_v51, %v512_v42 }
 0x149   :  { %v485_v58 = vadd.f32 %v481_v53, %v467_v55  ;;  %v470_v59 = vadd.f32 %v602_v54, %v421_v56  ;;  %v575_v60 = vpop.f32.mrb[4].mxu0 }
 0x14a   :  { %v603_v61 = vpop.f32.mrb[4].mxu1  ;;  %v576_v62 = vpop.f32.mrb[5].mxu0 }
 0x14b   :  { %489 = vst [vmem:[#allocation10] sm:$0xff] %v485_v58  ;;  %v486_v63 = vadd.f32 %v482_v57, %v470_v59  ;;  %v577_v0 = vadd.f32 %v576_v62, %v575_v60  ;;  %v604_v1 = vpop.f32.mrb[5].mxu1  ;;  %v578_v2 = vpop.f32.mrb[6].mxu0 }
 0x14c   :  { %v605_v3 = vadd.f32 %v604_v1, %v603_v61  ;;  %v606_v4 = vpop.f32.mrb[6].mxu1  ;;  %v579_v5 = vpop.f32.mrb[7].mxu0 }
 0x14d   :  { %490 = vst [vmem:[#allocation10 + $0x8] sm:$0xff] %v486_v63  ;;  %v426_v6 = vadd.f32 %v577_v0, %v512_v42  ;;  %v580_v7 = vadd.f32 %v579_v5, %v578_v2  ;;  %v607_v8 = vpop.f32.mrb[7].mxu1 }
 0x14e   :  { %v608_v10 = vadd.f32 %v607_v8, %v606_v4 }
 0x14f   :  { %v475_v11 = vadd.f32 %v605_v3, %v426_v6  ;;  %v429_v12 = vadd.f32 %v580_v7, %v512_v42 }
 0x151   :  { %v487_v14 = vadd.f32 %v483_v9, %v475_v11  ;;  %v478_v15 = vadd.f32 %v608_v10, %v429_v12 }
 0x153   :  { %491 = vst [vmem:[#allocation10 + $0x10] sm:$0xff] %v487_v14  ;;  %v488_v16 = vadd.f32 %v484_v13, %v478_v15 }
 0x155   :  { %492 = vst [vmem:[#allocation10 + $0x18] sm:$0xff] %v488_v16 }
 0x156   :  { %763 = shalt.err (!%p760_p8)
}
 0x157   :  { %s764_s18 = scalar_lea.hbm %s895_s4, 512 }
 0x158   :  { %p765_p9 = scmp.ne.s32.totalorder %s895_s4, %s764_s18  ;;  %p768_p10 = scmp.lt.u32.totalorder %s764_s18, %s895_s4 }
 0x15a   :  { %p770_p11 = pnand %p768_p10, %p765_p9 }
 0x15c   :  { %773 = shalt.err (!%p770_p11)
}
 0x15d   :  { %504 = dma.vmem_to_hbm [thread:$0]  %s499_s14, 512, %s895_s4, [#allocation4], %s790_s2, %s790_s2, %s791_s12  }
 0x15e   :  { %780 = dma.done.wait [#allocation4], 512  }
 0x15f   :  { %781 = vsyncadd [#allocation4], 4294966784 }
 0x160   :  { %508 = vsyncpa [#allocation3], 1 }
 0x161   :  { %509 = vsyncpa [#allocation6], 1 }
 0x162   :  { %510 = vsyncpa [#allocation9], 1 }
 0x163   :  { %511 = vsyncpa [#allocation4], 1 }

</bundles_post_ra>
